<compile_context>
chip_gen: v7x
topology: tpu7x:2x2x1
jax: 0.10.0
libtpu: 0.0.40
codegen_flags: <defaults>
</compile_context>

<pallas_src>
import functools
import math

import jax
import jax.numpy as jnp
from jax.experimental import pallas as pl
from jax.experimental.pallas import tpu as pltpu


_NEG_INF = -1e30
_LN_EPS = 1e-5
_ARB = pltpu.CompilerParams(dimension_semantics=("arbitrary",))


# ------------------------------ in-kernel helpers ------------------------------

def _gelu(x):
    c = math.sqrt(2.0 / math.pi)
    return 0.5 * x * (1.0 + jnp.tanh(c * (x + 0.044715 * x * x * x)))


def _softmax_last(x):
    m = jnp.max(x, axis=-1, keepdims=True)
    e = jnp.exp(x - m)
    return e / jnp.sum(e, axis=-1, keepdims=True)


def _layer_norm(x, g, b):
    mu = jnp.mean(x, axis=-1, keepdims=True)
    var = jnp.mean(jnp.square(x - mu), axis=-1, keepdims=True)
    return (x - mu) * jax.lax.rsqrt(var + _LN_EPS) * g + b


def _bf16(x):
    return x.astype(jnp.bfloat16)


def _dot(a, b):
    # bf16 MXU inputs, f32 accumulation.
    return jnp.dot(_bf16(a), _bf16(b), preferred_element_type=jnp.float32)


def _full_spec(shape):
    rank = len(shape)
    return pl.BlockSpec(shape, lambda *_: (0,) * rank)


def _pad_up(n, mult=128):
    return ((n + mult - 1) // mult) * mult


# ------------------------------ fused transformer layer ------------------------------

def _layer_kernel(x_ref, wqkv_ref, bqkv_ref, wo_ref, bo_ref,
                  ln1g_ref, ln1b_ref, w1_ref, b1_ref, w2_ref, b2_ref,
                  ln2g_ref, ln2b_ref, o_ref, *, L, N, H, Dh):
    E = H * Dh
    LN = L * N
    x = x_ref[...]                                               # (L*N, E) f32

    # fused QKV projection: one (LN,E)@(E,3E) MXU pass, lane-dense output
    qkv = _dot(x, wqkv_ref[...]) + bqkv_ref[...]                 # (LN, 3E)
    q, k, v = qkv[:, :E], qkv[:, E:2 * E], qkv[:, 2 * E:]

    # validity mask: row r = l*N + n may only attend to rows with the same n
    row = jax.lax.broadcasted_iota(jnp.int32, (LN, LN), 0)
    col = jax.lax.broadcasted_iota(jnp.int32, (LN, LN), 1)
    diff = row - col
    same_n = diff == 0
    for d in range(1, L):
        same_n = same_n | (diff == d * N) | (diff == -d * N)

    scale = 1.0 / math.sqrt(Dh)
    # per-head attention (statically unrolled); the output projection is
    # accumulated head-by-head so the (LN, E) result stays lane-dense.
    attn = jnp.broadcast_to(bo_ref[...], (LN, E))
    for h in range(H):
        lo, hi = h * Dh, (h + 1) * Dh
        qh, kh, vh = _bf16(q[:, lo:hi]), _bf16(k[:, lo:hi]), _bf16(v[:, lo:hi])
        s = jax.lax.dot_general(qh, kh, (((1,), (1,)), ((), ())),
                                preferred_element_type=jnp.float32) * scale
        s = jnp.where(same_n, s, _NEG_INF)
        p = _softmax_last(s)
        ch = _dot(p, vh)                                         # (LN, Dh)
        attn = attn + _dot(ch, wo_ref[lo:hi, :])                 # (LN, E)

    # add & LayerNorm 1
    x1 = _layer_norm(x + attn, ln1g_ref[...], ln1b_ref[...])

    # feed-forward (gelu)
    h1 = _gelu(_dot(x1, w1_ref[...]) + b1_ref[...])
    h2 = _dot(h1, w2_ref[...]) + b2_ref[...]

    # add & LayerNorm 2
    o_ref[...] = _layer_norm(x1 + h2, ln2g_ref[...], ln2b_ref[...])


def transformer_layer(x2d, p, *, L, N, H):
    LN, E = x2d.shape
    Dh = E // H
    args = (x2d, p["w_qkv"], p["b_qkv"], p["w_o"], p["b_o"],
            p["ln1_g"], p["ln1_b"], p["w1"], p["b1"], p["w2"], p["b2"],
            p["ln2_g"], p["ln2_b"])
    return pl.pallas_call(
        functools.partial(_layer_kernel, L=L, N=N, H=H, Dh=Dh),
        grid=(1,),
        in_specs=[_full_spec(a.shape) for a in args],
        out_specs=_full_spec((LN, E)),
        out_shape=jax.ShapeDtypeStruct((LN, E), jnp.float32),
        compiler_params=_ARB,
    )(*args)


# --------------------- mean-pool + context / personality / emotion ---------------------

def _heads_kernel(x_ref, cw1_ref, cb1_ref, cw2_ref, cb2_ref,
                  pw1_ref, pb1_ref, pw2_ref, pb2_ref,
                  ew1_ref, eb1_ref, ew2_ref, eb2_ref,
                  ctx_ref, per_ref, emo_ref, *, L, N):
    x = x_ref[...]                                               # (L*N, E)
    # mean-pool over the seq axis (dim 1 of the original (B, S, E))
    pooled = jnp.concatenate(
        [jnp.mean(x[l * N:(l + 1) * N, :], axis=0, keepdims=True)
         for l in range(L)], axis=0)                             # (L, E)

    # context analyzer
    hc = _gelu(_dot(pooled, cw1_ref[...]) + cb1_ref[...])
    context = _dot(hc, cw2_ref[...]) + cb2_ref[...]              # (L, E)
    ctx_ref[...] = context

    # personality head (weights zero-padded to a 128-lane-dense output width)
    hp = _gelu(_dot(context, pw1_ref[...]) + pb1_ref[...])
    per_ref[...] = _dot(hp, pw2_ref[...]) + pb2_ref[...]

    # emotion head: padded logits get bias -1e30 so softmax over 128 == softmax over 7
    he = _gelu(_dot(context, ew1_ref[...]) + eb1_ref[...])
    emo_ref[...] = _softmax_last(_dot(he, ew2_ref[...]) + eb2_ref[...])


def pooled_heads(x2d, params, *, L, N):
    E = x2d.shape[1]
    args = (x2d,
            params["ctx_w1"], params["ctx_b1"], params["ctx_w2"], params["ctx_b2"],
            params["per_w1"], params["per_b1"], params["per_w2"], params["per_b2"],
            params["emo_w1"], params["emo_b1"], params["emo_w2"], params["emo_b2"])
    p_pad = params["per_w2"].shape[1]
    e_pad = params["emo_w2"].shape[1]
    out_shape = (jax.ShapeDtypeStruct((L, E), jnp.float32),
                 jax.ShapeDtypeStruct((L, p_pad), jnp.float32),
                 jax.ShapeDtypeStruct((L, e_pad), jnp.float32))
    return pl.pallas_call(
        functools.partial(_heads_kernel, L=L, N=N),
        grid=(1,),
        in_specs=[_full_spec(a.shape) for a in args],
        out_specs=tuple(_full_spec(s.shape) for s in out_shape),
        out_shape=out_shape,
        compiler_params=_ARB,
    )(*args)


# ----------------------- memory attention + response generator -----------------------

def _mem_resp_kernel(ctx_ref, per_ref, emo_ref, mem_ref,
                     mwq_ref, mbq_ref, mwkv_ref, mbkv_ref, mwo_ref, mbo_ref,
                     rw1c_ref, rw1p_ref, rw1e_ref, rb1_ref, rw2_ref, rb2_ref,
                     logits_ref, newctx_ref, *, H, Dh, n_mem, use_memory):
    E = H * Dh
    context = ctx_ref[...]                                       # (B, E)
    B = context.shape[0]

    if use_memory:
        # project the memory bank ONCE (shared across batch), K/V fused
        q = _dot(context, mwq_ref[...]) + mbq_ref[...]           # (B, E)
        kv = _dot(mem_ref[...], mwkv_ref[...]) + mbkv_ref[...]   # (M_pad, 2E)
        kk, vv = kv[:, :E], kv[:, E:]
        key_valid = jax.lax.broadcasted_iota(
            jnp.int32, (B, mem_ref.shape[0]), 1) < n_mem
        scale = 1.0 / math.sqrt(Dh)
        attn = jnp.broadcast_to(mbo_ref[...], (B, E))
        for h in range(H):
            lo, hi = h * Dh, (h + 1) * Dh
            qh, kh, vh = _bf16(q[:, lo:hi]), _bf16(kk[:, lo:hi]), _bf16(vv[:, lo:hi])
            s = jax.lax.dot_general(qh, kh, (((1,), (1,)), ((), ())),
                                    preferred_element_type=jnp.float32) * scale
            s = jnp.where(key_valid, s, _NEG_INF)
            p = _softmax_last(s)
            ch = _dot(p, vh)                                     # (B, Dh)
            attn = attn + _dot(ch, mwo_ref[lo:hi, :])            # (B, E)
        context = context + attn

    newctx_ref[...] = context

    # response generator: combined = [context | personality | emotion] realised as
    # three row-blocks of W1 (padded inputs x zero-padded weight rows) -> no concat.
    h1 = (_dot(context, rw1c_ref[...]) + _dot(per_ref[...], rw1p_ref[...])
          + _dot(emo_ref[...], rw1e_ref[...]) + rb1_ref[...])
    h1 = _gelu(h1)
    logits_ref[...] = _dot(h1, rw2_ref[...]) + rb2_ref[...]


def memory_response(context, per_pad, emo_pad, mem_pad, params, *, H, n_mem, use_memory):
    B, E = context.shape
    Dh = E // H
    vocab = params["resp_w2"].shape[1]
    args = (context, per_pad, emo_pad, mem_pad,
            params["mem_wq"], params["mem_bq"], params["mem_wkv"], params["mem_bkv"],
            params["mem_wo"], params["mem_bo"],
            params["resp_w1_ctx"], params["resp_w1_per"], params["resp_w1_emo"],
            params["resp_b1"], params["resp_w2"], params["resp_b2"])
    out_shape = (jax.ShapeDtypeStruct((B, vocab), jnp.float32),
                 jax.ShapeDtypeStruct((B, E), jnp.float32))
    return pl.pallas_call(
        functools.partial(_mem_resp_kernel, H=H, Dh=Dh, n_mem=n_mem,
                          use_memory=use_memory),
        grid=(1,),
        in_specs=[_full_spec(a.shape) for a in args],
        out_specs=tuple(_full_spec(s.shape) for s in out_shape),
        out_shape=out_shape,
        compiler_params=_ARB,
    )(*args)


# ------------------------------------ forward ------------------------------------

def maxv1_forward(params, input_ids, *, num_heads, use_memory=True):
    B, S = input_ids.shape
    E = params["embedding"].shape[1]

    # embedding lookup + positional encoding (gather glue kept in XLA)
    x = params["embedding"][input_ids] + params["pos_enc"][:S][None, :, :]

    # batch_first=False misuse reproduced: dim 0 (batch) is the "sequence" axis,
    # dim 1 (seq) the "batch" axis.  Rows ordered (l, n) = (batch, seq).
    L, N = B, S
    x2 = x.reshape(L * N, E)
    for lp in params["layers"]:
        x2 = transformer_layer(x2, lp, L=L, N=N, H=num_heads)

    context0, per_pad, emo_pad = pooled_heads(x2, params, L=L, N=N)

    mem = params["memory_bank"]
    m_pad = _pad_up(mem.shape[0])
    mem_pad = jnp.pad(mem, ((0, m_pad - mem.shape[0]), (0, 0)))

    logits, context = memory_response(
        context0, per_pad, emo_pad, mem_pad, params,
        H=num_heads, n_mem=mem.shape[0], use_memory=use_memory)

    return {
        "logits": logits,
        "context": context,
        "personality": per_pad[:, :64],
        "emotion": emo_pad[:, :7],
        "attention_weights": x2.reshape(B, S, E),
    }


# ----------------------------------- param init -----------------------------------

def init_params(key, vocab_size, embed_dim, hidden_dim, num_layers):
    keys = iter(jax.random.split(key, 512))

    def wf32(shape, scale):
        return scale * jax.random.normal(next(keys), shape, jnp.float32)

    def w(shape, scale=0.02):                    # matmul weights -> bf16 storage
        return wf32(shape, scale).astype(jnp.bfloat16)

    def zeros(shape):
        return jnp.zeros(shape, jnp.float32)

    def ones(shape):
        return jnp.ones(shape, jnp.float32)

    E, HID, V = embed_dim, hidden_dim, vocab_size
    P_OUT, P_PAD = 64, _pad_up(64)
    EM_OUT, EM_PAD = 7, _pad_up(7)

    def layer_params():
        return dict(
            w_qkv=w((E, 3 * E)), b_qkv=zeros((1, 3 * E)),
            w_o=w((E, E)), b_o=zeros((1, E)),
            ln1_g=ones((1, E)), ln1_b=zeros((1, E)),
            ln2_g=ones((1, E)), ln2_b=zeros((1, E)),
            w1=w((E, HID)), b1=zeros((1, HID)),
            w2=w((HID, E)), b2=zeros((1, E)),
        )

    # padded head weights (lane-dense 128-wide outputs; wrapper slices the results)
    per_w2 = jnp.pad(wf32((256, P_OUT), 0.02),
                     ((0, 0), (0, P_PAD - P_OUT))).astype(jnp.bfloat16)
    per_b2 = zeros((1, P_PAD))
    emo_w2 = jnp.pad(wf32((128, EM_OUT), 0.02),
                     ((0, 0), (0, EM_PAD - EM_OUT))).astype(jnp.bfloat16)
    emo_b2 = jnp.full((1, EM_PAD), _NEG_INF, jnp.float32).at[:, :EM_OUT].set(0.0)

    # response first layer split into row-blocks matching [context|personality|emotion]
    resp_w1_ctx = w((E, HID))
    resp_w1_per = jnp.pad(wf32((P_OUT, HID), 0.02),
                          ((0, P_PAD - P_OUT), (0, 0))).astype(jnp.bfloat16)
    resp_w1_emo = jnp.pad(wf32((EM_OUT, HID), 0.02),
                          ((0, EM_PAD - EM_OUT), (0, 0))).astype(jnp.bfloat16)

    return dict(
        embedding=wf32((V, E), 1.0),
        pos_enc=wf32((1000, E), 1.0),
        layers=[layer_params() for _ in range(num_layers)],
        ctx_w1=w((E, HID)), ctx_b1=zeros((1, HID)),
        ctx_w2=w((HID, E)), ctx_b2=zeros((1, E)),
        per_w1=w((E, 256)), per_b1=zeros((1, 256)),
        per_w2=per_w2, per_b2=per_b2,
        emo_w1=w((E, 128)), emo_b1=zeros((1, 128)),
        emo_w2=emo_w2, emo_b2=emo_b2,
        resp_w1_ctx=resp_w1_ctx, resp_w1_per=resp_w1_per, resp_w1_emo=resp_w1_emo,
        resp_b1=zeros((1, HID)),
        resp_w2=w((HID, V)), resp_b2=zeros((1, V)),
        memory_bank=wf32((100, E), 1.0),
        mem_wq=w((E, E)), mem_bq=zeros((1, E)),
        mem_wkv=w((E, 2 * E)), mem_bkv=zeros((1, 2 * E)),
        mem_wo=w((E, E)), mem_bo=zeros((1, E)),
    )


# -------------------------------------- main --------------------------------------

if __name__ == "__main__":
    VOCAB = 256
    EMBED = 128
    HIDDEN = 256
    NUM_LAYERS = 2
    NUM_HEADS = 4
    BATCH = 2
    SEQ = 8

    root = jax.random.PRNGKey(0)
    k_param, k_ids = jax.random.split(root)
    params = init_params(k_param, VOCAB, EMBED, HIDDEN, NUM_LAYERS)
    input_ids = jax.random.randint(k_ids, (BATCH, SEQ), 0, VOCAB, dtype=jnp.int32)

    fwd = jax.jit(functools.partial(maxv1_forward, num_heads=NUM_HEADS, use_memory=True))
    out = fwd(params, input_ids)
    jax.block_until_ready(out)

    assert out["logits"].shape == (BATCH, VOCAB)
    assert out["context"].shape == (BATCH, EMBED)
    assert out["personality"].shape == (BATCH, 64)
    assert out["emotion"].shape == (BATCH, 7)
    assert out["attention_weights"].shape == (BATCH, SEQ, EMBED)
    assert bool(jnp.all(jnp.isfinite(out["logits"])))
    # emotion rows sum to 1 (softmax over the 7 real logits; padded lanes are 0)
    assert bool(jnp.allclose(jnp.sum(out["emotion"], axis=-1), 1.0, atol=1e-4))

    print("KERNEL_OK")
</pallas_src>

<mosaic_0001>
module attributes {stable_mosaic.version = 11 : i64} {
  func.func @_layer_kernel(%arg0: i32, %arg1: memref<16x128xf32, #tpu.memory_space<vmem>>, %arg2: memref<128x384xbf16, #tpu.memory_space<vmem>>, %arg3: memref<1x384xf32, #tpu.memory_space<vmem>>, %arg4: memref<128x128xbf16, #tpu.memory_space<vmem>>, %arg5: memref<1x128xf32, #tpu.memory_space<vmem>>, %arg6: memref<1x128xf32, #tpu.memory_space<vmem>>, %arg7: memref<1x128xf32, #tpu.memory_space<vmem>>, %arg8: memref<128x256xbf16, #tpu.memory_space<vmem>>, %arg9: memref<1x256xf32, #tpu.memory_space<vmem>>, %arg10: memref<256x128xbf16, #tpu.memory_space<vmem>>, %arg11: memref<1x128xf32, #tpu.memory_space<vmem>>, %arg12: memref<1x128xf32, #tpu.memory_space<vmem>>, %arg13: memref<1x128xf32, #tpu.memory_space<vmem>>, %arg14: memref<16x128xf32, #tpu.memory_space<vmem>>) attributes {dimension_semantics = [#tpu.dimension_semantics<arbitrary>], iteration_bounds = array<i64: 1>, scalar_prefetch = 0 : i64, scratch_operands = 0 : i64, tpu.core_type = #tpu.core_type<tc>, window_params = [{pipeline_mode = #tpu.pipeline_mode<synchronous>, transform_indices = @transform_0, window_bounds = array<i64: 16, 128>}, {pipeline_mode = #tpu.pipeline_mode<synchronous>, transform_indices = @transform_1, window_bounds = array<i64: 128, 384>}, {pipeline_mode = #tpu.pipeline_mode<synchronous>, transform_indices = @transform_2, window_bounds = array<i64: 1, 384>}, {pipeline_mode = #tpu.pipeline_mode<synchronous>, transform_indices = @transform_3, window_bounds = array<i64: 128, 128>}, {pipeline_mode = #tpu.pipeline_mode<synchronous>, transform_indices = @transform_4, window_bounds = array<i64: 1, 128>}, {pipeline_mode = #tpu.pipeline_mode<synchronous>, transform_indices = @transform_5, window_bounds = array<i64: 1, 128>}, {pipeline_mode = #tpu.pipeline_mode<synchronous>, transform_indices = @transform_6, window_bounds = array<i64: 1, 128>}, {pipeline_mode = #tpu.pipeline_mode<synchronous>, transform_indices = @transform_7, window_bounds = array<i64: 128, 256>}, {pipeline_mode = #tpu.pipeline_mode<synchronous>, transform_indices = @transform_8, window_bounds = array<i64: 1, 256>}, {pipeline_mode = #tpu.pipeline_mode<synchronous>, transform_indices = @transform_9, window_bounds = array<i64: 256, 128>}, {pipeline_mode = #tpu.pipeline_mode<synchronous>, transform_indices = @transform_10, window_bounds = array<i64: 1, 128>}, {pipeline_mode = #tpu.pipeline_mode<synchronous>, transform_indices = @transform_11, window_bounds = array<i64: 1, 128>}, {pipeline_mode = #tpu.pipeline_mode<synchronous>, transform_indices = @transform_12, window_bounds = array<i64: 1, 128>}, {pipeline_mode = #tpu.pipeline_mode<synchronous>, transform_indices = @transform_13, window_bounds = array<i64: 16, 128>}]} {
    %c0 = arith.constant 0 : index
    %c0_0 = arith.constant 0 : index
    %0 = vector.load %arg1[%c0, %c0_0] : memref<16x128xf32, #tpu.memory_space<vmem>>, vector<16x128xf32>
    %c0_1 = arith.constant 0 : index
    %c0_2 = arith.constant 0 : index
    %1 = vector.load %arg2[%c0_1, %c0_2] : memref<128x384xbf16, #tpu.memory_space<vmem>>, vector<128x384xbf16>
    %2 = arith.truncf %0 : vector<16x128xf32> to vector<16x128xbf16>
    %cst = arith.constant dense<0.000000e+00> : vector<16x384xf32>
    %3 = tpu.matmul %2, %1, %cst {dimension_numbers = #tpu.dot_dimension_numbers<[1], [0], [0], [1], [0, 0, 1, 1], [], []>} : vector<16x128xbf16>, vector<128x384xbf16>, vector<16x384xf32> -> vector<16x384xf32>
    %c0_3 = arith.constant 0 : index
    %c0_4 = arith.constant 0 : index
    %4 = vector.load %arg3[%c0_3, %c0_4] : memref<1x384xf32, #tpu.memory_space<vmem>>, vector<1x384xf32>
    %5 = vector.broadcast %4 : vector<1x384xf32> to vector<16x384xf32>
    %6 = arith.addf %3, %5 : vector<16x384xf32>
    %7 = vector.extract_strided_slice %6 {offsets = [0, 0], sizes = [16, 128], strides = [1, 1]} : vector<16x384xf32> to vector<16x128xf32>
    %8 = vector.extract_strided_slice %6 {offsets = [0, 128], sizes = [16, 128], strides = [1, 1]} : vector<16x384xf32> to vector<16x128xf32>
    %9 = vector.extract_strided_slice %6 {offsets = [0, 256], sizes = [16, 128], strides = [1, 1]} : vector<16x384xf32> to vector<16x128xf32>
    %10 = tpu.iota {dimensions = array<i32: 0>} : vector<16x16xi32>
    %11 = tpu.iota {dimensions = array<i32: 1>} : vector<16x16xi32>
    %12 = arith.subi %10, %11 : vector<16x16xi32>
    %c0_i32 = arith.constant 0 : i32
    %13 = vector.broadcast %c0_i32 : i32 to vector<16x16xi32>
    %14 = arith.cmpi eq, %12, %13 : vector<16x16xi32>
    %c8_i32 = arith.constant 8 : i32
    %15 = vector.broadcast %c8_i32 : i32 to vector<16x16xi32>
    %16 = arith.cmpi eq, %12, %15 : vector<16x16xi32>
    %17 = arith.ori %14, %16 : vector<16x16xi1>
    %c-8_i32 = arith.constant -8 : i32
    %18 = vector.broadcast %c-8_i32 : i32 to vector<16x16xi32>
    %19 = arith.cmpi eq, %12, %18 : vector<16x16xi32>
    %20 = arith.ori %17, %19 : vector<16x16xi1>
    %c0_5 = arith.constant 0 : index
    %c0_6 = arith.constant 0 : index
    %21 = vector.load %arg5[%c0_5, %c0_6] : memref<1x128xf32, #tpu.memory_space<vmem>>, vector<1x128xf32>
    %22 = vector.shape_cast %21 : vector<1x128xf32> to vector<1x128xf32>
    %23 = vector.broadcast %22 : vector<1x128xf32> to vector<16x128xf32>
    %24 = vector.extract_strided_slice %7 {offsets = [0, 0], sizes = [16, 32], strides = [1, 1]} : vector<16x128xf32> to vector<16x32xf32>
    %25 = arith.truncf %24 : vector<16x32xf32> to vector<16x32xbf16>
    %26 = vector.extract_strided_slice %8 {offsets = [0, 0], sizes = [16, 32], strides = [1, 1]} : vector<16x128xf32> to vector<16x32xf32>
    %27 = arith.truncf %26 : vector<16x32xf32> to vector<16x32xbf16>
    %28 = vector.extract_strided_slice %9 {offsets = [0, 0], sizes = [16, 32], strides = [1, 1]} : vector<16x128xf32> to vector<16x32xf32>
    %29 = arith.truncf %28 : vector<16x32xf32> to vector<16x32xbf16>
    %cst_7 = arith.constant dense<0.000000e+00> : vector<16x16xf32>
    %30 = tpu.matmul %25, %27, %cst_7 {dimension_numbers = #tpu.dot_dimension_numbers<[1], [1], [0], [0], [0, 0, 1, 0], [], []>} : vector<16x32xbf16>, vector<16x32xbf16>, vector<16x16xf32> -> vector<16x16xf32>
    %cst_8 = arith.constant 0.176776692 : f32
    %31 = vector.broadcast %cst_8 : f32 to vector<16x16xf32>
    %32 = arith.mulf %30, %31 : vector<16x16xf32>
    %cst_9 = arith.constant -1.000000e+30 : f32
    %33 = vector.broadcast %cst_9 : f32 to vector<16x16xf32>
    %34 = arith.select %20, %32, %33 : vector<16x16xi1>, vector<16x16xf32>
    %cst_10 = arith.constant dense<0xFF800000> : vector<16xf32>
    %35 = vector.multi_reduction <maximumf>, %34, %cst_10 [1] : vector<16x16xf32> to vector<16xf32>
    %36 = vector.shape_cast %35 : vector<16xf32> to vector<16x1xf32>
    %37 = vector.broadcast %36 : vector<16x1xf32> to vector<16x16xf32>
    %38 = arith.subf %34, %37 : vector<16x16xf32>
    %39 = math.exp %38 : vector<16x16xf32>
    %cst_11 = arith.constant dense<0.000000e+00> : vector<16xf32>
    %40 = vector.multi_reduction <add>, %39, %cst_11 [1] : vector<16x16xf32> to vector<16xf32>
    %41 = vector.shape_cast %40 : vector<16xf32> to vector<16x1xf32>
    %42 = vector.broadcast %41 : vector<16x1xf32> to vector<16x16xf32>
    %43 = arith.divf %39, %42 : vector<16x16xf32>
    %44 = arith.truncf %43 : vector<16x16xf32> to vector<16x16xbf16>
    %cst_12 = arith.constant dense<0.000000e+00> : vector<16x32xf32>
    %45 = tpu.matmul %44, %29, %cst_12 {dimension_numbers = #tpu.dot_dimension_numbers<[1], [0], [0], [1], [0, 0, 1, 1], [], []>} : vector<16x16xbf16>, vector<16x32xbf16>, vector<16x32xf32> -> vector<16x32xf32>
    %c0_13 = arith.constant 0 : index
    %c0_14 = arith.constant 0 : index
    %46 = vector.load %arg4[%c0_13, %c0_14] : memref<128x128xbf16, #tpu.memory_space<vmem>>, vector<32x128xbf16>
    %47 = arith.truncf %45 : vector<16x32xf32> to vector<16x32xbf16>
    %cst_15 = arith.constant dense<0.000000e+00> : vector<16x128xf32>
    %48 = tpu.matmul %47, %46, %cst_15 {dimension_numbers = #tpu.dot_dimension_numbers<[1], [0], [0], [1], [0, 0, 1, 1], [], []>} : vector<16x32xbf16>, vector<32x128xbf16>, vector<16x128xf32> -> vector<16x128xf32>
    %49 = arith.addf %23, %48 : vector<16x128xf32>
    %50 = vector.extract_strided_slice %7 {offsets = [0, 32], sizes = [16, 32], strides = [1, 1]} : vector<16x128xf32> to vector<16x32xf32>
    %51 = arith.truncf %50 : vector<16x32xf32> to vector<16x32xbf16>
    %52 = vector.extract_strided_slice %8 {offsets = [0, 32], sizes = [16, 32], strides = [1, 1]} : vector<16x128xf32> to vector<16x32xf32>
    %53 = arith.truncf %52 : vector<16x32xf32> to vector<16x32xbf16>
    %54 = vector.extract_strided_slice %9 {offsets = [0, 32], sizes = [16, 32], strides = [1, 1]} : vector<16x128xf32> to vector<16x32xf32>
    %55 = arith.truncf %54 : vector<16x32xf32> to vector<16x32xbf16>
    %cst_16 = arith.constant dense<0.000000e+00> : vector<16x16xf32>
    %56 = tpu.matmul %51, %53, %cst_16 {dimension_numbers = #tpu.dot_dimension_numbers<[1], [1], [0], [0], [0, 0, 1, 0], [], []>} : vector<16x32xbf16>, vector<16x32xbf16>, vector<16x16xf32> -> vector<16x16xf32>
    %cst_17 = arith.constant 0.176776692 : f32
    %57 = vector.broadcast %cst_17 : f32 to vector<16x16xf32>
    %58 = arith.mulf %56, %57 : vector<16x16xf32>
    %cst_18 = arith.constant -1.000000e+30 : f32
    %59 = vector.broadcast %cst_18 : f32 to vector<16x16xf32>
    %60 = arith.select %20, %58, %59 : vector<16x16xi1>, vector<16x16xf32>
    %cst_19 = arith.constant dense<0xFF800000> : vector<16xf32>
    %61 = vector.multi_reduction <maximumf>, %60, %cst_19 [1] : vector<16x16xf32> to vector<16xf32>
    %62 = vector.shape_cast %61 : vector<16xf32> to vector<16x1xf32>
    %63 = vector.broadcast %62 : vector<16x1xf32> to vector<16x16xf32>
    %64 = arith.subf %60, %63 : vector<16x16xf32>
    %65 = math.exp %64 : vector<16x16xf32>
    %cst_20 = arith.constant dense<0.000000e+00> : vector<16xf32>
    %66 = vector.multi_reduction <add>, %65, %cst_20 [1] : vector<16x16xf32> to vector<16xf32>
    %67 = vector.shape_cast %66 : vector<16xf32> to vector<16x1xf32>
    %68 = vector.broadcast %67 : vector<16x1xf32> to vector<16x16xf32>
    %69 = arith.divf %65, %68 : vector<16x16xf32>
    %70 = arith.truncf %69 : vector<16x16xf32> to vector<16x16xbf16>
    %cst_21 = arith.constant dense<0.000000e+00> : vector<16x32xf32>
    %71 = tpu.matmul %70, %55, %cst_21 {dimension_numbers = #tpu.dot_dimension_numbers<[1], [0], [0], [1], [0, 0, 1, 1], [], []>} : vector<16x16xbf16>, vector<16x32xbf16>, vector<16x32xf32> -> vector<16x32xf32>
    %c32 = arith.constant 32 : index
    %c0_22 = arith.constant 0 : index
    %72 = vector.load %arg4[%c32, %c0_22] : memref<128x128xbf16, #tpu.memory_space<vmem>>, vector<32x128xbf16>
    %73 = arith.truncf %71 : vector<16x32xf32> to vector<16x32xbf16>
    %cst_23 = arith.constant dense<0.000000e+00> : vector<16x128xf32>
    %74 = tpu.matmul %73, %72, %cst_23 {dimension_numbers = #tpu.dot_dimension_numbers<[1], [0], [0], [1], [0, 0, 1, 1], [], []>} : vector<16x32xbf16>, vector<32x128xbf16>, vector<16x128xf32> -> vector<16x128xf32>
    %75 = arith.addf %49, %74 : vector<16x128xf32>
    %76 = vector.extract_strided_slice %7 {offsets = [0, 64], sizes = [16, 32], strides = [1, 1]} : vector<16x128xf32> to vector<16x32xf32>
    %77 = arith.truncf %76 : vector<16x32xf32> to vector<16x32xbf16>
    %78 = vector.extract_strided_slice %8 {offsets = [0, 64], sizes = [16, 32], strides = [1, 1]} : vector<16x128xf32> to vector<16x32xf32>
    %79 = arith.truncf %78 : vector<16x32xf32> to vector<16x32xbf16>
    %80 = vector.extract_strided_slice %9 {offsets = [0, 64], sizes = [16, 32], strides = [1, 1]} : vector<16x128xf32> to vector<16x32xf32>
    %81 = arith.truncf %80 : vector<16x32xf32> to vector<16x32xbf16>
    %cst_24 = arith.constant dense<0.000000e+00> : vector<16x16xf32>
    %82 = tpu.matmul %77, %79, %cst_24 {dimension_numbers = #tpu.dot_dimension_numbers<[1], [1], [0], [0], [0, 0, 1, 0], [], []>} : vector<16x32xbf16>, vector<16x32xbf16>, vector<16x16xf32> -> vector<16x16xf32>
    %cst_25 = arith.constant 0.176776692 : f32
    %83 = vector.broadcast %cst_25 : f32 to vector<16x16xf32>
    %84 = arith.mulf %82, %83 : vector<16x16xf32>
    %cst_26 = arith.constant -1.000000e+30 : f32
    %85 = vector.broadcast %cst_26 : f32 to vector<16x16xf32>
    %86 = arith.select %20, %84, %85 : vector<16x16xi1>, vector<16x16xf32>
    %cst_27 = arith.constant dense<0xFF800000> : vector<16xf32>
    %87 = vector.multi_reduction <maximumf>, %86, %cst_27 [1] : vector<16x16xf32> to vector<16xf32>
    %88 = vector.shape_cast %87 : vector<16xf32> to vector<16x1xf32>
    %89 = vector.broadcast %88 : vector<16x1xf32> to vector<16x16xf32>
    %90 = arith.subf %86, %89 : vector<16x16xf32>
    %91 = math.exp %90 : vector<16x16xf32>
    %cst_28 = arith.constant dense<0.000000e+00> : vector<16xf32>
    %92 = vector.multi_reduction <add>, %91, %cst_28 [1] : vector<16x16xf32> to vector<16xf32>
    %93 = vector.shape_cast %92 : vector<16xf32> to vector<16x1xf32>
    %94 = vector.broadcast %93 : vector<16x1xf32> to vector<16x16xf32>
    %95 = arith.divf %91, %94 : vector<16x16xf32>
    %96 = arith.truncf %95 : vector<16x16xf32> to vector<16x16xbf16>
    %cst_29 = arith.constant dense<0.000000e+00> : vector<16x32xf32>
    %97 = tpu.matmul %96, %81, %cst_29 {dimension_numbers = #tpu.dot_dimension_numbers<[1], [0], [0], [1], [0, 0, 1, 1], [], []>} : vector<16x16xbf16>, vector<16x32xbf16>, vector<16x32xf32> -> vector<16x32xf32>
    %c64 = arith.constant 64 : index
    %c0_30 = arith.constant 0 : index
    %98 = vector.load %arg4[%c64, %c0_30] : memref<128x128xbf16, #tpu.memory_space<vmem>>, vector<32x128xbf16>
    %99 = arith.truncf %97 : vector<16x32xf32> to vector<16x32xbf16>
    %cst_31 = arith.constant dense<0.000000e+00> : vector<16x128xf32>
    %100 = tpu.matmul %99, %98, %cst_31 {dimension_numbers = #tpu.dot_dimension_numbers<[1], [0], [0], [1], [0, 0, 1, 1], [], []>} : vector<16x32xbf16>, vector<32x128xbf16>, vector<16x128xf32> -> vector<16x128xf32>
    %101 = arith.addf %75, %100 : vector<16x128xf32>
    %102 = vector.extract_strided_slice %7 {offsets = [0, 96], sizes = [16, 32], strides = [1, 1]} : vector<16x128xf32> to vector<16x32xf32>
    %103 = arith.truncf %102 : vector<16x32xf32> to vector<16x32xbf16>
    %104 = vector.extract_strided_slice %8 {offsets = [0, 96], sizes = [16, 32], strides = [1, 1]} : vector<16x128xf32> to vector<16x32xf32>
    %105 = arith.truncf %104 : vector<16x32xf32> to vector<16x32xbf16>
    %106 = vector.extract_strided_slice %9 {offsets = [0, 96], sizes = [16, 32], strides = [1, 1]} : vector<16x128xf32> to vector<16x32xf32>
    %107 = arith.truncf %106 : vector<16x32xf32> to vector<16x32xbf16>
    %cst_32 = arith.constant dense<0.000000e+00> : vector<16x16xf32>
    %108 = tpu.matmul %103, %105, %cst_32 {dimension_numbers = #tpu.dot_dimension_numbers<[1], [1], [0], [0], [0, 0, 1, 0], [], []>} : vector<16x32xbf16>, vector<16x32xbf16>, vector<16x16xf32> -> vector<16x16xf32>
    %cst_33 = arith.constant 0.176776692 : f32
    %109 = vector.broadcast %cst_33 : f32 to vector<16x16xf32>
    %110 = arith.mulf %108, %109 : vector<16x16xf32>
    %cst_34 = arith.constant -1.000000e+30 : f32
    %111 = vector.broadcast %cst_34 : f32 to vector<16x16xf32>
    %112 = arith.select %20, %110, %111 : vector<16x16xi1>, vector<16x16xf32>
    %cst_35 = arith.constant dense<0xFF800000> : vector<16xf32>
    %113 = vector.multi_reduction <maximumf>, %112, %cst_35 [1] : vector<16x16xf32> to vector<16xf32>
    %114 = vector.shape_cast %113 : vector<16xf32> to vector<16x1xf32>
    %115 = vector.broadcast %114 : vector<16x1xf32> to vector<16x16xf32>
    %116 = arith.subf %112, %115 : vector<16x16xf32>
    %117 = math.exp %116 : vector<16x16xf32>
    %cst_36 = arith.constant dense<0.000000e+00> : vector<16xf32>
    %118 = vector.multi_reduction <add>, %117, %cst_36 [1] : vector<16x16xf32> to vector<16xf32>
    %119 = vector.shape_cast %118 : vector<16xf32> to vector<16x1xf32>
    %120 = vector.broadcast %119 : vector<16x1xf32> to vector<16x16xf32>
    %121 = arith.divf %117, %120 : vector<16x16xf32>
    %122 = arith.truncf %121 : vector<16x16xf32> to vector<16x16xbf16>
    %cst_37 = arith.constant dense<0.000000e+00> : vector<16x32xf32>
    %123 = tpu.matmul %122, %107, %cst_37 {dimension_numbers = #tpu.dot_dimension_numbers<[1], [0], [0], [1], [0, 0, 1, 1], [], []>} : vector<16x16xbf16>, vector<16x32xbf16>, vector<16x32xf32> -> vector<16x32xf32>
    %c96 = arith.constant 96 : index
    %c0_38 = arith.constant 0 : index
    %124 = vector.load %arg4[%c96, %c0_38] : memref<128x128xbf16, #tpu.memory_space<vmem>>, vector<32x128xbf16>
    %125 = arith.truncf %123 : vector<16x32xf32> to vector<16x32xbf16>
    %cst_39 = arith.constant dense<0.000000e+00> : vector<16x128xf32>
    %126 = tpu.matmul %125, %124, %cst_39 {dimension_numbers = #tpu.dot_dimension_numbers<[1], [0], [0], [1], [0, 0, 1, 1], [], []>} : vector<16x32xbf16>, vector<32x128xbf16>, vector<16x128xf32> -> vector<16x128xf32>
    %127 = arith.addf %101, %126 : vector<16x128xf32>
    %128 = arith.addf %0, %127 : vector<16x128xf32>
    %c0_40 = arith.constant 0 : index
    %c0_41 = arith.constant 0 : index
    %129 = vector.load %arg6[%c0_40, %c0_41] : memref<1x128xf32, #tpu.memory_space<vmem>>, vector<1x128xf32>
    %c0_42 = arith.constant 0 : index
    %c0_43 = arith.constant 0 : index
    %130 = vector.load %arg7[%c0_42, %c0_43] : memref<1x128xf32, #tpu.memory_space<vmem>>, vector<1x128xf32>
    %cst_44 = arith.constant dense<0.000000e+00> : vector<16xf32>
    %131 = vector.multi_reduction <add>, %128, %cst_44 [1] : vector<16x128xf32> to vector<16xf32>
    %132 = vector.shape_cast %131 : vector<16xf32> to vector<16x1xf32>
    %cst_45 = arith.constant 1.280000e+02 : f32
    %133 = vector.broadcast %cst_45 : f32 to vector<16x1xf32>
    %134 = arith.divf %132, %133 : vector<16x1xf32>
    %135 = vector.broadcast %134 : vector<16x1xf32> to vector<16x128xf32>
    %136 = arith.subf %128, %135 : vector<16x128xf32>
    %137 = arith.mulf %136, %136 : vector<16x128xf32>
    %cst_46 = arith.constant dense<0.000000e+00> : vector<16xf32>
    %138 = vector.multi_reduction <add>, %137, %cst_46 [1] : vector<16x128xf32> to vector<16xf32>
    %139 = vector.shape_cast %138 : vector<16xf32> to vector<16x1xf32>
    %cst_47 = arith.constant 1.280000e+02 : f32
    %140 = vector.broadcast %cst_47 : f32 to vector<16x1xf32>
    %141 = arith.divf %139, %140 : vector<16x1xf32>
    %142 = vector.broadcast %134 : vector<16x1xf32> to vector<16x128xf32>
    %143 = arith.subf %128, %142 : vector<16x128xf32>
    %cst_48 = arith.constant 9.99999974E-6 : f32
    %144 = vector.broadcast %cst_48 : f32 to vector<16x1xf32>
    %145 = arith.addf %141, %144 : vector<16x1xf32>
    %146 = math.rsqrt %145 : vector<16x1xf32>
    %147 = vector.broadcast %146 : vector<16x1xf32> to vector<16x128xf32>
    %148 = arith.mulf %143, %147 : vector<16x128xf32>
    %149 = vector.broadcast %129 : vector<1x128xf32> to vector<16x128xf32>
    %150 = arith.mulf %148, %149 : vector<16x128xf32>
    %151 = vector.broadcast %130 : vector<1x128xf32> to vector<16x128xf32>
    %152 = arith.addf %150, %151 : vector<16x128xf32>
    %c0_49 = arith.constant 0 : index
    %c0_50 = arith.constant 0 : index
    %153 = vector.load %arg8[%c0_49, %c0_50] : memref<128x256xbf16, #tpu.memory_space<vmem>>, vector<128x256xbf16>
    %154 = arith.truncf %152 : vector<16x128xf32> to vector<16x128xbf16>
    %cst_51 = arith.constant dense<0.000000e+00> : vector<16x256xf32>
    %155 = tpu.matmul %154, %153, %cst_51 {dimension_numbers = #tpu.dot_dimension_numbers<[1], [0], [0], [1], [0, 0, 1, 1], [], []>} : vector<16x128xbf16>, vector<128x256xbf16>, vector<16x256xf32> -> vector<16x256xf32>
    %c0_52 = arith.constant 0 : index
    %c0_53 = arith.constant 0 : index
    %156 = vector.load %arg9[%c0_52, %c0_53] : memref<1x256xf32, #tpu.memory_space<vmem>>, vector<1x256xf32>
    %157 = vector.broadcast %156 : vector<1x256xf32> to vector<16x256xf32>
    %158 = arith.addf %155, %157 : vector<16x256xf32>
    %cst_54 = arith.constant 5.000000e-01 : f32
    %159 = vector.broadcast %cst_54 : f32 to vector<16x256xf32>
    %160 = arith.mulf %159, %158 : vector<16x256xf32>
    %cst_55 = arith.constant 4.471500e-02 : f32
    %161 = vector.broadcast %cst_55 : f32 to vector<16x256xf32>
    %162 = arith.mulf %161, %158 : vector<16x256xf32>
    %163 = arith.mulf %162, %158 : vector<16x256xf32>
    %164 = arith.mulf %163, %158 : vector<16x256xf32>
    %165 = arith.addf %158, %164 : vector<16x256xf32>
    %cst_56 = arith.constant 0.797884583 : f32
    %166 = vector.broadcast %cst_56 : f32 to vector<16x256xf32>
    %167 = arith.mulf %166, %165 : vector<16x256xf32>
    %168 = math.tanh %167 : vector<16x256xf32>
    %cst_57 = arith.constant 1.000000e+00 : f32
    %169 = vector.broadcast %cst_57 : f32 to vector<16x256xf32>
    %170 = arith.addf %169, %168 : vector<16x256xf32>
    %171 = arith.mulf %160, %170 : vector<16x256xf32>
    %c0_58 = arith.constant 0 : index
    %c0_59 = arith.constant 0 : index
    %172 = vector.load %arg10[%c0_58, %c0_59] : memref<256x128xbf16, #tpu.memory_space<vmem>>, vector<256x128xbf16>
    %173 = arith.truncf %171 : vector<16x256xf32> to vector<16x256xbf16>
    %cst_60 = arith.constant dense<0.000000e+00> : vector<16x128xf32>
    %174 = tpu.matmul %173, %172, %cst_60 {dimension_numbers = #tpu.dot_dimension_numbers<[1], [0], [0], [1], [0, 0, 1, 1], [], []>} : vector<16x256xbf16>, vector<256x128xbf16>, vector<16x128xf32> -> vector<16x128xf32>
    %c0_61 = arith.constant 0 : index
    %c0_62 = arith.constant 0 : index
    %175 = vector.load %arg11[%c0_61, %c0_62] : memref<1x128xf32, #tpu.memory_space<vmem>>, vector<1x128xf32>
    %176 = vector.broadcast %175 : vector<1x128xf32> to vector<16x128xf32>
    %177 = arith.addf %174, %176 : vector<16x128xf32>
    %178 = arith.addf %152, %177 : vector<16x128xf32>
    %c0_63 = arith.constant 0 : index
    %c0_64 = arith.constant 0 : index
    %179 = vector.load %arg12[%c0_63, %c0_64] : memref<1x128xf32, #tpu.memory_space<vmem>>, vector<1x128xf32>
    %c0_65 = arith.constant 0 : index
    %c0_66 = arith.constant 0 : index
    %180 = vector.load %arg13[%c0_65, %c0_66] : memref<1x128xf32, #tpu.memory_space<vmem>>, vector<1x128xf32>
    %cst_67 = arith.constant dense<0.000000e+00> : vector<16xf32>
    %181 = vector.multi_reduction <add>, %178, %cst_67 [1] : vector<16x128xf32> to vector<16xf32>
    %182 = vector.shape_cast %181 : vector<16xf32> to vector<16x1xf32>
    %cst_68 = arith.constant 1.280000e+02 : f32
    %183 = vector.broadcast %cst_68 : f32 to vector<16x1xf32>
    %184 = arith.divf %182, %183 : vector<16x1xf32>
    %185 = vector.broadcast %184 : vector<16x1xf32> to vector<16x128xf32>
    %186 = arith.subf %178, %185 : vector<16x128xf32>
    %187 = arith.mulf %186, %186 : vector<16x128xf32>
    %cst_69 = arith.constant dense<0.000000e+00> : vector<16xf32>
    %188 = vector.multi_reduction <add>, %187, %cst_69 [1] : vector<16x128xf32> to vector<16xf32>
    %189 = vector.shape_cast %188 : vector<16xf32> to vector<16x1xf32>
    %cst_70 = arith.constant 1.280000e+02 : f32
    %190 = vector.broadcast %cst_70 : f32 to vector<16x1xf32>
    %191 = arith.divf %189, %190 : vector<16x1xf32>
    %192 = vector.broadcast %184 : vector<16x1xf32> to vector<16x128xf32>
    %193 = arith.subf %178, %192 : vector<16x128xf32>
    %cst_71 = arith.constant 9.99999974E-6 : f32
    %194 = vector.broadcast %cst_71 : f32 to vector<16x1xf32>
    %195 = arith.addf %191, %194 : vector<16x1xf32>
    %196 = math.rsqrt %195 : vector<16x1xf32>
    %197 = vector.broadcast %196 : vector<16x1xf32> to vector<16x128xf32>
    %198 = arith.mulf %193, %197 : vector<16x128xf32>
    %199 = vector.broadcast %179 : vector<1x128xf32> to vector<16x128xf32>
    %200 = arith.mulf %198, %199 : vector<16x128xf32>
    %201 = vector.broadcast %180 : vector<1x128xf32> to vector<16x128xf32>
    %202 = arith.addf %200, %201 : vector<16x128xf32>
    %c0_72 = arith.constant 0 : index
    %c0_73 = arith.constant 0 : index
    %203 = vector.load %arg14[%c0_72, %c0_73] : memref<16x128xf32, #tpu.memory_space<vmem>>, vector<16x128xf32>
    tpu.vector_store %arg14[%c0_72, %c0_73], %202 {strides = array<i32>} : memref<16x128xf32, #tpu.memory_space<vmem>>, vector<16x128xf32>,
    return
  }
  func.func @transform_0(%arg0: i32) -> (i32, i32) {
    %c0_i32 = arith.constant 0 : i32
    %c0_i32_0 = arith.constant 0 : i32
    %c0_i32_1 = arith.constant 0 : i32
    return %c0_i32, %c0_i32_0 : i32, i32
  }
  func.func @transform_1(%arg0: i32) -> (i32, i32) {
    %c0_i32 = arith.constant 0 : i32
    %c0_i32_0 = arith.constant 0 : i32
    %c0_i32_1 = arith.constant 0 : i32
    return %c0_i32, %c0_i32_0 : i32, i32
  }
  func.func @transform_2(%arg0: i32) -> (i32, i32) {
    %c0_i32 = arith.constant 0 : i32
    %c0_i32_0 = arith.constant 0 : i32
    %c0_i32_1 = arith.constant 0 : i32
    return %c0_i32, %c0_i32_0 : i32, i32
  }
  func.func @transform_3(%arg0: i32) -> (i32, i32) {
    %c0_i32 = arith.constant 0 : i32
    %c0_i32_0 = arith.constant 0 : i32
    %c0_i32_1 = arith.constant 0 : i32
    return %c0_i32, %c0_i32_0 : i32, i32
  }
  func.func @transform_4(%arg0: i32) -> (i32, i32) {
    %c0_i32 = arith.constant 0 : i32
    %c0_i32_0 = arith.constant 0 : i32
    %c0_i32_1 = arith.constant 0 : i32
    return %c0_i32, %c0_i32_0 : i32, i32
  }
  func.func @transform_5(%arg0: i32) -> (i32, i32) {
    %c0_i32 = arith.constant 0 : i32
    %c0_i32_0 = arith.constant 0 : i32
    %c0_i32_1 = arith.constant 0 : i32
    return %c0_i32, %c0_i32_0 : i32, i32
  }
  func.func @transform_6(%arg0: i32) -> (i32, i32) {
    %c0_i32 = arith.constant 0 : i32
    %c0_i32_0 = arith.constant 0 : i32
    %c0_i32_1 = arith.constant 0 : i32
    return %c0_i32, %c0_i32_0 : i32, i32
  }
  func.func @transform_7(%arg0: i32) -> (i32, i32) {
    %c0_i32 = arith.constant 0 : i32
    %c0_i32_0 = arith.constant 0 : i32
    %c0_i32_1 = arith.constant 0 : i32
    return %c0_i32, %c0_i32_0 : i32, i32
  }
  func.func @transform_8(%arg0: i32) -> (i32, i32) {
    %c0_i32 = arith.constant 0 : i32
    %c0_i32_0 = arith.constant 0 : i32
    %c0_i32_1 = arith.constant 0 : i32
    return %c0_i32, %c0_i32_0 : i32, i32
  }
  func.func @transform_9(%arg0: i32) -> (i32, i32) {
    %c0_i32 = arith.constant 0 : i32
    %c0_i32_0 = arith.constant 0 : i32
    %c0_i32_1 = arith.constant 0 : i32
    return %c0_i32, %c0_i32_0 : i32, i32
  }
  func.func @transform_10(%arg0: i32) -> (i32, i32) {
    %c0_i32 = arith.constant 0 : i32
    %c0_i32_0 = arith.constant 0 : i32
    %c0_i32_1 = arith.constant 0 : i32
    return %c0_i32, %c0_i32_0 : i32, i32
  }
  func.func @transform_11(%arg0: i32) -> (i32, i32) {
    %c0_i32 = arith.constant 0 : i32
    %c0_i32_0 = arith.constant 0 : i32
    %c0_i32_1 = arith.constant 0 : i32
    return %c0_i32, %c0_i32_0 : i32, i32
  }
  func.func @transform_12(%arg0: i32) -> (i32, i32) {
    %c0_i32 = arith.constant 0 : i32
    %c0_i32_0 = arith.constant 0 : i32
    %c0_i32_1 = arith.constant 0 : i32
    return %c0_i32, %c0_i32_0 : i32, i32
  }
  func.func @transform_13(%arg0: i32) -> (i32, i32) {
    %c0_i32 = arith.constant 0 : i32
    %c0_i32_0 = arith.constant 0 : i32
    %c0_i32_1 = arith.constant 0 : i32
    return %c0_i32, %c0_i32_0 : i32, i32
  }
}

module attributes {stable_mosaic.version = 11 : i64} {
  func.func @_heads_kernel(%arg0: i32, %arg1: memref<16x128xf32, #tpu.memory_space<vmem>>, %arg2: memref<128x256xbf16, #tpu.memory_space<vmem>>, %arg3: memref<1x256xf32, #tpu.memory_space<vmem>>, %arg4: memref<256x128xbf16, #tpu.memory_space<vmem>>, %arg5: memref<1x128xf32, #tpu.memory_space<vmem>>, %arg6: memref<128x256xbf16, #tpu.memory_space<vmem>>, %arg7: memref<1x256xf32, #tpu.memory_space<vmem>>, %arg8: memref<256x128xbf16, #tpu.memory_space<vmem>>, %arg9: memref<1x128xf32, #tpu.memory_space<vmem>>, %arg10: memref<128x128xbf16, #tpu.memory_space<vmem>>, %arg11: memref<1x128xf32, #tpu.memory_space<vmem>>, %arg12: memref<128x128xbf16, #tpu.memory_space<vmem>>, %arg13: memref<1x128xf32, #tpu.memory_space<vmem>>, %arg14: memref<2x128xf32, #tpu.memory_space<vmem>>, %arg15: memref<2x128xf32, #tpu.memory_space<vmem>>, %arg16: memref<2x128xf32, #tpu.memory_space<vmem>>) attributes {dimension_semantics = [#tpu.dimension_semantics<arbitrary>], iteration_bounds = array<i64: 1>, scalar_prefetch = 0 : i64, scratch_operands = 0 : i64, tpu.core_type = #tpu.core_type<tc>, window_params = [{pipeline_mode = #tpu.pipeline_mode<synchronous>, transform_indices = @transform_0, window_bounds = array<i64: 16, 128>}, {pipeline_mode = #tpu.pipeline_mode<synchronous>, transform_indices = @transform_1, window_bounds = array<i64: 128, 256>}, {pipeline_mode = #tpu.pipeline_mode<synchronous>, transform_indices = @transform_2, window_bounds = array<i64: 1, 256>}, {pipeline_mode = #tpu.pipeline_mode<synchronous>, transform_indices = @transform_3, window_bounds = array<i64: 256, 128>}, {pipeline_mode = #tpu.pipeline_mode<synchronous>, transform_indices = @transform_4, window_bounds = array<i64: 1, 128>}, {pipeline_mode = #tpu.pipeline_mode<synchronous>, transform_indices = @transform_5, window_bounds = array<i64: 128, 256>}, {pipeline_mode = #tpu.pipeline_mode<synchronous>, transform_indices = @transform_6, window_bounds = array<i64: 1, 256>}, {pipeline_mode = #tpu.pipeline_mode<synchronous>, transform_indices = @transform_7, window_bounds = array<i64: 256, 128>}, {pipeline_mode = #tpu.pipeline_mode<synchronous>, transform_indices = @transform_8, window_bounds = array<i64: 1, 128>}, {pipeline_mode = #tpu.pipeline_mode<synchronous>, transform_indices = @transform_9, window_bounds = array<i64: 128, 128>}, {pipeline_mode = #tpu.pipeline_mode<synchronous>, transform_indices = @transform_10, window_bounds = array<i64: 1, 128>}, {pipeline_mode = #tpu.pipeline_mode<synchronous>, transform_indices = @transform_11, window_bounds = array<i64: 128, 128>}, {pipeline_mode = #tpu.pipeline_mode<synchronous>, transform_indices = @transform_12, window_bounds = array<i64: 1, 128>}, {pipeline_mode = #tpu.pipeline_mode<synchronous>, transform_indices = @transform_13, window_bounds = array<i64: 2, 128>}, {pipeline_mode = #tpu.pipeline_mode<synchronous>, transform_indices = @transform_14, window_bounds = array<i64: 2, 128>}, {pipeline_mode = #tpu.pipeline_mode<synchronous>, transform_indices = @transform_15, window_bounds = array<i64: 2, 128>}]} {
    %c0 = arith.constant 0 : index
    %c0_0 = arith.constant 0 : index
    %0 = vector.load %arg1[%c0, %c0_0] : memref<16x128xf32, #tpu.memory_space<vmem>>, vector<16x128xf32>
    %1 = vector.extract_strided_slice %0 {offsets = [0, 0], sizes = [8, 128], strides = [1, 1]} : vector<16x128xf32> to vector<8x128xf32>
    %cst = arith.constant dense<0.000000e+00> : vector<128xf32>
    %2 = vector.multi_reduction <add>, %1, %cst [0] : vector<8x128xf32> to vector<128xf32>
    %3 = vector.shape_cast %2 : vector<128xf32> to vector<1x128xf32>
    %cst_1 = arith.constant 8.000000e+00 : f32
    %4 = vector.broadcast %cst_1 : f32 to vector<1x128xf32>
    %5 = arith.divf %3, %4 : vector<1x128xf32>
    %6 = vector.extract_strided_slice %0 {offsets = [8, 0], sizes = [8, 128], strides = [1, 1]} : vector<16x128xf32> to vector<8x128xf32>
    %cst_2 = arith.constant dense<0.000000e+00> : vector<128xf32>
    %7 = vector.multi_reduction <add>, %6, %cst_2 [0] : vector<8x128xf32> to vector<128xf32>
    %8 = vector.shape_cast %7 : vector<128xf32> to vector<1x128xf32>
    %cst_3 = arith.constant 8.000000e+00 : f32
    %9 = vector.broadcast %cst_3 : f32 to vector<1x128xf32>
    %10 = arith.divf %8, %9 : vector<1x128xf32>
    %11 = tpu.concatenate %5, %10 in 0 : vector<1x128xf32>, vector<1x128xf32> -> vector<2x128xf32>
    %c0_4 = arith.constant 0 : index
    %c0_5 = arith.constant 0 : index
    %12 = vector.load %arg2[%c0_4, %c0_5] : memref<128x256xbf16, #tpu.memory_space<vmem>>, vector<128x256xbf16>
    %13 = arith.truncf %11 : vector<2x128xf32> to vector<2x128xbf16>
    %cst_6 = arith.constant dense<0.000000e+00> : vector<2x256xf32>
    %14 = tpu.matmul %13, %12, %cst_6 {dimension_numbers = #tpu.dot_dimension_numbers<[1], [0], [0], [1], [0, 0, 1, 1], [], []>} : vector<2x128xbf16>, vector<128x256xbf16>, vector<2x256xf32> -> vector<2x256xf32>
    %c0_7 = arith.constant 0 : index
    %c0_8 = arith.constant 0 : index
    %15 = vector.load %arg3[%c0_7, %c0_8] : memref<1x256xf32, #tpu.memory_space<vmem>>, vector<1x256xf32>
    %16 = vector.broadcast %15 : vector<1x256xf32> to vector<2x256xf32>
    %17 = arith.addf %14, %16 : vector<2x256xf32>
    %cst_9 = arith.constant 5.000000e-01 : f32
    %18 = vector.broadcast %cst_9 : f32 to vector<2x256xf32>
    %19 = arith.mulf %18, %17 : vector<2x256xf32>
    %cst_10 = arith.constant 4.471500e-02 : f32
    %20 = vector.broadcast %cst_10 : f32 to vector<2x256xf32>
    %21 = arith.mulf %20, %17 : vector<2x256xf32>
    %22 = arith.mulf %21, %17 : vector<2x256xf32>
    %23 = arith.mulf %22, %17 : vector<2x256xf32>
    %24 = arith.addf %17, %23 : vector<2x256xf32>
    %cst_11 = arith.constant 0.797884583 : f32
    %25 = vector.broadcast %cst_11 : f32 to vector<2x256xf32>
    %26 = arith.mulf %25, %24 : vector<2x256xf32>
    %27 = math.tanh %26 : vector<2x256xf32>
    %cst_12 = arith.constant 1.000000e+00 : f32
    %28 = vector.broadcast %cst_12 : f32 to vector<2x256xf32>
    %29 = arith.addf %28, %27 : vector<2x256xf32>
    %30 = arith.mulf %19, %29 : vector<2x256xf32>
    %c0_13 = arith.constant 0 : index
    %c0_14 = arith.constant 0 : index
    %31 = vector.load %arg4[%c0_13, %c0_14] : memref<256x128xbf16, #tpu.memory_space<vmem>>, vector<256x128xbf16>
    %32 = arith.truncf %30 : vector<2x256xf32> to vector<2x256xbf16>
    %cst_15 = arith.constant dense<0.000000e+00> : vector<2x128xf32>
    %33 = tpu.matmul %32, %31, %cst_15 {dimension_numbers = #tpu.dot_dimension_numbers<[1], [0], [0], [1], [0, 0, 1, 1], [], []>} : vector<2x256xbf16>, vector<256x128xbf16>, vector<2x128xf32> -> vector<2x128xf32>
    %c0_16 = arith.constant 0 : index
    %c0_17 = arith.constant 0 : index
    %34 = vector.load %arg5[%c0_16, %c0_17] : memref<1x128xf32, #tpu.memory_space<vmem>>, vector<1x128xf32>
    %35 = vector.broadcast %34 : vector<1x128xf32> to vector<2x128xf32>
    %36 = arith.addf %33, %35 : vector<2x128xf32>
    %c0_18 = arith.constant 0 : index
    %c0_19 = arith.constant 0 : index
    %37 = vector.load %arg14[%c0_18, %c0_19] : memref<2x128xf32, #tpu.memory_space<vmem>>, vector<2x128xf32>
    tpu.vector_store %arg14[%c0_18, %c0_19], %36 {strides = array<i32>} : memref<2x128xf32, #tpu.memory_space<vmem>>, vector<2x128xf32>,
    %c0_20 = arith.constant 0 : index
    %c0_21 = arith.constant 0 : index
    %38 = vector.load %arg6[%c0_20, %c0_21] : memref<128x256xbf16, #tpu.memory_space<vmem>>, vector<128x256xbf16>
    %39 = arith.truncf %36 : vector<2x128xf32> to vector<2x128xbf16>
    %cst_22 = arith.constant dense<0.000000e+00> : vector<2x256xf32>
    %40 = tpu.matmul %39, %38, %cst_22 {dimension_numbers = #tpu.dot_dimension_numbers<[1], [0], [0], [1], [0, 0, 1, 1], [], []>} : vector<2x128xbf16>, vector<128x256xbf16>, vector<2x256xf32> -> vector<2x256xf32>
    %c0_23 = arith.constant 0 : index
    %c0_24 = arith.constant 0 : index
    %41 = vector.load %arg7[%c0_23, %c0_24] : memref<1x256xf32, #tpu.memory_space<vmem>>, vector<1x256xf32>
    %42 = vector.broadcast %41 : vector<1x256xf32> to vector<2x256xf32>
    %43 = arith.addf %40, %42 : vector<2x256xf32>
    %cst_25 = arith.constant 5.000000e-01 : f32
    %44 = vector.broadcast %cst_25 : f32 to vector<2x256xf32>
    %45 = arith.mulf %44, %43 : vector<2x256xf32>
    %cst_26 = arith.constant 4.471500e-02 : f32
    %46 = vector.broadcast %cst_26 : f32 to vector<2x256xf32>
    %47 = arith.mulf %46, %43 : vector<2x256xf32>
    %48 = arith.mulf %47, %43 : vector<2x256xf32>
    %49 = arith.mulf %48, %43 : vector<2x256xf32>
    %50 = arith.addf %43, %49 : vector<2x256xf32>
    %cst_27 = arith.constant 0.797884583 : f32
    %51 = vector.broadcast %cst_27 : f32 to vector<2x256xf32>
    %52 = arith.mulf %51, %50 : vector<2x256xf32>
    %53 = math.tanh %52 : vector<2x256xf32>
    %cst_28 = arith.constant 1.000000e+00 : f32
    %54 = vector.broadcast %cst_28 : f32 to vector<2x256xf32>
    %55 = arith.addf %54, %53 : vector<2x256xf32>
    %56 = arith.mulf %45, %55 : vector<2x256xf32>
    %c0_29 = arith.constant 0 : index
    %c0_30 = arith.constant 0 : index
    %57 = vector.load %arg8[%c0_29, %c0_30] : memref<256x128xbf16, #tpu.memory_space<vmem>>, vector<256x128xbf16>
    %58 = arith.truncf %56 : vector<2x256xf32> to vector<2x256xbf16>
    %cst_31 = arith.constant dense<0.000000e+00> : vector<2x128xf32>
    %59 = tpu.matmul %58, %57, %cst_31 {dimension_numbers = #tpu.dot_dimension_numbers<[1], [0], [0], [1], [0, 0, 1, 1], [], []>} : vector<2x256xbf16>, vector<256x128xbf16>, vector<2x128xf32> -> vector<2x128xf32>
    %c0_32 = arith.constant 0 : index
    %c0_33 = arith.constant 0 : index
    %60 = vector.load %arg9[%c0_32, %c0_33] : memref<1x128xf32, #tpu.memory_space<vmem>>, vector<1x128xf32>
    %61 = vector.broadcast %60 : vector<1x128xf32> to vector<2x128xf32>
    %62 = arith.addf %59, %61 : vector<2x128xf32>
    %c0_34 = arith.constant 0 : index
    %c0_35 = arith.constant 0 : index
    %63 = vector.load %arg15[%c0_34, %c0_35] : memref<2x128xf32, #tpu.memory_space<vmem>>, vector<2x128xf32>
    tpu.vector_store %arg15[%c0_34, %c0_35], %62 {strides = array<i32>} : memref<2x128xf32, #tpu.memory_space<vmem>>, vector<2x128xf32>,
    %c0_36 = arith.constant 0 : index
    %c0_37 = arith.constant 0 : index
    %64 = vector.load %arg10[%c0_36, %c0_37] : memref<128x128xbf16, #tpu.memory_space<vmem>>, vector<128x128xbf16>
    %65 = arith.truncf %36 : vector<2x128xf32> to vector<2x128xbf16>
    %cst_38 = arith.constant dense<0.000000e+00> : vector<2x128xf32>
    %66 = tpu.matmul %65, %64, %cst_38 {dimension_numbers = #tpu.dot_dimension_numbers<[1], [0], [0], [1], [0, 0, 1, 1], [], []>} : vector<2x128xbf16>, vector<128x128xbf16>, vector<2x128xf32> -> vector<2x128xf32>
    %c0_39 = arith.constant 0 : index
    %c0_40 = arith.constant 0 : index
    %67 = vector.load %arg11[%c0_39, %c0_40] : memref<1x128xf32, #tpu.memory_space<vmem>>, vector<1x128xf32>
    %68 = vector.broadcast %67 : vector<1x128xf32> to vector<2x128xf32>
    %69 = arith.addf %66, %68 : vector<2x128xf32>
    %cst_41 = arith.constant 5.000000e-01 : f32
    %70 = vector.broadcast %cst_41 : f32 to vector<2x128xf32>
    %71 = arith.mulf %70, %69 : vector<2x128xf32>
    %cst_42 = arith.constant 4.471500e-02 : f32
    %72 = vector.broadcast %cst_42 : f32 to vector<2x128xf32>
    %73 = arith.mulf %72, %69 : vector<2x128xf32>
    %74 = arith.mulf %73, %69 : vector<2x128xf32>
    %75 = arith.mulf %74, %69 : vector<2x128xf32>
    %76 = arith.addf %69, %75 : vector<2x128xf32>
    %cst_43 = arith.constant 0.797884583 : f32
    %77 = vector.broadcast %cst_43 : f32 to vector<2x128xf32>
    %78 = arith.mulf %77, %76 : vector<2x128xf32>
    %79 = math.tanh %78 : vector<2x128xf32>
    %cst_44 = arith.constant 1.000000e+00 : f32
    %80 = vector.broadcast %cst_44 : f32 to vector<2x128xf32>
    %81 = arith.addf %80, %79 : vector<2x128xf32>
    %82 = arith.mulf %71, %81 : vector<2x128xf32>
    %c0_45 = arith.constant 0 : index
    %c0_46 = arith.constant 0 : index
    %83 = vector.load %arg12[%c0_45, %c0_46] : memref<128x128xbf16, #tpu.memory_space<vmem>>, vector<128x128xbf16>
    %84 = arith.truncf %82 : vector<2x128xf32> to vector<2x128xbf16>
    %cst_47 = arith.constant dense<0.000000e+00> : vector<2x128xf32>
    %85 = tpu.matmul %84, %83, %cst_47 {dimension_numbers = #tpu.dot_dimension_numbers<[1], [0], [0], [1], [0, 0, 1, 1], [], []>} : vector<2x128xbf16>, vector<128x128xbf16>, vector<2x128xf32> -> vector<2x128xf32>
    %c0_48 = arith.constant 0 : index
    %c0_49 = arith.constant 0 : index
    %86 = vector.load %arg13[%c0_48, %c0_49] : memref<1x128xf32, #tpu.memory_space<vmem>>, vector<1x128xf32>
    %87 = vector.broadcast %86 : vector<1x128xf32> to vector<2x128xf32>
    %88 = arith.addf %85, %87 : vector<2x128xf32>
    %cst_50 = arith.constant dense<0xFF800000> : vector<2xf32>
    %89 = vector.multi_reduction <maximumf>, %88, %cst_50 [1] : vector<2x128xf32> to vector<2xf32>
    %90 = vector.shape_cast %89 : vector<2xf32> to vector<2x1xf32>
    %91 = vector.broadcast %90 : vector<2x1xf32> to vector<2x128xf32>
    %92 = arith.subf %88, %91 : vector<2x128xf32>
    %93 = math.exp %92 : vector<2x128xf32>
    %cst_51 = arith.constant dense<0.000000e+00> : vector<2xf32>
    %94 = vector.multi_reduction <add>, %93, %cst_51 [1] : vector<2x128xf32> to vector<2xf32>
    %95 = vector.shape_cast %94 : vector<2xf32> to vector<2x1xf32>
    %96 = vector.broadcast %95 : vector<2x1xf32> to vector<2x128xf32>
    %97 = arith.divf %93, %96 : vector<2x128xf32>
    %c0_52 = arith.constant 0 : index
    %c0_53 = arith.constant 0 : index
    %98 = vector.load %arg16[%c0_52, %c0_53] : memref<2x128xf32, #tpu.memory_space<vmem>>, vector<2x128xf32>
    tpu.vector_store %arg16[%c0_52, %c0_53], %97 {strides = array<i32>} : memref<2x128xf32, #tpu.memory_space<vmem>>, vector<2x128xf32>,
    return
  }
  func.func @transform_0(%arg0: i32) -> (i32, i32) {
    %c0_i32 = arith.constant 0 : i32
    %c0_i32_0 = arith.constant 0 : i32
    %c0_i32_1 = arith.constant 0 : i32
    return %c0_i32, %c0_i32_0 : i32, i32
  }
  func.func @transform_1(%arg0: i32) -> (i32, i32) {
    %c0_i32 = arith.constant 0 : i32
    %c0_i32_0 = arith.constant 0 : i32
    %c0_i32_1 = arith.constant 0 : i32
    return %c0_i32, %c0_i32_0 : i32, i32
  }
  func.func @transform_2(%arg0: i32) -> (i32, i32) {
    %c0_i32 = arith.constant 0 : i32
    %c0_i32_0 = arith.constant 0 : i32
    %c0_i32_1 = arith.constant 0 : i32
    return %c0_i32, %c0_i32_0 : i32, i32
  }
  func.func @transform_3(%arg0: i32) -> (i32, i32) {
    %c0_i32 = arith.constant 0 : i32
    %c0_i32_0 = arith.constant 0 : i32
    %c0_i32_1 = arith.constant 0 : i32
    return %c0_i32, %c0_i32_0 : i32, i32
  }
  func.func @transform_4(%arg0: i32) -> (i32, i32) {
    %c0_i32 = arith.constant 0 : i32
    %c0_i32_0 = arith.constant 0 : i32
    %c0_i32_1 = arith.constant 0 : i32
    return %c0_i32, %c0_i32_0 : i32, i32
  }
  func.func @transform_5(%arg0: i32) -> (i32, i32) {
    %c0_i32 = arith.constant 0 : i32
    %c0_i32_0 = arith.constant 0 : i32
    %c0_i32_1 = arith.constant 0 : i32
    return %c0_i32, %c0_i32_0 : i32, i32
  }
  func.func @transform_6(%arg0: i32) -> (i32, i32) {
    %c0_i32 = arith.constant 0 : i32
    %c0_i32_0 = arith.constant 0 : i32
    %c0_i32_1 = arith.constant 0 : i32
    return %c0_i32, %c0_i32_0 : i32, i32
  }
  func.func @transform_7(%arg0: i32) -> (i32, i32) {
    %c0_i32 = arith.constant 0 : i32
    %c0_i32_0 = arith.constant 0 : i32
    %c0_i32_1 = arith.constant 0 : i32
    return %c0_i32, %c0_i32_0 : i32, i32
  }
  func.func @transform_8(%arg0: i32) -> (i32, i32) {
    %c0_i32 = arith.constant 0 : i32
    %c0_i32_0 = arith.constant 0 : i32
    %c0_i32_1 = arith.constant 0 : i32
    return %c0_i32, %c0_i32_0 : i32, i32
  }
  func.func @transform_9(%arg0: i32) -> (i32, i32) {
    %c0_i32 = arith.constant 0 : i32
    %c0_i32_0 = arith.constant 0 : i32
    %c0_i32_1 = arith.constant 0 : i32
    return %c0_i32, %c0_i32_0 : i32, i32
  }
  func.func @transform_10(%arg0: i32) -> (i32, i32) {
    %c0_i32 = arith.constant 0 : i32
    %c0_i32_0 = arith.constant 0 : i32
    %c0_i32_1 = arith.constant 0 : i32
    return %c0_i32, %c0_i32_0 : i32, i32
  }
  func.func @transform_11(%arg0: i32) -> (i32, i32) {
    %c0_i32 = arith.constant 0 : i32
    %c0_i32_0 = arith.constant 0 : i32
    %c0_i32_1 = arith.constant 0 : i32
    return %c0_i32, %c0_i32_0 : i32, i32
  }
  func.func @transform_12(%arg0: i32) -> (i32, i32) {
    %c0_i32 = arith.constant 0 : i32
    %c0_i32_0 = arith.constant 0 : i32
    %c0_i32_1 = arith.constant 0 : i32
    return %c0_i32, %c0_i32_0 : i32, i32
  }
  func.func @transform_13(%arg0: i32) -> (i32, i32) {
    %c0_i32 = arith.constant 0 : i32
    %c0_i32_0 = arith.constant 0 : i32
    %c0_i32_1 = arith.constant 0 : i32
    return %c0_i32, %c0_i32_0 : i32, i32
  }
  func.func @transform_14(%arg0: i32) -> (i32, i32) {
    %c0_i32 = arith.constant 0 : i32
    %c0_i32_0 = arith.constant 0 : i32
    %c0_i32_1 = arith.constant 0 : i32
    return %c0_i32, %c0_i32_0 : i32, i32
  }
  func.func @transform_15(%arg0: i32) -> (i32, i32) {
    %c0_i32 = arith.constant 0 : i32
    %c0_i32_0 = arith.constant 0 : i32
    %c0_i32_1 = arith.constant 0 : i32
    return %c0_i32, %c0_i32_0 : i32, i32
  }
}

module attributes {stable_mosaic.version = 11 : i64} {
  func.func @_layer_kernel(%arg0: i32, %arg1: memref<16x128xf32, #tpu.memory_space<vmem>>, %arg2: memref<128x384xbf16, #tpu.memory_space<vmem>>, %arg3: memref<1x384xf32, #tpu.memory_space<vmem>>, %arg4: memref<128x128xbf16, #tpu.memory_space<vmem>>, %arg5: memref<1x128xf32, #tpu.memory_space<vmem>>, %arg6: memref<1x128xf32, #tpu.memory_space<vmem>>, %arg7: memref<1x128xf32, #tpu.memory_space<vmem>>, %arg8: memref<128x256xbf16, #tpu.memory_space<vmem>>, %arg9: memref<1x256xf32, #tpu.memory_space<vmem>>, %arg10: memref<256x128xbf16, #tpu.memory_space<vmem>>, %arg11: memref<1x128xf32, #tpu.memory_space<vmem>>, %arg12: memref<1x128xf32, #tpu.memory_space<vmem>>, %arg13: memref<1x128xf32, #tpu.memory_space<vmem>>, %arg14: memref<16x128xf32, #tpu.memory_space<vmem>>) attributes {dimension_semantics = [#tpu.dimension_semantics<arbitrary>], iteration_bounds = array<i64: 1>, scalar_prefetch = 0 : i64, scratch_operands = 0 : i64, tpu.core_type = #tpu.core_type<tc>, window_params = [{pipeline_mode = #tpu.pipeline_mode<synchronous>, transform_indices = @transform_0, window_bounds = array<i64: 16, 128>}, {pipeline_mode = #tpu.pipeline_mode<synchronous>, transform_indices = @transform_1, window_bounds = array<i64: 128, 384>}, {pipeline_mode = #tpu.pipeline_mode<synchronous>, transform_indices = @transform_2, window_bounds = array<i64: 1, 384>}, {pipeline_mode = #tpu.pipeline_mode<synchronous>, transform_indices = @transform_3, window_bounds = array<i64: 128, 128>}, {pipeline_mode = #tpu.pipeline_mode<synchronous>, transform_indices = @transform_4, window_bounds = array<i64: 1, 128>}, {pipeline_mode = #tpu.pipeline_mode<synchronous>, transform_indices = @transform_5, window_bounds = array<i64: 1, 128>}, {pipeline_mode = #tpu.pipeline_mode<synchronous>, transform_indices = @transform_6, window_bounds = array<i64: 1, 128>}, {pipeline_mode = #tpu.pipeline_mode<synchronous>, transform_indices = @transform_7, window_bounds = array<i64: 128, 256>}, {pipeline_mode = #tpu.pipeline_mode<synchronous>, transform_indices = @transform_8, window_bounds = array<i64: 1, 256>}, {pipeline_mode = #tpu.pipeline_mode<synchronous>, transform_indices = @transform_9, window_bounds = array<i64: 256, 128>}, {pipeline_mode = #tpu.pipeline_mode<synchronous>, transform_indices = @transform_10, window_bounds = array<i64: 1, 128>}, {pipeline_mode = #tpu.pipeline_mode<synchronous>, transform_indices = @transform_11, window_bounds = array<i64: 1, 128>}, {pipeline_mode = #tpu.pipeline_mode<synchronous>, transform_indices = @transform_12, window_bounds = array<i64: 1, 128>}, {pipeline_mode = #tpu.pipeline_mode<synchronous>, transform_indices = @transform_13, window_bounds = array<i64: 16, 128>}]} {
    %c0 = arith.constant 0 : index
    %c0_0 = arith.constant 0 : index
    %0 = vector.load %arg1[%c0, %c0_0] : memref<16x128xf32, #tpu.memory_space<vmem>>, vector<16x128xf32>
    %c0_1 = arith.constant 0 : index
    %c0_2 = arith.constant 0 : index
    %1 = vector.load %arg2[%c0_1, %c0_2] : memref<128x384xbf16, #tpu.memory_space<vmem>>, vector<128x384xbf16>
    %2 = arith.truncf %0 : vector<16x128xf32> to vector<16x128xbf16>
    %cst = arith.constant dense<0.000000e+00> : vector<16x384xf32>
    %3 = tpu.matmul %2, %1, %cst {dimension_numbers = #tpu.dot_dimension_numbers<[1], [0], [0], [1], [0, 0, 1, 1], [], []>} : vector<16x128xbf16>, vector<128x384xbf16>, vector<16x384xf32> -> vector<16x384xf32>
    %c0_3 = arith.constant 0 : index
    %c0_4 = arith.constant 0 : index
    %4 = vector.load %arg3[%c0_3, %c0_4] : memref<1x384xf32, #tpu.memory_space<vmem>>, vector<1x384xf32>
    %5 = vector.broadcast %4 : vector<1x384xf32> to vector<16x384xf32>
    %6 = arith.addf %3, %5 : vector<16x384xf32>
    %7 = vector.extract_strided_slice %6 {offsets = [0, 0], sizes = [16, 128], strides = [1, 1]} : vector<16x384xf32> to vector<16x128xf32>
    %8 = vector.extract_strided_slice %6 {offsets = [0, 128], sizes = [16, 128], strides = [1, 1]} : vector<16x384xf32> to vector<16x128xf32>
    %9 = vector.extract_strided_slice %6 {offsets = [0, 256], sizes = [16, 128], strides = [1, 1]} : vector<16x384xf32> to vector<16x128xf32>
    %10 = tpu.iota {dimensions = array<i32: 0>} : vector<16x16xi32>
    %11 = tpu.iota {dimensions = array<i32: 1>} : vector<16x16xi32>
    %12 = arith.subi %10, %11 : vector<16x16xi32>
    %c0_i32 = arith.constant 0 : i32
    %13 = vector.broadcast %c0_i32 : i32 to vector<16x16xi32>
    %14 = arith.cmpi eq, %12, %13 : vector<16x16xi32>
    %c8_i32 = arith.constant 8 : i32
    %15 = vector.broadcast %c8_i32 : i32 to vector<16x16xi32>
    %16 = arith.cmpi eq, %12, %15 : vector<16x16xi32>
    %17 = arith.ori %14, %16 : vector<16x16xi1>
    %c-8_i32 = arith.constant -8 : i32
    %18 = vector.broadcast %c-8_i32 : i32 to vector<16x16xi32>
    %19 = arith.cmpi eq, %12, %18 : vector<16x16xi32>
    %20 = arith.ori %17, %19 : vector<16x16xi1>
    %c0_5 = arith.constant 0 : index
    %c0_6 = arith.constant 0 : index
    %21 = vector.load %arg5[%c0_5, %c0_6] : memref<1x128xf32, #tpu.memory_space<vmem>>, vector<1x128xf32>
    %22 = vector.shape_cast %21 : vector<1x128xf32> to vector<1x128xf32>
    %23 = vector.broadcast %22 : vector<1x128xf32> to vector<16x128xf32>
    %24 = vector.extract_strided_slice %7 {offsets = [0, 0], sizes = [16, 32], strides = [1, 1]} : vector<16x128xf32> to vector<16x32xf32>
    %25 = arith.truncf %24 : vector<16x32xf32> to vector<16x32xbf16>
    %26 = vector.extract_strided_slice %8 {offsets = [0, 0], sizes = [16, 32], strides = [1, 1]} : vector<16x128xf32> to vector<16x32xf32>
    %27 = arith.truncf %26 : vector<16x32xf32> to vector<16x32xbf16>
    %28 = vector.extract_strided_slice %9 {offsets = [0, 0], sizes = [16, 32], strides = [1, 1]} : vector<16x128xf32> to vector<16x32xf32>
    %29 = arith.truncf %28 : vector<16x32xf32> to vector<16x32xbf16>
    %cst_7 = arith.constant dense<0.000000e+00> : vector<16x16xf32>
    %30 = tpu.matmul %25, %27, %cst_7 {dimension_numbers = #tpu.dot_dimension_numbers<[1], [1], [0], [0], [0, 0, 1, 0], [], []>} : vector<16x32xbf16>, vector<16x32xbf16>, vector<16x16xf32> -> vector<16x16xf32>
    %cst_8 = arith.constant 0.176776692 : f32
    %31 = vector.broadcast %cst_8 : f32 to vector<16x16xf32>
    %32 = arith.mulf %30, %31 : vector<16x16xf32>
    %cst_9 = arith.constant -1.000000e+30 : f32
    %33 = vector.broadcast %cst_9 : f32 to vector<16x16xf32>
    %34 = arith.select %20, %32, %33 : vector<16x16xi1>, vector<16x16xf32>
    %cst_10 = arith.constant dense<0xFF800000> : vector<16xf32>
    %35 = vector.multi_reduction <maximumf>, %34, %cst_10 [1] : vector<16x16xf32> to vector<16xf32>
    %36 = vector.shape_cast %35 : vector<16xf32> to vector<16x1xf32>
    %37 = vector.broadcast %36 : vector<16x1xf32> to vector<16x16xf32>
    %38 = arith.subf %34, %37 : vector<16x16xf32>
    %39 = math.exp %38 : vector<16x16xf32>
    %cst_11 = arith.constant dense<0.000000e+00> : vector<16xf32>
    %40 = vector.multi_reduction <add>, %39, %cst_11 [1] : vector<16x16xf32> to vector<16xf32>
    %41 = vector.shape_cast %40 : vector<16xf32> to vector<16x1xf32>
    %42 = vector.broadcast %41 : vector<16x1xf32> to vector<16x16xf32>
    %43 = arith.divf %39, %42 : vector<16x16xf32>
    %44 = arith.truncf %43 : vector<16x16xf32> to vector<16x16xbf16>
    %cst_12 = arith.constant dense<0.000000e+00> : vector<16x32xf32>
    %45 = tpu.matmul %44, %29, %cst_12 {dimension_numbers = #tpu.dot_dimension_numbers<[1], [0], [0], [1], [0, 0, 1, 1], [], []>} : vector<16x16xbf16>, vector<16x32xbf16>, vector<16x32xf32> -> vector<16x32xf32>
    %c0_13 = arith.constant 0 : index
    %c0_14 = arith.constant 0 : index
    %46 = vector.load %arg4[%c0_13, %c0_14] : memref<128x128xbf16, #tpu.memory_space<vmem>>, vector<32x128xbf16>
    %47 = arith.truncf %45 : vector<16x32xf32> to vector<16x32xbf16>
    %cst_15 = arith.constant dense<0.000000e+00> : vector<16x128xf32>
    %48 = tpu.matmul %47, %46, %cst_15 {dimension_numbers = #tpu.dot_dimension_numbers<[1], [0], [0], [1], [0, 0, 1, 1], [], []>} : vector<16x32xbf16>, vector<32x128xbf16>, vector<16x128xf32> -> vector<16x128xf32>
    %49 = arith.addf %23, %48 : vector<16x128xf32>
    %50 = vector.extract_strided_slice %7 {offsets = [0, 32], sizes = [16, 32], strides = [1, 1]} : vector<16x128xf32> to vector<16x32xf32>
    %51 = arith.truncf %50 : vector<16x32xf32> to vector<16x32xbf16>
    %52 = vector.extract_strided_slice %8 {offsets = [0, 32], sizes = [16, 32], strides = [1, 1]} : vector<16x128xf32> to vector<16x32xf32>
    %53 = arith.truncf %52 : vector<16x32xf32> to vector<16x32xbf16>
    %54 = vector.extract_strided_slice %9 {offsets = [0, 32], sizes = [16, 32], strides = [1, 1]} : vector<16x128xf32> to vector<16x32xf32>
    %55 = arith.truncf %54 : vector<16x32xf32> to vector<16x32xbf16>
    %cst_16 = arith.constant dense<0.000000e+00> : vector<16x16xf32>
    %56 = tpu.matmul %51, %53, %cst_16 {dimension_numbers = #tpu.dot_dimension_numbers<[1], [1], [0], [0], [0, 0, 1, 0], [], []>} : vector<16x32xbf16>, vector<16x32xbf16>, vector<16x16xf32> -> vector<16x16xf32>
    %cst_17 = arith.constant 0.176776692 : f32
    %57 = vector.broadcast %cst_17 : f32 to vector<16x16xf32>
    %58 = arith.mulf %56, %57 : vector<16x16xf32>
    %cst_18 = arith.constant -1.000000e+30 : f32
    %59 = vector.broadcast %cst_18 : f32 to vector<16x16xf32>
    %60 = arith.select %20, %58, %59 : vector<16x16xi1>, vector<16x16xf32>
    %cst_19 = arith.constant dense<0xFF800000> : vector<16xf32>
    %61 = vector.multi_reduction <maximumf>, %60, %cst_19 [1] : vector<16x16xf32> to vector<16xf32>
    %62 = vector.shape_cast %61 : vector<16xf32> to vector<16x1xf32>
    %63 = vector.broadcast %62 : vector<16x1xf32> to vector<16x16xf32>
    %64 = arith.subf %60, %63 : vector<16x16xf32>
    %65 = math.exp %64 : vector<16x16xf32>
    %cst_20 = arith.constant dense<0.000000e+00> : vector<16xf32>
    %66 = vector.multi_reduction <add>, %65, %cst_20 [1] : vector<16x16xf32> to vector<16xf32>
    %67 = vector.shape_cast %66 : vector<16xf32> to vector<16x1xf32>
    %68 = vector.broadcast %67 : vector<16x1xf32> to vector<16x16xf32>
    %69 = arith.divf %65, %68 : vector<16x16xf32>
    %70 = arith.truncf %69 : vector<16x16xf32> to vector<16x16xbf16>
    %cst_21 = arith.constant dense<0.000000e+00> : vector<16x32xf32>
    %71 = tpu.matmul %70, %55, %cst_21 {dimension_numbers = #tpu.dot_dimension_numbers<[1], [0], [0], [1], [0, 0, 1, 1], [], []>} : vector<16x16xbf16>, vector<16x32xbf16>, vector<16x32xf32> -> vector<16x32xf32>
    %c32 = arith.constant 32 : index
    %c0_22 = arith.constant 0 : index
    %72 = vector.load %arg4[%c32, %c0_22] : memref<128x128xbf16, #tpu.memory_space<vmem>>, vector<32x128xbf16>
    %73 = arith.truncf %71 : vector<16x32xf32> to vector<16x32xbf16>
    %cst_23 = arith.constant dense<0.000000e+00> : vector<16x128xf32>
    %74 = tpu.matmul %73, %72, %cst_23 {dimension_numbers = #tpu.dot_dimension_numbers<[1], [0], [0], [1], [0, 0, 1, 1], [], []>} : vector<16x32xbf16>, vector<32x128xbf16>, vector<16x128xf32> -> vector<16x128xf32>
    %75 = arith.addf %49, %74 : vector<16x128xf32>
    %76 = vector.extract_strided_slice %7 {offsets = [0, 64], sizes = [16, 32], strides = [1, 1]} : vector<16x128xf32> to vector<16x32xf32>
    %77 = arith.truncf %76 : vector<16x32xf32> to vector<16x32xbf16>
    %78 = vector.extract_strided_slice %8 {offsets = [0, 64], sizes = [16, 32], strides = [1, 1]} : vector<16x128xf32> to vector<16x32xf32>
    %79 = arith.truncf %78 : vector<16x32xf32> to vector<16x32xbf16>
    %80 = vector.extract_strided_slice %9 {offsets = [0, 64], sizes = [16, 32], strides = [1, 1]} : vector<16x128xf32> to vector<16x32xf32>
    %81 = arith.truncf %80 : vector<16x32xf32> to vector<16x32xbf16>
    %cst_24 = arith.constant dense<0.000000e+00> : vector<16x16xf32>
    %82 = tpu.matmul %77, %79, %cst_24 {dimension_numbers = #tpu.dot_dimension_numbers<[1], [1], [0], [0], [0, 0, 1, 0], [], []>} : vector<16x32xbf16>, vector<16x32xbf16>, vector<16x16xf32> -> vector<16x16xf32>
    %cst_25 = arith.constant 0.176776692 : f32
    %83 = vector.broadcast %cst_25 : f32 to vector<16x16xf32>
    %84 = arith.mulf %82, %83 : vector<16x16xf32>
    %cst_26 = arith.constant -1.000000e+30 : f32
    %85 = vector.broadcast %cst_26 : f32 to vector<16x16xf32>
    %86 = arith.select %20, %84, %85 : vector<16x16xi1>, vector<16x16xf32>
    %cst_27 = arith.constant dense<0xFF800000> : vector<16xf32>
    %87 = vector.multi_reduction <maximumf>, %86, %cst_27 [1] : vector<16x16xf32> to vector<16xf32>
    %88 = vector.shape_cast %87 : vector<16xf32> to vector<16x1xf32>
    %89 = vector.broadcast %88 : vector<16x1xf32> to vector<16x16xf32>
    %90 = arith.subf %86, %89 : vector<16x16xf32>
    %91 = math.exp %90 : vector<16x16xf32>
    %cst_28 = arith.constant dense<0.000000e+00> : vector<16xf32>
    %92 = vector.multi_reduction <add>, %91, %cst_28 [1] : vector<16x16xf32> to vector<16xf32>
    %93 = vector.shape_cast %92 : vector<16xf32> to vector<16x1xf32>
    %94 = vector.broadcast %93 : vector<16x1xf32> to vector<16x16xf32>
    %95 = arith.divf %91, %94 : vector<16x16xf32>
    %96 = arith.truncf %95 : vector<16x16xf32> to vector<16x16xbf16>
    %cst_29 = arith.constant dense<0.000000e+00> : vector<16x32xf32>
    %97 = tpu.matmul %96, %81, %cst_29 {dimension_numbers = #tpu.dot_dimension_numbers<[1], [0], [0], [1], [0, 0, 1, 1], [], []>} : vector<16x16xbf16>, vector<16x32xbf16>, vector<16x32xf32> -> vector<16x32xf32>
    %c64 = arith.constant 64 : index
    %c0_30 = arith.constant 0 : index
    %98 = vector.load %arg4[%c64, %c0_30] : memref<128x128xbf16, #tpu.memory_space<vmem>>, vector<32x128xbf16>
    %99 = arith.truncf %97 : vector<16x32xf32> to vector<16x32xbf16>
    %cst_31 = arith.constant dense<0.000000e+00> : vector<16x128xf32>
    %100 = tpu.matmul %99, %98, %cst_31 {dimension_numbers = #tpu.dot_dimension_numbers<[1], [0], [0], [1], [0, 0, 1, 1], [], []>} : vector<16x32xbf16>, vector<32x128xbf16>, vector<16x128xf32> -> vector<16x128xf32>
    %101 = arith.addf %75, %100 : vector<16x128xf32>
    %102 = vector.extract_strided_slice %7 {offsets = [0, 96], sizes = [16, 32], strides = [1, 1]} : vector<16x128xf32> to vector<16x32xf32>
    %103 = arith.truncf %102 : vector<16x32xf32> to vector<16x32xbf16>
    %104 = vector.extract_strided_slice %8 {offsets = [0, 96], sizes = [16, 32], strides = [1, 1]} : vector<16x128xf32> to vector<16x32xf32>
    %105 = arith.truncf %104 : vector<16x32xf32> to vector<16x32xbf16>
    %106 = vector.extract_strided_slice %9 {offsets = [0, 96], sizes = [16, 32], strides = [1, 1]} : vector<16x128xf32> to vector<16x32xf32>
    %107 = arith.truncf %106 : vector<16x32xf32> to vector<16x32xbf16>
    %cst_32 = arith.constant dense<0.000000e+00> : vector<16x16xf32>
    %108 = tpu.matmul %103, %105, %cst_32 {dimension_numbers = #tpu.dot_dimension_numbers<[1], [1], [0], [0], [0, 0, 1, 0], [], []>} : vector<16x32xbf16>, vector<16x32xbf16>, vector<16x16xf32> -> vector<16x16xf32>
    %cst_33 = arith.constant 0.176776692 : f32
    %109 = vector.broadcast %cst_33 : f32 to vector<16x16xf32>
    %110 = arith.mulf %108, %109 : vector<16x16xf32>
    %cst_34 = arith.constant -1.000000e+30 : f32
    %111 = vector.broadcast %cst_34 : f32 to vector<16x16xf32>
    %112 = arith.select %20, %110, %111 : vector<16x16xi1>, vector<16x16xf32>
    %cst_35 = arith.constant dense<0xFF800000> : vector<16xf32>
    %113 = vector.multi_reduction <maximumf>, %112, %cst_35 [1] : vector<16x16xf32> to vector<16xf32>
    %114 = vector.shape_cast %113 : vector<16xf32> to vector<16x1xf32>
    %115 = vector.broadcast %114 : vector<16x1xf32> to vector<16x16xf32>
    %116 = arith.subf %112, %115 : vector<16x16xf32>
    %117 = math.exp %116 : vector<16x16xf32>
    %cst_36 = arith.constant dense<0.000000e+00> : vector<16xf32>
    %118 = vector.multi_reduction <add>, %117, %cst_36 [1] : vector<16x16xf32> to vector<16xf32>
    %119 = vector.shape_cast %118 : vector<16xf32> to vector<16x1xf32>
    %120 = vector.broadcast %119 : vector<16x1xf32> to vector<16x16xf32>
    %121 = arith.divf %117, %120 : vector<16x16xf32>
    %122 = arith.truncf %121 : vector<16x16xf32> to vector<16x16xbf16>
    %cst_37 = arith.constant dense<0.000000e+00> : vector<16x32xf32>
    %123 = tpu.matmul %122, %107, %cst_37 {dimension_numbers = #tpu.dot_dimension_numbers<[1], [0], [0], [1], [0, 0, 1, 1], [], []>} : vector<16x16xbf16>, vector<16x32xbf16>, vector<16x32xf32> -> vector<16x32xf32>
    %c96 = arith.constant 96 : index
    %c0_38 = arith.constant 0 : index
    %124 = vector.load %arg4[%c96, %c0_38] : memref<128x128xbf16, #tpu.memory_space<vmem>>, vector<32x128xbf16>
    %125 = arith.truncf %123 : vector<16x32xf32> to vector<16x32xbf16>
    %cst_39 = arith.constant dense<0.000000e+00> : vector<16x128xf32>
    %126 = tpu.matmul %125, %124, %cst_39 {dimension_numbers = #tpu.dot_dimension_numbers<[1], [0], [0], [1], [0, 0, 1, 1], [], []>} : vector<16x32xbf16>, vector<32x128xbf16>, vector<16x128xf32> -> vector<16x128xf32>
    %127 = arith.addf %101, %126 : vector<16x128xf32>
    %128 = arith.addf %0, %127 : vector<16x128xf32>
    %c0_40 = arith.constant 0 : index
    %c0_41 = arith.constant 0 : index
    %129 = vector.load %arg6[%c0_40, %c0_41] : memref<1x128xf32, #tpu.memory_space<vmem>>, vector<1x128xf32>
    %c0_42 = arith.constant 0 : index
    %c0_43 = arith.constant 0 : index
    %130 = vector.load %arg7[%c0_42, %c0_43] : memref<1x128xf32, #tpu.memory_space<vmem>>, vector<1x128xf32>
    %cst_44 = arith.constant dense<0.000000e+00> : vector<16xf32>
    %131 = vector.multi_reduction <add>, %128, %cst_44 [1] : vector<16x128xf32> to vector<16xf32>
    %132 = vector.shape_cast %131 : vector<16xf32> to vector<16x1xf32>
    %cst_45 = arith.constant 1.280000e+02 : f32
    %133 = vector.broadcast %cst_45 : f32 to vector<16x1xf32>
    %134 = arith.divf %132, %133 : vector<16x1xf32>
    %135 = vector.broadcast %134 : vector<16x1xf32> to vector<16x128xf32>
    %136 = arith.subf %128, %135 : vector<16x128xf32>
    %137 = arith.mulf %136, %136 : vector<16x128xf32>
    %cst_46 = arith.constant dense<0.000000e+00> : vector<16xf32>
    %138 = vector.multi_reduction <add>, %137, %cst_46 [1] : vector<16x128xf32> to vector<16xf32>
    %139 = vector.shape_cast %138 : vector<16xf32> to vector<16x1xf32>
    %cst_47 = arith.constant 1.280000e+02 : f32
    %140 = vector.broadcast %cst_47 : f32 to vector<16x1xf32>
    %141 = arith.divf %139, %140 : vector<16x1xf32>
    %142 = vector.broadcast %134 : vector<16x1xf32> to vector<16x128xf32>
    %143 = arith.subf %128, %142 : vector<16x128xf32>
    %cst_48 = arith.constant 9.99999974E-6 : f32
    %144 = vector.broadcast %cst_48 : f32 to vector<16x1xf32>
    %145 = arith.addf %141, %144 : vector<16x1xf32>
    %146 = math.rsqrt %145 : vector<16x1xf32>
    %147 = vector.broadcast %146 : vector<16x1xf32> to vector<16x128xf32>
    %148 = arith.mulf %143, %147 : vector<16x128xf32>
    %149 = vector.broadcast %129 : vector<1x128xf32> to vector<16x128xf32>
    %150 = arith.mulf %148, %149 : vector<16x128xf32>
    %151 = vector.broadcast %130 : vector<1x128xf32> to vector<16x128xf32>
    %152 = arith.addf %150, %151 : vector<16x128xf32>
    %c0_49 = arith.constant 0 : index
    %c0_50 = arith.constant 0 : index
    %153 = vector.load %arg8[%c0_49, %c0_50] : memref<128x256xbf16, #tpu.memory_space<vmem>>, vector<128x256xbf16>
    %154 = arith.truncf %152 : vector<16x128xf32> to vector<16x128xbf16>
    %cst_51 = arith.constant dense<0.000000e+00> : vector<16x256xf32>
    %155 = tpu.matmul %154, %153, %cst_51 {dimension_numbers = #tpu.dot_dimension_numbers<[1], [0], [0], [1], [0, 0, 1, 1], [], []>} : vector<16x128xbf16>, vector<128x256xbf16>, vector<16x256xf32> -> vector<16x256xf32>
    %c0_52 = arith.constant 0 : index
    %c0_53 = arith.constant 0 : index
    %156 = vector.load %arg9[%c0_52, %c0_53] : memref<1x256xf32, #tpu.memory_space<vmem>>, vector<1x256xf32>
    %157 = vector.broadcast %156 : vector<1x256xf32> to vector<16x256xf32>
    %158 = arith.addf %155, %157 : vector<16x256xf32>
    %cst_54 = arith.constant 5.000000e-01 : f32
    %159 = vector.broadcast %cst_54 : f32 to vector<16x256xf32>
    %160 = arith.mulf %159, %158 : vector<16x256xf32>
    %cst_55 = arith.constant 4.471500e-02 : f32
    %161 = vector.broadcast %cst_55 : f32 to vector<16x256xf32>
    %162 = arith.mulf %161, %158 : vector<16x256xf32>
    %163 = arith.mulf %162, %158 : vector<16x256xf32>
    %164 = arith.mulf %163, %158 : vector<16x256xf32>
    %165 = arith.addf %158, %164 : vector<16x256xf32>
    %cst_56 = arith.constant 0.797884583 : f32
    %166 = vector.broadcast %cst_56 : f32 to vector<16x256xf32>
    %167 = arith.mulf %166, %165 : vector<16x256xf32>
    %168 = math.tanh %167 : vector<16x256xf32>
    %cst_57 = arith.constant 1.000000e+00 : f32
    %169 = vector.broadcast %cst_57 : f32 to vector<16x256xf32>
    %170 = arith.addf %169, %168 : vector<16x256xf32>
    %171 = arith.mulf %160, %170 : vector<16x256xf32>
    %c0_58 = arith.constant 0 : index
    %c0_59 = arith.constant 0 : index
    %172 = vector.load %arg10[%c0_58, %c0_59] : memref<256x128xbf16, #tpu.memory_space<vmem>>, vector<256x128xbf16>
    %173 = arith.truncf %171 : vector<16x256xf32> to vector<16x256xbf16>
    %cst_60 = arith.constant dense<0.000000e+00> : vector<16x128xf32>
    %174 = tpu.matmul %173, %172, %cst_60 {dimension_numbers = #tpu.dot_dimension_numbers<[1], [0], [0], [1], [0, 0, 1, 1], [], []>} : vector<16x256xbf16>, vector<256x128xbf16>, vector<16x128xf32> -> vector<16x128xf32>
    %c0_61 = arith.constant 0 : index
    %c0_62 = arith.constant 0 : index
    %175 = vector.load %arg11[%c0_61, %c0_62] : memref<1x128xf32, #tpu.memory_space<vmem>>, vector<1x128xf32>
    %176 = vector.broadcast %175 : vector<1x128xf32> to vector<16x128xf32>
    %177 = arith.addf %174, %176 : vector<16x128xf32>
    %178 = arith.addf %152, %177 : vector<16x128xf32>
    %c0_63 = arith.constant 0 : index
    %c0_64 = arith.constant 0 : index
    %179 = vector.load %arg12[%c0_63, %c0_64] : memref<1x128xf32, #tpu.memory_space<vmem>>, vector<1x128xf32>
    %c0_65 = arith.constant 0 : index
    %c0_66 = arith.constant 0 : index
    %180 = vector.load %arg13[%c0_65, %c0_66] : memref<1x128xf32, #tpu.memory_space<vmem>>, vector<1x128xf32>
    %cst_67 = arith.constant dense<0.000000e+00> : vector<16xf32>
    %181 = vector.multi_reduction <add>, %178, %cst_67 [1] : vector<16x128xf32> to vector<16xf32>
    %182 = vector.shape_cast %181 : vector<16xf32> to vector<16x1xf32>
    %cst_68 = arith.constant 1.280000e+02 : f32
    %183 = vector.broadcast %cst_68 : f32 to vector<16x1xf32>
    %184 = arith.divf %182, %183 : vector<16x1xf32>
    %185 = vector.broadcast %184 : vector<16x1xf32> to vector<16x128xf32>
    %186 = arith.subf %178, %185 : vector<16x128xf32>
    %187 = arith.mulf %186, %186 : vector<16x128xf32>
    %cst_69 = arith.constant dense<0.000000e+00> : vector<16xf32>
    %188 = vector.multi_reduction <add>, %187, %cst_69 [1] : vector<16x128xf32> to vector<16xf32>
    %189 = vector.shape_cast %188 : vector<16xf32> to vector<16x1xf32>
    %cst_70 = arith.constant 1.280000e+02 : f32
    %190 = vector.broadcast %cst_70 : f32 to vector<16x1xf32>
    %191 = arith.divf %189, %190 : vector<16x1xf32>
    %192 = vector.broadcast %184 : vector<16x1xf32> to vector<16x128xf32>
    %193 = arith.subf %178, %192 : vector<16x128xf32>
    %cst_71 = arith.constant 9.99999974E-6 : f32
    %194 = vector.broadcast %cst_71 : f32 to vector<16x1xf32>
    %195 = arith.addf %191, %194 : vector<16x1xf32>
    %196 = math.rsqrt %195 : vector<16x1xf32>
    %197 = vector.broadcast %196 : vector<16x1xf32> to vector<16x128xf32>
    %198 = arith.mulf %193, %197 : vector<16x128xf32>
    %199 = vector.broadcast %179 : vector<1x128xf32> to vector<16x128xf32>
    %200 = arith.mulf %198, %199 : vector<16x128xf32>
    %201 = vector.broadcast %180 : vector<1x128xf32> to vector<16x128xf32>
    %202 = arith.addf %200, %201 : vector<16x128xf32>
    %c0_72 = arith.constant 0 : index
    %c0_73 = arith.constant 0 : index
    %203 = vector.load %arg14[%c0_72, %c0_73] : memref<16x128xf32, #tpu.memory_space<vmem>>, vector<16x128xf32>
    tpu.vector_store %arg14[%c0_72, %c0_73], %202 {strides = array<i32>} : memref<16x128xf32, #tpu.memory_space<vmem>>, vector<16x128xf32>,
    return
  }
  func.func @transform_0(%arg0: i32) -> (i32, i32) {
    %c0_i32 = arith.constant 0 : i32
    %c0_i32_0 = arith.constant 0 : i32
    %c0_i32_1 = arith.constant 0 : i32
    return %c0_i32, %c0_i32_0 : i32, i32
  }
  func.func @transform_1(%arg0: i32) -> (i32, i32) {
    %c0_i32 = arith.constant 0 : i32
    %c0_i32_0 = arith.constant 0 : i32
    %c0_i32_1 = arith.constant 0 : i32
    return %c0_i32, %c0_i32_0 : i32, i32
  }
  func.func @transform_2(%arg0: i32) -> (i32, i32) {
    %c0_i32 = arith.constant 0 : i32
    %c0_i32_0 = arith.constant 0 : i32
    %c0_i32_1 = arith.constant 0 : i32
    return %c0_i32, %c0_i32_0 : i32, i32
  }
  func.func @transform_3(%arg0: i32) -> (i32, i32) {
    %c0_i32 = arith.constant 0 : i32
    %c0_i32_0 = arith.constant 0 : i32
    %c0_i32_1 = arith.constant 0 : i32
    return %c0_i32, %c0_i32_0 : i32, i32
  }
  func.func @transform_4(%arg0: i32) -> (i32, i32) {
    %c0_i32 = arith.constant 0 : i32
    %c0_i32_0 = arith.constant 0 : i32
    %c0_i32_1 = arith.constant 0 : i32
    return %c0_i32, %c0_i32_0 : i32, i32
  }
  func.func @transform_5(%arg0: i32) -> (i32, i32) {
    %c0_i32 = arith.constant 0 : i32
    %c0_i32_0 = arith.constant 0 : i32
    %c0_i32_1 = arith.constant 0 : i32
    return %c0_i32, %c0_i32_0 : i32, i32
  }
  func.func @transform_6(%arg0: i32) -> (i32, i32) {
    %c0_i32 = arith.constant 0 : i32
    %c0_i32_0 = arith.constant 0 : i32
    %c0_i32_1 = arith.constant 0 : i32
    return %c0_i32, %c0_i32_0 : i32, i32
  }
  func.func @transform_7(%arg0: i32) -> (i32, i32) {
    %c0_i32 = arith.constant 0 : i32
    %c0_i32_0 = arith.constant 0 : i32
    %c0_i32_1 = arith.constant 0 : i32
    return %c0_i32, %c0_i32_0 : i32, i32
  }
  func.func @transform_8(%arg0: i32) -> (i32, i32) {
    %c0_i32 = arith.constant 0 : i32
    %c0_i32_0 = arith.constant 0 : i32
    %c0_i32_1 = arith.constant 0 : i32
    return %c0_i32, %c0_i32_0 : i32, i32
  }
  func.func @transform_9(%arg0: i32) -> (i32, i32) {
    %c0_i32 = arith.constant 0 : i32
    %c0_i32_0 = arith.constant 0 : i32
    %c0_i32_1 = arith.constant 0 : i32
    return %c0_i32, %c0_i32_0 : i32, i32
  }
  func.func @transform_10(%arg0: i32) -> (i32, i32) {
    %c0_i32 = arith.constant 0 : i32
    %c0_i32_0 = arith.constant 0 : i32
    %c0_i32_1 = arith.constant 0 : i32
    return %c0_i32, %c0_i32_0 : i32, i32
  }
  func.func @transform_11(%arg0: i32) -> (i32, i32) {
    %c0_i32 = arith.constant 0 : i32
    %c0_i32_0 = arith.constant 0 : i32
    %c0_i32_1 = arith.constant 0 : i32
    return %c0_i32, %c0_i32_0 : i32, i32
  }
  func.func @transform_12(%arg0: i32) -> (i32, i32) {
    %c0_i32 = arith.constant 0 : i32
    %c0_i32_0 = arith.constant 0 : i32
    %c0_i32_1 = arith.constant 0 : i32
    return %c0_i32, %c0_i32_0 : i32, i32
  }
  func.func @transform_13(%arg0: i32) -> (i32, i32) {
    %c0_i32 = arith.constant 0 : i32
    %c0_i32_0 = arith.constant 0 : i32
    %c0_i32_1 = arith.constant 0 : i32
    return %c0_i32, %c0_i32_0 : i32, i32
  }
}

module attributes {stable_mosaic.version = 11 : i64} {
  func.func @_mem_resp_kernel(%arg0: i32, %arg1: memref<2x128xf32, #tpu.memory_space<vmem>>, %arg2: memref<2x128xf32, #tpu.memory_space<vmem>>, %arg3: memref<2x128xf32, #tpu.memory_space<vmem>>, %arg4: memref<128x128xf32, #tpu.memory_space<vmem>>, %arg5: memref<128x128xbf16, #tpu.memory_space<vmem>>, %arg6: memref<1x128xf32, #tpu.memory_space<vmem>>, %arg7: memref<128x256xbf16, #tpu.memory_space<vmem>>, %arg8: memref<1x256xf32, #tpu.memory_space<vmem>>, %arg9: memref<128x128xbf16, #tpu.memory_space<vmem>>, %arg10: memref<1x128xf32, #tpu.memory_space<vmem>>, %arg11: memref<128x256xbf16, #tpu.memory_space<vmem>>, %arg12: memref<128x256xbf16, #tpu.memory_space<vmem>>, %arg13: memref<128x256xbf16, #tpu.memory_space<vmem>>, %arg14: memref<1x256xf32, #tpu.memory_space<vmem>>, %arg15: memref<256x256xbf16, #tpu.memory_space<vmem>>, %arg16: memref<1x256xf32, #tpu.memory_space<vmem>>, %arg17: memref<2x256xf32, #tpu.memory_space<vmem>>, %arg18: memref<2x128xf32, #tpu.memory_space<vmem>>) attributes {dimension_semantics = [#tpu.dimension_semantics<arbitrary>], iteration_bounds = array<i64: 1>, scalar_prefetch = 0 : i64, scratch_operands = 0 : i64, tpu.core_type = #tpu.core_type<tc>, window_params = [{pipeline_mode = #tpu.pipeline_mode<synchronous>, transform_indices = @transform_0, window_bounds = array<i64: 2, 128>}, {pipeline_mode = #tpu.pipeline_mode<synchronous>, transform_indices = @transform_1, window_bounds = array<i64: 2, 128>}, {pipeline_mode = #tpu.pipeline_mode<synchronous>, transform_indices = @transform_2, window_bounds = array<i64: 2, 128>}, {pipeline_mode = #tpu.pipeline_mode<synchronous>, transform_indices = @transform_3, window_bounds = array<i64: 128, 128>}, {pipeline_mode = #tpu.pipeline_mode<synchronous>, transform_indices = @transform_4, window_bounds = array<i64: 128, 128>}, {pipeline_mode = #tpu.pipeline_mode<synchronous>, transform_indices = @transform_5, window_bounds = array<i64: 1, 128>}, {pipeline_mode = #tpu.pipeline_mode<synchronous>, transform_indices = @transform_6, window_bounds = array<i64: 128, 256>}, {pipeline_mode = #tpu.pipeline_mode<synchronous>, transform_indices = @transform_7, window_bounds = array<i64: 1, 256>}, {pipeline_mode = #tpu.pipeline_mode<synchronous>, transform_indices = @transform_8, window_bounds = array<i64: 128, 128>}, {pipeline_mode = #tpu.pipeline_mode<synchronous>, transform_indices = @transform_9, window_bounds = array<i64: 1, 128>}, {pipeline_mode = #tpu.pipeline_mode<synchronous>, transform_indices = @transform_10, window_bounds = array<i64: 128, 256>}, {pipeline_mode = #tpu.pipeline_mode<synchronous>, transform_indices = @transform_11, window_bounds = array<i64: 128, 256>}, {pipeline_mode = #tpu.pipeline_mode<synchronous>, transform_indices = @transform_12, window_bounds = array<i64: 128, 256>}, {pipeline_mode = #tpu.pipeline_mode<synchronous>, transform_indices = @transform_13, window_bounds = array<i64: 1, 256>}, {pipeline_mode = #tpu.pipeline_mode<synchronous>, transform_indices = @transform_14, window_bounds = array<i64: 256, 256>}, {pipeline_mode = #tpu.pipeline_mode<synchronous>, transform_indices = @transform_15, window_bounds = array<i64: 1, 256>}, {pipeline_mode = #tpu.pipeline_mode<synchronous>, transform_indices = @transform_16, window_bounds = array<i64: 2, 256>}, {pipeline_mode = #tpu.pipeline_mode<synchronous>, transform_indices = @transform_17, window_bounds = array<i64: 2, 128>}]} {
    %c0 = arith.constant 0 : index
    %c0_0 = arith.constant 0 : index
    %0 = vector.load %arg1[%c0, %c0_0] : memref<2x128xf32, #tpu.memory_space<vmem>>, vector<2x128xf32>
    %c0_1 = arith.constant 0 : index
    %c0_2 = arith.constant 0 : index
    %1 = vector.load %arg5[%c0_1, %c0_2] : memref<128x128xbf16, #tpu.memory_space<vmem>>, vector<128x128xbf16>
    %2 = arith.truncf %0 : vector<2x128xf32> to vector<2x128xbf16>
    %cst = arith.constant dense<0.000000e+00> : vector<2x128xf32>
    %3 = tpu.matmul %2, %1, %cst {dimension_numbers = #tpu.dot_dimension_numbers<[1], [0], [0], [1], [0, 0, 1, 1], [], []>} : vector<2x128xbf16>, vector<128x128xbf16>, vector<2x128xf32> -> vector<2x128xf32>
    %c0_3 = arith.constant 0 : index
    %c0_4 = arith.constant 0 : index
    %4 = vector.load %arg6[%c0_3, %c0_4] : memref<1x128xf32, #tpu.memory_space<vmem>>, vector<1x128xf32>
    %5 = vector.broadcast %4 : vector<1x128xf32> to vector<2x128xf32>
    %6 = arith.addf %3, %5 : vector<2x128xf32>
    %c0_5 = arith.constant 0 : index
    %c0_6 = arith.constant 0 : index
    %7 = vector.load %arg4[%c0_5, %c0_6] : memref<128x128xf32, #tpu.memory_space<vmem>>, vector<128x128xf32>
    %c0_7 = arith.constant 0 : index
    %c0_8 = arith.constant 0 : index
    %8 = vector.load %arg7[%c0_7, %c0_8] : memref<128x256xbf16, #tpu.memory_space<vmem>>, vector<128x256xbf16>
    %9 = arith.truncf %7 : vector<128x128xf32> to vector<128x128xbf16>
    %cst_9 = arith.constant dense<0.000000e+00> : vector<128x256xf32>
    %10 = tpu.matmul %9, %8, %cst_9 {dimension_numbers = #tpu.dot_dimension_numbers<[1], [0], [0], [1], [0, 0, 1, 1], [], []>} : vector<128x128xbf16>, vector<128x256xbf16>, vector<128x256xf32> -> vector<128x256xf32>
    %c0_10 = arith.constant 0 : index
    %c0_11 = arith.constant 0 : index
    %11 = vector.load %arg8[%c0_10, %c0_11] : memref<1x256xf32, #tpu.memory_space<vmem>>, vector<1x256xf32>
    %12 = vector.broadcast %11 : vector<1x256xf32> to vector<128x256xf32>
    %13 = arith.addf %10, %12 : vector<128x256xf32>
    %14 = vector.extract_strided_slice %13 {offsets = [0, 0], sizes = [128, 128], strides = [1, 1]} : vector<128x256xf32> to vector<128x128xf32>
    %15 = vector.extract_strided_slice %13 {offsets = [0, 128], sizes = [128, 128], strides = [1, 1]} : vector<128x256xf32> to vector<128x128xf32>
    %16 = tpu.iota {dimensions = array<i32: 1>} : vector<2x128xi32>
    %c100_i32 = arith.constant 100 : i32
    %17 = vector.broadcast %c100_i32 : i32 to vector<2x128xi32>
    %18 = arith.cmpi slt, %16, %17 : vector<2x128xi32>
    %c0_12 = arith.constant 0 : index
    %c0_13 = arith.constant 0 : index
    %19 = vector.load %arg10[%c0_12, %c0_13] : memref<1x128xf32, #tpu.memory_space<vmem>>, vector<1x128xf32>
    %20 = vector.shape_cast %19 : vector<1x128xf32> to vector<1x128xf32>
    %21 = vector.broadcast %20 : vector<1x128xf32> to vector<2x128xf32>
    %22 = vector.extract_strided_slice %6 {offsets = [0, 0], sizes = [2, 32], strides = [1, 1]} : vector<2x128xf32> to vector<2x32xf32>
    %23 = arith.truncf %22 : vector<2x32xf32> to vector<2x32xbf16>
    %24 = vector.extract_strided_slice %14 {offsets = [0, 0], sizes = [128, 32], strides = [1, 1]} : vector<128x128xf32> to vector<128x32xf32>
    %25 = arith.truncf %24 : vector<128x32xf32> to vector<128x32xbf16>
    %26 = vector.extract_strided_slice %15 {offsets = [0, 0], sizes = [128, 32], strides = [1, 1]} : vector<128x128xf32> to vector<128x32xf32>
    %27 = arith.truncf %26 : vector<128x32xf32> to vector<128x32xbf16>
    %cst_14 = arith.constant dense<0.000000e+00> : vector<2x128xf32>
    %28 = tpu.matmul %23, %25, %cst_14 {dimension_numbers = #tpu.dot_dimension_numbers<[1], [1], [0], [0], [0, 0, 1, 0], [], []>} : vector<2x32xbf16>, vector<128x32xbf16>, vector<2x128xf32> -> vector<2x128xf32>
    %cst_15 = arith.constant 0.176776692 : f32
    %29 = vector.broadcast %cst_15 : f32 to vector<2x128xf32>
    %30 = arith.mulf %28, %29 : vector<2x128xf32>
    %cst_16 = arith.constant -1.000000e+30 : f32
    %31 = vector.broadcast %cst_16 : f32 to vector<2x128xf32>
    %32 = arith.select %18, %30, %31 : vector<2x128xi1>, vector<2x128xf32>
    %cst_17 = arith.constant dense<0xFF800000> : vector<2xf32>
    %33 = vector.multi_reduction <maximumf>, %32, %cst_17 [1] : vector<2x128xf32> to vector<2xf32>
    %34 = vector.shape_cast %33 : vector<2xf32> to vector<2x1xf32>
    %35 = vector.broadcast %34 : vector<2x1xf32> to vector<2x128xf32>
    %36 = arith.subf %32, %35 : vector<2x128xf32>
    %37 = math.exp %36 : vector<2x128xf32>
    %cst_18 = arith.constant dense<0.000000e+00> : vector<2xf32>
    %38 = vector.multi_reduction <add>, %37, %cst_18 [1] : vector<2x128xf32> to vector<2xf32>
    %39 = vector.shape_cast %38 : vector<2xf32> to vector<2x1xf32>
    %40 = vector.broadcast %39 : vector<2x1xf32> to vector<2x128xf32>
    %41 = arith.divf %37, %40 : vector<2x128xf32>
    %42 = arith.truncf %41 : vector<2x128xf32> to vector<2x128xbf16>
    %cst_19 = arith.constant dense<0.000000e+00> : vector<2x32xf32>
    %43 = tpu.matmul %42, %27, %cst_19 {dimension_numbers = #tpu.dot_dimension_numbers<[1], [0], [0], [1], [0, 0, 1, 1], [], []>} : vector<2x128xbf16>, vector<128x32xbf16>, vector<2x32xf32> -> vector<2x32xf32>
    %c0_20 = arith.constant 0 : index
    %c0_21 = arith.constant 0 : index
    %44 = vector.load %arg9[%c0_20, %c0_21] : memref<128x128xbf16, #tpu.memory_space<vmem>>, vector<32x128xbf16>
    %45 = arith.truncf %43 : vector<2x32xf32> to vector<2x32xbf16>
    %cst_22 = arith.constant dense<0.000000e+00> : vector<2x128xf32>
    %46 = tpu.matmul %45, %44, %cst_22 {dimension_numbers = #tpu.dot_dimension_numbers<[1], [0], [0], [1], [0, 0, 1, 1], [], []>} : vector<2x32xbf16>, vector<32x128xbf16>, vector<2x128xf32> -> vector<2x128xf32>
    %47 = arith.addf %21, %46 : vector<2x128xf32>
    %48 = vector.extract_strided_slice %6 {offsets = [0, 32], sizes = [2, 32], strides = [1, 1]} : vector<2x128xf32> to vector<2x32xf32>
    %49 = arith.truncf %48 : vector<2x32xf32> to vector<2x32xbf16>
    %50 = vector.extract_strided_slice %14 {offsets = [0, 32], sizes = [128, 32], strides = [1, 1]} : vector<128x128xf32> to vector<128x32xf32>
    %51 = arith.truncf %50 : vector<128x32xf32> to vector<128x32xbf16>
    %52 = vector.extract_strided_slice %15 {offsets = [0, 32], sizes = [128, 32], strides = [1, 1]} : vector<128x128xf32> to vector<128x32xf32>
    %53 = arith.truncf %52 : vector<128x32xf32> to vector<128x32xbf16>
    %cst_23 = arith.constant dense<0.000000e+00> : vector<2x128xf32>
    %54 = tpu.matmul %49, %51, %cst_23 {dimension_numbers = #tpu.dot_dimension_numbers<[1], [1], [0], [0], [0, 0, 1, 0], [], []>} : vector<2x32xbf16>, vector<128x32xbf16>, vector<2x128xf32> -> vector<2x128xf32>
    %cst_24 = arith.constant 0.176776692 : f32
    %55 = vector.broadcast %cst_24 : f32 to vector<2x128xf32>
    %56 = arith.mulf %54, %55 : vector<2x128xf32>
    %cst_25 = arith.constant -1.000000e+30 : f32
    %57 = vector.broadcast %cst_25 : f32 to vector<2x128xf32>
    %58 = arith.select %18, %56, %57 : vector<2x128xi1>, vector<2x128xf32>
    %cst_26 = arith.constant dense<0xFF800000> : vector<2xf32>
    %59 = vector.multi_reduction <maximumf>, %58, %cst_26 [1] : vector<2x128xf32> to vector<2xf32>
    %60 = vector.shape_cast %59 : vector<2xf32> to vector<2x1xf32>
    %61 = vector.broadcast %60 : vector<2x1xf32> to vector<2x128xf32>
    %62 = arith.subf %58, %61 : vector<2x128xf32>
    %63 = math.exp %62 : vector<2x128xf32>
    %cst_27 = arith.constant dense<0.000000e+00> : vector<2xf32>
    %64 = vector.multi_reduction <add>, %63, %cst_27 [1] : vector<2x128xf32> to vector<2xf32>
    %65 = vector.shape_cast %64 : vector<2xf32> to vector<2x1xf32>
    %66 = vector.broadcast %65 : vector<2x1xf32> to vector<2x128xf32>
    %67 = arith.divf %63, %66 : vector<2x128xf32>
    %68 = arith.truncf %67 : vector<2x128xf32> to vector<2x128xbf16>
    %cst_28 = arith.constant dense<0.000000e+00> : vector<2x32xf32>
    %69 = tpu.matmul %68, %53, %cst_28 {dimension_numbers = #tpu.dot_dimension_numbers<[1], [0], [0], [1], [0, 0, 1, 1], [], []>} : vector<2x128xbf16>, vector<128x32xbf16>, vector<2x32xf32> -> vector<2x32xf32>
    %c32 = arith.constant 32 : index
    %c0_29 = arith.constant 0 : index
    %70 = vector.load %arg9[%c32, %c0_29] : memref<128x128xbf16, #tpu.memory_space<vmem>>, vector<32x128xbf16>
    %71 = arith.truncf %69 : vector<2x32xf32> to vector<2x32xbf16>
    %cst_30 = arith.constant dense<0.000000e+00> : vector<2x128xf32>
    %72 = tpu.matmul %71, %70, %cst_30 {dimension_numbers = #tpu.dot_dimension_numbers<[1], [0], [0], [1], [0, 0, 1, 1], [], []>} : vector<2x32xbf16>, vector<32x128xbf16>, vector<2x128xf32> -> vector<2x128xf32>
    %73 = arith.addf %47, %72 : vector<2x128xf32>
    %74 = vector.extract_strided_slice %6 {offsets = [0, 64], sizes = [2, 32], strides = [1, 1]} : vector<2x128xf32> to vector<2x32xf32>
    %75 = arith.truncf %74 : vector<2x32xf32> to vector<2x32xbf16>
    %76 = vector.extract_strided_slice %14 {offsets = [0, 64], sizes = [128, 32], strides = [1, 1]} : vector<128x128xf32> to vector<128x32xf32>
    %77 = arith.truncf %76 : vector<128x32xf32> to vector<128x32xbf16>
    %78 = vector.extract_strided_slice %15 {offsets = [0, 64], sizes = [128, 32], strides = [1, 1]} : vector<128x128xf32> to vector<128x32xf32>
    %79 = arith.truncf %78 : vector<128x32xf32> to vector<128x32xbf16>
    %cst_31 = arith.constant dense<0.000000e+00> : vector<2x128xf32>
    %80 = tpu.matmul %75, %77, %cst_31 {dimension_numbers = #tpu.dot_dimension_numbers<[1], [1], [0], [0], [0, 0, 1, 0], [], []>} : vector<2x32xbf16>, vector<128x32xbf16>, vector<2x128xf32> -> vector<2x128xf32>
    %cst_32 = arith.constant 0.176776692 : f32
    %81 = vector.broadcast %cst_32 : f32 to vector<2x128xf32>
    %82 = arith.mulf %80, %81 : vector<2x128xf32>
    %cst_33 = arith.constant -1.000000e+30 : f32
    %83 = vector.broadcast %cst_33 : f32 to vector<2x128xf32>
    %84 = arith.select %18, %82, %83 : vector<2x128xi1>, vector<2x128xf32>
    %cst_34 = arith.constant dense<0xFF800000> : vector<2xf32>
    %85 = vector.multi_reduction <maximumf>, %84, %cst_34 [1] : vector<2x128xf32> to vector<2xf32>
    %86 = vector.shape_cast %85 : vector<2xf32> to vector<2x1xf32>
    %87 = vector.broadcast %86 : vector<2x1xf32> to vector<2x128xf32>
    %88 = arith.subf %84, %87 : vector<2x128xf32>
    %89 = math.exp %88 : vector<2x128xf32>
    %cst_35 = arith.constant dense<0.000000e+00> : vector<2xf32>
    %90 = vector.multi_reduction <add>, %89, %cst_35 [1] : vector<2x128xf32> to vector<2xf32>
    %91 = vector.shape_cast %90 : vector<2xf32> to vector<2x1xf32>
    %92 = vector.broadcast %91 : vector<2x1xf32> to vector<2x128xf32>
    %93 = arith.divf %89, %92 : vector<2x128xf32>
    %94 = arith.truncf %93 : vector<2x128xf32> to vector<2x128xbf16>
    %cst_36 = arith.constant dense<0.000000e+00> : vector<2x32xf32>
    %95 = tpu.matmul %94, %79, %cst_36 {dimension_numbers = #tpu.dot_dimension_numbers<[1], [0], [0], [1], [0, 0, 1, 1], [], []>} : vector<2x128xbf16>, vector<128x32xbf16>, vector<2x32xf32> -> vector<2x32xf32>
    %c64 = arith.constant 64 : index
    %c0_37 = arith.constant 0 : index
    %96 = vector.load %arg9[%c64, %c0_37] : memref<128x128xbf16, #tpu.memory_space<vmem>>, vector<32x128xbf16>
    %97 = arith.truncf %95 : vector<2x32xf32> to vector<2x32xbf16>
    %cst_38 = arith.constant dense<0.000000e+00> : vector<2x128xf32>
    %98 = tpu.matmul %97, %96, %cst_38 {dimension_numbers = #tpu.dot_dimension_numbers<[1], [0], [0], [1], [0, 0, 1, 1], [], []>} : vector<2x32xbf16>, vector<32x128xbf16>, vector<2x128xf32> -> vector<2x128xf32>
    %99 = arith.addf %73, %98 : vector<2x128xf32>
    %100 = vector.extract_strided_slice %6 {offsets = [0, 96], sizes = [2, 32], strides = [1, 1]} : vector<2x128xf32> to vector<2x32xf32>
    %101 = arith.truncf %100 : vector<2x32xf32> to vector<2x32xbf16>
    %102 = vector.extract_strided_slice %14 {offsets = [0, 96], sizes = [128, 32], strides = [1, 1]} : vector<128x128xf32> to vector<128x32xf32>
    %103 = arith.truncf %102 : vector<128x32xf32> to vector<128x32xbf16>
    %104 = vector.extract_strided_slice %15 {offsets = [0, 96], sizes = [128, 32], strides = [1, 1]} : vector<128x128xf32> to vector<128x32xf32>
    %105 = arith.truncf %104 : vector<128x32xf32> to vector<128x32xbf16>
    %cst_39 = arith.constant dense<0.000000e+00> : vector<2x128xf32>
    %106 = tpu.matmul %101, %103, %cst_39 {dimension_numbers = #tpu.dot_dimension_numbers<[1], [1], [0], [0], [0, 0, 1, 0], [], []>} : vector<2x32xbf16>, vector<128x32xbf16>, vector<2x128xf32> -> vector<2x128xf32>
    %cst_40 = arith.constant 0.176776692 : f32
    %107 = vector.broadcast %cst_40 : f32 to vector<2x128xf32>
    %108 = arith.mulf %106, %107 : vector<2x128xf32>
    %cst_41 = arith.constant -1.000000e+30 : f32
    %109 = vector.broadcast %cst_41 : f32 to vector<2x128xf32>
    %110 = arith.select %18, %108, %109 : vector<2x128xi1>, vector<2x128xf32>
    %cst_42 = arith.constant dense<0xFF800000> : vector<2xf32>
    %111 = vector.multi_reduction <maximumf>, %110, %cst_42 [1] : vector<2x128xf32> to vector<2xf32>
    %112 = vector.shape_cast %111 : vector<2xf32> to vector<2x1xf32>
    %113 = vector.broadcast %112 : vector<2x1xf32> to vector<2x128xf32>
    %114 = arith.subf %110, %113 : vector<2x128xf32>
    %115 = math.exp %114 : vector<2x128xf32>
    %cst_43 = arith.constant dense<0.000000e+00> : vector<2xf32>
    %116 = vector.multi_reduction <add>, %115, %cst_43 [1] : vector<2x128xf32> to vector<2xf32>
    %117 = vector.shape_cast %116 : vector<2xf32> to vector<2x1xf32>
    %118 = vector.broadcast %117 : vector<2x1xf32> to vector<2x128xf32>
    %119 = arith.divf %115, %118 : vector<2x128xf32>
    %120 = arith.truncf %119 : vector<2x128xf32> to vector<2x128xbf16>
    %cst_44 = arith.constant dense<0.000000e+00> : vector<2x32xf32>
    %121 = tpu.matmul %120, %105, %cst_44 {dimension_numbers = #tpu.dot_dimension_numbers<[1], [0], [0], [1], [0, 0, 1, 1], [], []>} : vector<2x128xbf16>, vector<128x32xbf16>, vector<2x32xf32> -> vector<2x32xf32>
    %c96 = arith.constant 96 : index
    %c0_45 = arith.constant 0 : index
    %122 = vector.load %arg9[%c96, %c0_45] : memref<128x128xbf16, #tpu.memory_space<vmem>>, vector<32x128xbf16>
    %123 = arith.truncf %121 : vector<2x32xf32> to vector<2x32xbf16>
    %cst_46 = arith.constant dense<0.000000e+00> : vector<2x128xf32>
    %124 = tpu.matmul %123, %122, %cst_46 {dimension_numbers = #tpu.dot_dimension_numbers<[1], [0], [0], [1], [0, 0, 1, 1], [], []>} : vector<2x32xbf16>, vector<32x128xbf16>, vector<2x128xf32> -> vector<2x128xf32>
    %125 = arith.addf %99, %124 : vector<2x128xf32>
    %126 = arith.addf %0, %125 : vector<2x128xf32>
    %c0_47 = arith.constant 0 : index
    %c0_48 = arith.constant 0 : index
    %127 = vector.load %arg18[%c0_47, %c0_48] : memref<2x128xf32, #tpu.memory_space<vmem>>, vector<2x128xf32>
    tpu.vector_store %arg18[%c0_47, %c0_48], %126 {strides = array<i32>} : memref<2x128xf32, #tpu.memory_space<vmem>>, vector<2x128xf32>,
    %c0_49 = arith.constant 0 : index
    %c0_50 = arith.constant 0 : index
    %128 = vector.load %arg11[%c0_49, %c0_50] : memref<128x256xbf16, #tpu.memory_space<vmem>>, vector<128x256xbf16>
    %129 = arith.truncf %126 : vector<2x128xf32> to vector<2x128xbf16>
    %cst_51 = arith.constant dense<0.000000e+00> : vector<2x256xf32>
    %130 = tpu.matmul %129, %128, %cst_51 {dimension_numbers = #tpu.dot_dimension_numbers<[1], [0], [0], [1], [0, 0, 1, 1], [], []>} : vector<2x128xbf16>, vector<128x256xbf16>, vector<2x256xf32> -> vector<2x256xf32>
    %c0_52 = arith.constant 0 : index
    %c0_53 = arith.constant 0 : index
    %131 = vector.load %arg2[%c0_52, %c0_53] : memref<2x128xf32, #tpu.memory_space<vmem>>, vector<2x128xf32>
    %c0_54 = arith.constant 0 : index
    %c0_55 = arith.constant 0 : index
    %132 = vector.load %arg12[%c0_54, %c0_55] : memref<128x256xbf16, #tpu.memory_space<vmem>>, vector<128x256xbf16>
    %133 = arith.truncf %131 : vector<2x128xf32> to vector<2x128xbf16>
    %cst_56 = arith.constant dense<0.000000e+00> : vector<2x256xf32>
    %134 = tpu.matmul %133, %132, %cst_56 {dimension_numbers = #tpu.dot_dimension_numbers<[1], [0], [0], [1], [0, 0, 1, 1], [], []>} : vector<2x128xbf16>, vector<128x256xbf16>, vector<2x256xf32> -> vector<2x256xf32>
    %135 = arith.addf %130, %134 : vector<2x256xf32>
    %c0_57 = arith.constant 0 : index
    %c0_58 = arith.constant 0 : index
    %136 = vector.load %arg3[%c0_57, %c0_58] : memref<2x128xf32, #tpu.memory_space<vmem>>, vector<2x128xf32>
    %c0_59 = arith.constant 0 : index
    %c0_60 = arith.constant 0 : index
    %137 = vector.load %arg13[%c0_59, %c0_60] : memref<128x256xbf16, #tpu.memory_space<vmem>>, vector<128x256xbf16>
    %138 = arith.truncf %136 : vector<2x128xf32> to vector<2x128xbf16>
    %cst_61 = arith.constant dense<0.000000e+00> : vector<2x256xf32>
    %139 = tpu.matmul %138, %137, %cst_61 {dimension_numbers = #tpu.dot_dimension_numbers<[1], [0], [0], [1], [0, 0, 1, 1], [], []>} : vector<2x128xbf16>, vector<128x256xbf16>, vector<2x256xf32> -> vector<2x256xf32>
    %140 = arith.addf %135, %139 : vector<2x256xf32>
    %c0_62 = arith.constant 0 : index
    %c0_63 = arith.constant 0 : index
    %141 = vector.load %arg14[%c0_62, %c0_63] : memref<1x256xf32, #tpu.memory_space<vmem>>, vector<1x256xf32>
    %142 = vector.broadcast %141 : vector<1x256xf32> to vector<2x256xf32>
    %143 = arith.addf %140, %142 : vector<2x256xf32>
    %cst_64 = arith.constant 5.000000e-01 : f32
    %144 = vector.broadcast %cst_64 : f32 to vector<2x256xf32>
    %145 = arith.mulf %144, %143 : vector<2x256xf32>
    %cst_65 = arith.constant 4.471500e-02 : f32
    %146 = vector.broadcast %cst_65 : f32 to vector<2x256xf32>
    %147 = arith.mulf %146, %143 : vector<2x256xf32>
    %148 = arith.mulf %147, %143 : vector<2x256xf32>
    %149 = arith.mulf %148, %143 : vector<2x256xf32>
    %150 = arith.addf %143, %149 : vector<2x256xf32>
    %cst_66 = arith.constant 0.797884583 : f32
    %151 = vector.broadcast %cst_66 : f32 to vector<2x256xf32>
    %152 = arith.mulf %151, %150 : vector<2x256xf32>
    %153 = math.tanh %152 : vector<2x256xf32>
    %cst_67 = arith.constant 1.000000e+00 : f32
    %154 = vector.broadcast %cst_67 : f32 to vector<2x256xf32>
    %155 = arith.addf %154, %153 : vector<2x256xf32>
    %156 = arith.mulf %145, %155 : vector<2x256xf32>
    %c0_68 = arith.constant 0 : index
    %c0_69 = arith.constant 0 : index
    %157 = vector.load %arg15[%c0_68, %c0_69] : memref<256x256xbf16, #tpu.memory_space<vmem>>, vector<256x256xbf16>
    %158 = arith.truncf %156 : vector<2x256xf32> to vector<2x256xbf16>
    %cst_70 = arith.constant dense<0.000000e+00> : vector<2x256xf32>
    %159 = tpu.matmul %158, %157, %cst_70 {dimension_numbers = #tpu.dot_dimension_numbers<[1], [0], [0], [1], [0, 0, 1, 1], [], []>} : vector<2x256xbf16>, vector<256x256xbf16>, vector<2x256xf32> -> vector<2x256xf32>
    %c0_71 = arith.constant 0 : index
    %c0_72 = arith.constant 0 : index
    %160 = vector.load %arg16[%c0_71, %c0_72] : memref<1x256xf32, #tpu.memory_space<vmem>>, vector<1x256xf32>
    %161 = vector.broadcast %160 : vector<1x256xf32> to vector<2x256xf32>
    %162 = arith.addf %159, %161 : vector<2x256xf32>
    %c0_73 = arith.constant 0 : index
    %c0_74 = arith.constant 0 : index
    %163 = vector.load %arg17[%c0_73, %c0_74] : memref<2x256xf32, #tpu.memory_space<vmem>>, vector<2x256xf32>
    tpu.vector_store %arg17[%c0_73, %c0_74], %162 {strides = array<i32>} : memref<2x256xf32, #tpu.memory_space<vmem>>, vector<2x256xf32>,
    return
  }
  func.func @transform_0(%arg0: i32) -> (i32, i32) {
    %c0_i32 = arith.constant 0 : i32
    %c0_i32_0 = arith.constant 0 : i32
    %c0_i32_1 = arith.constant 0 : i32
    return %c0_i32, %c0_i32_0 : i32, i32
  }
  func.func @transform_1(%arg0: i32) -> (i32, i32) {
    %c0_i32 = arith.constant 0 : i32
    %c0_i32_0 = arith.constant 0 : i32
    %c0_i32_1 = arith.constant 0 : i32
    return %c0_i32, %c0_i32_0 : i32, i32
  }
  func.func @transform_2(%arg0: i32) -> (i32, i32) {
    %c0_i32 = arith.constant 0 : i32
    %c0_i32_0 = arith.constant 0 : i32
    %c0_i32_1 = arith.constant 0 : i32
    return %c0_i32, %c0_i32_0 : i32, i32
  }
  func.func @transform_3(%arg0: i32) -> (i32, i32) {
    %c0_i32 = arith.constant 0 : i32
    %c0_i32_0 = arith.constant 0 : i32
    %c0_i32_1 = arith.constant 0 : i32
    return %c0_i32, %c0_i32_0 : i32, i32
  }
  func.func @transform_4(%arg0: i32) -> (i32, i32) {
    %c0_i32 = arith.constant 0 : i32
    %c0_i32_0 = arith.constant 0 : i32
    %c0_i32_1 = arith.constant 0 : i32
    return %c0_i32, %c0_i32_0 : i32, i32
  }
  func.func @transform_5(%arg0: i32) -> (i32, i32) {
    %c0_i32 = arith.constant 0 : i32
    %c0_i32_0 = arith.constant 0 : i32
    %c0_i32_1 = arith.constant 0 : i32
    return %c0_i32, %c0_i32_0 : i32, i32
  }
  func.func @transform_6(%arg0: i32) -> (i32, i32) {
    %c0_i32 = arith.constant 0 : i32
    %c0_i32_0 = arith.constant 0 : i32
    %c0_i32_1 = arith.constant 0 : i32
    return %c0_i32, %c0_i32_0 : i32, i32
  }
  func.func @transform_7(%arg0: i32) -> (i32, i32) {
    %c0_i32 = arith.constant 0 : i32
    %c0_i32_0 = arith.constant 0 : i32
    %c0_i32_1 = arith.constant 0 : i32
    return %c0_i32, %c0_i32_0 : i32, i32
  }
  func.func @transform_8(%arg0: i32) -> (i32, i32) {
    %c0_i32 = arith.constant 0 : i32
    %c0_i32_0 = arith.constant 0 : i32
    %c0_i32_1 = arith.constant 0 : i32
    return %c0_i32, %c0_i32_0 : i32, i32
  }
  func.func @transform_9(%arg0: i32) -> (i32, i32) {
    %c0_i32 = arith.constant 0 : i32
    %c0_i32_0 = arith.constant 0 : i32
    %c0_i32_1 = arith.constant 0 : i32
    return %c0_i32, %c0_i32_0 : i32, i32
  }
  func.func @transform_10(%arg0: i32) -> (i32, i32) {
    %c0_i32 = arith.constant 0 : i32
    %c0_i32_0 = arith.constant 0 : i32
    %c0_i32_1 = arith.constant 0 : i32
    return %c0_i32, %c0_i32_0 : i32, i32
  }
  func.func @transform_11(%arg0: i32) -> (i32, i32) {
    %c0_i32 = arith.constant 0 : i32
    %c0_i32_0 = arith.constant 0 : i32
    %c0_i32_1 = arith.constant 0 : i32
    return %c0_i32, %c0_i32_0 : i32, i32
  }
  func.func @transform_12(%arg0: i32) -> (i32, i32) {
    %c0_i32 = arith.constant 0 : i32
    %c0_i32_0 = arith.constant 0 : i32
    %c0_i32_1 = arith.constant 0 : i32
    return %c0_i32, %c0_i32_0 : i32, i32
  }
  func.func @transform_13(%arg0: i32) -> (i32, i32) {
    %c0_i32 = arith.constant 0 : i32
    %c0_i32_0 = arith.constant 0 : i32
    %c0_i32_1 = arith.constant 0 : i32
    return %c0_i32, %c0_i32_0 : i32, i32
  }
  func.func @transform_14(%arg0: i32) -> (i32, i32) {
    %c0_i32 = arith.constant 0 : i32
    %c0_i32_0 = arith.constant 0 : i32
    %c0_i32_1 = arith.constant 0 : i32
    return %c0_i32, %c0_i32_0 : i32, i32
  }
  func.func @transform_15(%arg0: i32) -> (i32, i32) {
    %c0_i32 = arith.constant 0 : i32
    %c0_i32_0 = arith.constant 0 : i32
    %c0_i32_1 = arith.constant 0 : i32
    return %c0_i32, %c0_i32_0 : i32, i32
  }
  func.func @transform_16(%arg0: i32) -> (i32, i32) {
    %c0_i32 = arith.constant 0 : i32
    %c0_i32_0 = arith.constant 0 : i32
    %c0_i32_1 = arith.constant 0 : i32
    return %c0_i32, %c0_i32_0 : i32, i32
  }
  func.func @transform_17(%arg0: i32) -> (i32, i32) {
    %c0_i32 = arith.constant 0 : i32
    %c0_i32_0 = arith.constant 0 : i32
    %c0_i32_1 = arith.constant 0 : i32
    return %c0_i32, %c0_i32_0 : i32, i32
  }
}

</mosaic_0001>

<bundles_post_ra>
// kernel: maxv1_forward.6
= control target key start
LH: loop header
LB: loop body
LE: loop exit
PB: predicated region body
PF: predicated region fallthrough
CT: control target
= control target key end

     0   :  { %21 = vsyncpa [#allocation3], 0  ;;  %s1864_s0 = inlined_call_operand.vmem [shape: f32[16,128], index: 0, kind: input, shape index: {}]   ;;  %s1865_s1 = inlined_call_operand.vmem [shape: bf16[128,256], index: 1, kind: input, shape index: {}]   ;;  %s1866_s2 = inlined_call_operand.vmem [shape: f32[1,256], index: 2, kind: input, shape index: {}]   ;;  %s1867_s3 = inlined_call_operand.vmem [shape: bf16[256,128], index: 3, kind: input, shape index: {}]   ;;  %s1868_s4 = inlined_call_operand.vmem [shape: f32[1,128], index: 4, kind: input, shape index: {}]   ;;  %s1869_s5 = inlined_call_operand.vmem [shape: bf16[128,256], index: 5, kind: input, shape index: {}]   ;;  %s1870_s6 = inlined_call_operand.vmem [shape: f32[1,256], index: 6, kind: input, shape index: {}]   ;;  %s1871_s7 = inlined_call_operand.vmem [shape: bf16[256,128], index: 7, kind: input, shape index: {}]   ;;  %s1872_s8 = inlined_call_operand.vmem [shape: f32[1,128], index: 8, kind: input, shape index: {}]   ;;  %s1873_s9 = inlined_call_operand.hbm [shape: bf16[128,128], index: 9, kind: input, shape index: {}]   ;;  %s1874_s10 = inlined_call_operand.hbm [shape: f32[1,128], index: 10, kind: input, shape index: {}]   ;;  %s1875_s11 = inlined_call_operand.hbm [shape: bf16[128,128], index: 11, kind: input, shape index: {}]   ;;  %s1876_s12 = inlined_call_operand.hbm [shape: f32[1,128], index: 12, kind: input, shape index: {}]   ;;  %s1877_s13 = inlined_call_operand.vmem [shape: f32[2,128], index: 13, kind: output, shape index: {0}]   ;;  %s1878_s14 = inlined_call_operand.vmem [shape: f32[2,128], index: 14, kind: output, shape index: {1}]   ;;  %s1879_s15 = inlined_call_operand.vmem [shape: f32[2,128], index: 15, kind: output, shape index: {2}]  }
   0x1   :  { %22 = vsyncpa [#allocation5], 0 }
   0x2   :  { %23 = vsyncpa [#allocation8], 0  ;;  %s1469_s18 = smov [#allocation4]   ;;  %s1470_s20 = smov [#allocation2]  }
   0x3   :  { %s60_s19 = sshll.u32 %s1469_s18, 4  ;;  %s47_s21 = sshll.u32 %s1470_s20, 4  ;;  %s61_s19 = int_to_ptr.vmem [resolvable:$true] %s60_s19  ;;  %s1558_s21 = int_to_ptr.vmem [resolvable:$true] %s47_s21 }
   0x4   :  { %s1375_s24 = scalar_lea.hbm %s1874_s10, 16 }
   0x5   :  { %p1376_p0 = scmp.ne.s32.totalorder %s1874_s10, %s1375_s24  ;;  %p1379_p1 = scmp.lt.u32.totalorder %s1375_s24, %s1874_s10 }
   0x7   :  { %p1381_p2 = pnand %p1379_p1, %p1376_p0 }
   0x9   :  { %1384 = shalt.err (!%p1381_p2)
}
   0xa   :  { %s1385_s29 = scalar_lea.vmem %s61_s19, 16  ;;  %s1389_s30 = scalar_lea.vmem %s61_s19, 32 }
   0xb   :  { %p1386_p3 = scmp.ne.s32.totalorder %s61_s19, %s1385_s29  ;;  %p1390_p4 = scmp.lt.s32.totalorder %s61_s19, %s61_s19 }
   0xc   :  { %p1391_p5 = scmp.lt.s32.totalorder %s1389_s30, %s1385_s29 }
   0xe   :  { %p1392_p6 = por %p1391_p5, %p1390_p4 }
  0x10   :  { %p1393_p7 = pnand %p1392_p6, %p1386_p3 }
  0x12   :  { %1396 = shalt.err (!%p1393_p7)
}
  0x13   :  { %63 = dma.hbm_to_vmem [thread:$0]  %s1874_s10, 16, %s61_s19, [#allocation5]  }
  0x14   :  { %s1397_s22 = scalar_lea.hbm %s1873_s9, 1024 }
  0x15   :  { %p1398_p8 = scmp.ne.s32.totalorder %s1873_s9, %s1397_s22  ;;  %p1401_p9 = scmp.lt.u32.totalorder %s1397_s22, %s1873_s9 }
  0x17   :  { %p1403_p10 = pnand %p1401_p9, %p1398_p8 }
  0x19   :  { %1406 = shalt.err (!%p1403_p10)
}
  0x1a   :  { %s1407_s27 = scalar_lea.vmem %s1558_s21, 1024  ;;  %p1412_p12 = scmp.lt.s32.totalorder %s1558_s21, %s1558_s21 }
  0x1b   :  { %p1408_p11 = scmp.ne.s32.totalorder %s1558_s21, %s1407_s27  ;;  %p1413_p13 = scmp.lt.s32.totalorder %s1407_s27, %s1407_s27 }
  0x1d   :  { %p1414_p0 = por %p1413_p13, %p1412_p12 }
  0x1f   :  { %p1415_p1 = pnand %p1414_p0, %p1408_p11 }
  0x21   :  { %1418 = shalt.err (!%p1415_p1)
}
  0x22   :  { %s1471_s10 = smov 64   ;;  %s1472_s19 = smov 4  }
  0x23   :  { %53 = dma.hbm_to_vmem [thread:$0]  %s1873_s9, 1024, %s1558_s21, [#allocation3], %s1471_s10, %s1471_s10, %s1472_s19  }
  0x24   :  { %s1473_s30 = smov [#allocation6]   ;;  %s1474_s17 = smov [#allocation7]  }
  0x25   :  { %s69_s16 = sshll.u32 %s1473_s30, 4  ;;  %s82_s18 = sshll.u32 %s1474_s17, 4  ;;  %s70_s16 = int_to_ptr.vmem [resolvable:$true] %s69_s16  ;;  %s83_s18 = int_to_ptr.vmem [resolvable:$true] %s82_s18 }
  0x26   :  { %s1419_s23 = scalar_lea.hbm %s1875_s11, 1024 }
  0x27   :  { %p1420_p2 = scmp.ne.s32.totalorder %s1875_s11, %s1419_s23  ;;  %p1423_p3 = scmp.lt.u32.totalorder %s1419_s23, %s1875_s11 }
  0x29   :  { %p1425_p4 = pnand %p1423_p3, %p1420_p2 }
  0x2b   :  { %1428 = shalt.err (!%p1425_p4)
}
  0x2c   :  { %s1429_s9 = scalar_lea.vmem %s70_s16, 1024  ;;  %p1434_p6 = scmp.lt.s32.totalorder %s70_s16, %s70_s16 }
  0x2d   :  { %p1430_p5 = scmp.ne.s32.totalorder %s70_s16, %s1429_s9  ;;  %p1435_p7 = scmp.lt.s32.totalorder %s1429_s9, %s1429_s9 }
  0x2f   :  { %p1436_p8 = por %p1435_p7, %p1434_p6 }
  0x31   :  { %p1437_p9 = pnand %p1436_p8, %p1430_p5 }
  0x33   :  { %1440 = shalt.err (!%p1437_p9)
}
  0x34   :  { %75 = dma.hbm_to_vmem [thread:$0]  %s1875_s11, 1024, %s70_s16, [#allocation5], %s1471_s10, %s1471_s10, %s1472_s19  }
  0x35   :  { %s1441_s17 = scalar_lea.hbm %s1876_s12, 16 }
  0x36   :  { %p1442_p10 = scmp.ne.s32.totalorder %s1876_s12, %s1441_s17  ;;  %p1445_p11 = scmp.lt.u32.totalorder %s1441_s17, %s1876_s12 }
  0x38   :  { %p1447_p12 = pnand %p1445_p11, %p1442_p10 }
  0x3a   :  { %1450 = shalt.err (!%p1447_p12)
}
  0x3b   :  { %s1451_s25 = scalar_lea.vmem %s83_s18, 16  ;;  %s1455_s26 = scalar_lea.vmem %s83_s18, 32 }
  0x3c   :  { %p1452_p13 = scmp.ne.s32.totalorder %s83_s18, %s1451_s25  ;;  %p1456_p0 = scmp.lt.s32.totalorder %s83_s18, %s83_s18 }
  0x3d   :  { %p1457_p1 = scmp.lt.s32.totalorder %s1455_s26, %s1451_s25 }
  0x3f   :  { %p1458_p2 = por %p1457_p1, %p1456_p0 }
  0x41   :  { %p1459_p3 = pnand %p1458_p2, %p1452_p13 }
  0x43   :  { %1462 = shalt.err (!%p1459_p3)
}
  0x44   :  { %85 = dma.hbm_to_vmem [thread:$0]  %s1876_s12, 16, %s83_s18, [#allocation8]  }
  0x45   :  { %1463 = dma.done.wait [#allocation3], 1024  }
  0x46   :  { %1464 = vsyncadd [#allocation3], 4294966272 }
  0x47   :  { %1465 = dma.done.wait [#allocation5], 1040  }
  0x48   :  { %1466 = vsyncadd [#allocation5], 4294966256 }
  0x49   :  { %1467 = dma.done.wait [#allocation8], 16  }
  0x4a   :  { %1468 = vsyncadd [#allocation8], 4294967280  ;;  %v1475_v0 = vmov 0   ;;  %v1265_v1 = vld [vmem:[%s1865_s1 + $0x4] ss:$8 sps:$4 sm:$0xff]   ;;  %vm116_vm0 = vcmask 1040384  }
  0x4b   :  { %259 = vmatprep.mubr.bf16.mxu0 %v1475_v0  ;;  %v1267_v2 = vld [vmem:[%s1865_s1] ss:$8 sps:$4 sm:$0xff]   ;;  %227 = vmatprep.subr.bf16.mxu0 %v1265_v1  ;;  %v1268_v3 = vld [vmem:[%s1865_s1 + $0x14] ss:$8 sps:$4 sm:$0xff]   ;;  %v1270_v4 = vld [vmem:[%s1865_s1 + $0x10] ss:$8 sps:$4 sm:$0xff]   ;;  %v137_v1 = vlaneseq }
  0x4c   :  { %228 = vmatpush1.bf16.msra.mxu0 %v1267_v2  ;;  %v1271_v5 = vld [vmem:[%s1865_s1 + $0x24] ss:$8 sps:$4 sm:$0xff]   ;;  %v1273_v6 = vld [vmem:[%s1865_s1 + $0x20] ss:$8 sps:$4 sm:$0xff]   ;;  %v1274_v7 = vld [vmem:[%s1865_s1 + $0x34] ss:$8 sps:$4 sm:$0xff]  }
  0x4d   :  { %229 = vmatprep.subr.bf16.mxu0 %v1268_v3  ;;  %v1276_v8 = vld [vmem:[%s1865_s1 + $0x30] ss:$8 sps:$4 sm:$0xff]   ;;  %v99_v9 = vld [vmem:[%s1864_s0] sm:$0xff]  ;;  %v100_v11 = vld [vmem:[%s1864_s0 + $0x8] sm:$0xff]  ;;  %v1757_v2 = vshrl.u32 %v137_v1, 7  ;;  %vm1477_vm1 = vmmov 0  }
  0x4e   :  { %v1277_v10 = vld [vmem:[%s1865_s1 + $0x44] ss:$8 sps:$4 sm:$0xff]   ;;  %v101_v12 = vrot.slane %v99_v9, 4  ;;  %v109_v13 = vrot.slane %v100_v11, 4  ;;  %v1279_v14 = vld [vmem:[%s1865_s1 + $0x40] ss:$8 sps:$4 sm:$0xff]  }
  0x4f   :  { %v1280_v16 = vld [vmem:[%s1865_s1 + $0x54] ss:$8 sps:$4 sm:$0xff]   ;;  %v1282_v20 = vld [vmem:[%s1865_s1 + $0x50] ss:$8 sps:$4 sm:$0xff]   ;;  %v1283_v22 = vld [vmem:[%s1865_s1 + $0x64] ss:$8 sps:$4 sm:$0xff]  }
  0x50   :  { %230 = vmatpush1.bf16.msra.mxu0 %v1270_v4  ;;  %v102_v15 = vadd.f32 %v101_v12, %v99_v9  ;;  %v110_v17 = vadd.f32 %v109_v13, %v100_v11  ;;  %v1285_v26 = vld [vmem:[%s1865_s1 + $0x60] ss:$8 sps:$4 sm:$0xff]   ;;  %v1286_v28 = vld [vmem:[%s1865_s1 + $0x74] ss:$8 sps:$4 sm:$0xff]   ;;  %v1288_v32 = vld [vmem:[%s1865_s1 + $0x70] ss:$8 sps:$4 sm:$0xff]  }
  0x51   :  { %231 = vmatprep.subr.bf16.mxu0 %v1271_v5  ;;  %v1289_v35 = vld [vmem:[%s1867_s3 + $0x40] sm:$0xff]   ;;  %v1291_v37 = vld [vmem:[%s1867_s3 + $0x48] sm:$0xff]   ;;  %v1293_v39 = vld [vmem:[%s1867_s3 + $0x50] sm:$0xff]   ;;  %v139_v3 = vsub.s32 0, %v1757_v2  ;;  %v143_v5 = vsub.s32 1, %v1757_v2  ;;  %vm1042_vm2 = vcmask 1041408  }
  0x52   :  { %v103_v18 = vrot.slane %v102_v15, 2  ;;  %v111_v19 = vrot.slane %v110_v17, 2  ;;  %v1290_v36 = vld [vmem:[%s1867_s3] sm:$0xff]   ;;  %1154 = vmatprep.subr.bf16.mxu1 %v1289_v35  ;;  %v1292_v38 = vld [vmem:[%s1867_s3 + $0x8] sm:$0xff]   ;;  %v1294_v40 = vld [vmem:[%s1867_s3 + $0x10] sm:$0xff]  }
  0x53   :  { %1155 = vmatpush3.bf16.msra.mxu1 %v1290_v36  ;;  %v1295_v41 = vld [vmem:[%s1867_s3 + $0x58] sm:$0xff]   ;;  %v1297_v43 = vld [vmem:[%s1867_s3 + $0x60] sm:$0xff]   ;;  %v1299_v45 = vld [vmem:[%s1867_s3 + $0x68] sm:$0xff]   ;;  %v1476_v36 = vmov 0.0  }
  0x54   :  { %232 = vmatpush1.bf16.msra.mxu0 %v1273_v6  ;;  %v104_v21 = vadd.f32 %v103_v18, %v102_v15  ;;  %v112_v23 = vadd.f32 %v111_v19, %v110_v17  ;;  %1156 = vmatprep.subr.bf16.mxu1 %v1291_v37  ;;  %v1296_v42 = vld [vmem:[%s1867_s3 + $0x18] sm:$0xff]   ;;  %v1298_v44 = vld [vmem:[%s1867_s3 + $0x20] sm:$0xff]   ;;  %v1300_v46 = vld [vmem:[%s1867_s3 + $0x28] sm:$0xff]  }
  0x55   :  { %233 = vmatprep.subr.bf16.mxu0 %v1274_v7  ;;  %v1301_v47 = vld [vmem:[%s1867_s3 + $0x70] sm:$0xff]   ;;  %v1303_v49 = vld [vmem:[%s1867_s3 + $0x78] sm:$0xff]   ;;  %v1305_v51 = vld [vmem:[%s1869_s5] ss:$8 sps:$4 sm:$0xff]  }
  0x56   :  { %v105_v24 = vrot.slane %v104_v21, 1  ;;  %v113_v25 = vrot.slane %v112_v23, 1  ;;  %v1302_v48 = vld [vmem:[%s1867_s3 + $0x30] sm:$0xff]   ;;  %v1304_v50 = vld [vmem:[%s1867_s3 + $0x38] sm:$0xff]   ;;  %v1307_v52 = vld [vmem:[%s1869_s5 + $0x4] ss:$8 sps:$4 sm:$0xff]  }
  0x57   :  { %1157 = vmatpush3.bf16.msra.mxu1 %v1292_v38  ;;  %v1310_v53 = vld [vmem:[%s1869_s5 + $0x14] ss:$8 sps:$4 sm:$0xff]   ;;  %v1308_v54 = vld [vmem:[%s1869_s5 + $0x10] ss:$8 sps:$4 sm:$0xff]   ;;  %v1313_v55 = vld [vmem:[%s1869_s5 + $0x24] ss:$8 sps:$4 sm:$0xff]  }
  0x58   :  { %234 = vmatpush1.bf16.msra.mxu0 %v1276_v8  ;;  %v106_v27 = vadd.f32 %v105_v24, %v104_v21  ;;  %v114_v29 = vadd.f32 %v113_v25, %v112_v23  ;;  %1158 = vmatprep.subr.bf16.mxu1 %v1293_v39  ;;  %v1311_v56 = vld [vmem:[%s1869_s5 + $0x20] ss:$8 sps:$4 sm:$0xff]   ;;  %v1316_v57 = vld [vmem:[%s1869_s5 + $0x34] ss:$8 sps:$4 sm:$0xff]   ;;  %v1314_v58 = vld [vmem:[%s1869_s5 + $0x30] ss:$8 sps:$4 sm:$0xff]  }
  0x59   :  { %235 = vmatprep.subr.bf16.mxu0 %v1277_v10  ;;  %v1319_v59 = vld [vmem:[%s1869_s5 + $0x44] ss:$8 sps:$4 sm:$0xff]   ;;  %v1317_v60 = vld [vmem:[%s1869_s5 + $0x40] ss:$8 sps:$4 sm:$0xff]   ;;  %v1322_v61 = vld [vmem:[%s1869_s5 + $0x54] ss:$8 sps:$4 sm:$0xff]  }
  0x5a   :  { %v108_v30 = vmul.f32 0.125, %v106_v27  ;;  %v115_v31 = vmul.f32 0.125, %v114_v29  ;;  %v1320_v62 = vld [vmem:[%s1869_s5 + $0x50] ss:$8 sps:$4 sm:$0xff]   ;;  %v1325_v63 = vld [vmem:[%s1869_s5 + $0x64] ss:$8 sps:$4 sm:$0xff]  }
  0x5b   :  { %1159 = vmatpush3.bf16.msra.mxu1 %v1294_v40  ;;  %v135_v4 = vld [vmem:[%s1866_s2] sm:$0x3]  ;;  %v1326_v35 = vld [vmem:[%s1869_s5 + $0x70] ss:$8 sps:$4 sm:$0xff]  }
  0x5c   :  { %236 = vmatpush1.bf16.msra.mxu0 %v1279_v14  ;;  %v117_v33 = vsel %vm116_vm0, %v108_v30, %v115_v31  ;;  %1160 = vmatprep.subr.bf16.mxu1 %v1295_v41  ;;  %v140_v6 = vrot.slane %v135_v4, %v139_v3  ;;  %v144_v7 = vrot.slane %v135_v4, %v143_v5  ;;  %v1337_v37 = vld [vmem:[%s1871_s7 + $0x40] sm:$0xff]   ;;  %v1349_v1 = vld [vmem:[%s1871_s7 + $0x70] sm:$0xff]  }
  0x5d   :  { %237 = vmatprep.subr.bf16.mxu0 %v1280_v16  ;;  %v134_v34 = vpack.c.bf16 %v117_v33, %v117_v33  ;;  %v1086_v39 = vld [vmem:[%s1868_s4] ss:$0 sm:$0xff]  ;;  %v1350_v4 = vld [vmem:[%s1871_s7 + $0x30] sm:$0xff]  }
  0x5f   :  { %1161 = vmatpush3.bf16.msra.mxu1 %v1296_v42 }
  0x60   :  { %238 = vmatpush1.bf16.msra.mxu0 %v1282_v20  ;;  %1162 = vmatprep.subr.bf16.mxu1 %v1297_v43 }
  0x61   :  { %239 = vmatprep.subr.bf16.mxu0 %v1283_v22 }
  0x63   :  { %1163 = vmatpush3.bf16.msra.mxu1 %v1298_v44 }
  0x64   :  { %240 = vmatpush1.bf16.msra.mxu0 %v1285_v26  ;;  %1164 = vmatprep.subr.bf16.mxu1 %v1299_v45  ;;  %v1329_v45 = vld [vmem:[#allocation2] sm:$0xff]  }
  0x65   :  { %241 = vmatprep.subr.bf16.mxu0 %v1286_v28 }
  0x67   :  { %1165 = vmatpush3.bf16.msra.mxu1 %v1300_v46 }
  0x68   :  { %242 = vmatpush1.bf16.msra.mxu0 %v1288_v32  ;;  %1166 = vmatprep.subr.bf16.mxu1 %v1301_v47  ;;  %v1330_v47 = vld [vmem:[#allocation2 + $0x8] sm:$0xff]  }
  0x69   :  { %573 = vmatprep.subr.bf16.mxu0 %v1307_v52  ;;  %v1335_v52 = vld [vmem:[#allocation2 + $0x30] sm:$0xff]  }
  0x6b   :  { %260 = vmatmul.mubr.bf16.vlgmr.msra.gmra.mrb[0].mxu0 %v134_v34  ;;  %1167 = vmatpush3.bf16.msra.mxu1 %v1302_v48  ;;  %v1328_v34 = vld [vmem:[%s1869_s5 + $0x74] ss:$8 sps:$4 sm:$0xff]  }
  0x6c   :  { %605 = vmatprep.mubr.bf16.mxu0 %v1475_v0  ;;  %1168 = vmatprep.subr.bf16.mxu1 %v1303_v49  ;;  %v1323_v0 = vld [vmem:[%s1869_s5 + $0x60] ss:$8 sps:$4 sm:$0xff]   ;;  %v1331_v48 = vld [vmem:[#allocation2 + $0x10] sm:$0xff]   ;;  %v1332_v49 = vld [vmem:[#allocation2 + $0x18] sm:$0xff]  }
  0x6d   :  { %574 = vmatpush1.bf16.msra.mxu0 %v1305_v51  ;;  %v1334_v51 = vld [vmem:[#allocation2 + $0x28] sm:$0xff]  }
  0x6e   :  { %575 = vmatprep.subr.bf16.mxu0 %v1310_v53  ;;  %v1336_v53 = vld [vmem:[#allocation2 + $0x38] sm:$0xff]  }
  0x6f   :  { %1169 = vmatpush3.bf16.msra.mxu1 %v1304_v50  ;;  %v1333_v50 = vld [vmem:[#allocation2 + $0x20] sm:$0xff]  }
  0x70   :  { %1176 = vmatprep.subr.bf16.mxu1 %v1337_v37 }
  0x71   :  { %576 = vmatpush1.bf16.msra.mxu0 %v1308_v54  ;;  %v1338_v54 = vld [vmem:[%s1871_s7] sm:$0xff]  }
  0x72   :  { %577 = vmatprep.subr.bf16.mxu0 %v1313_v55  ;;  %v1339_v55 = vld [vmem:[%s1871_s7 + $0x48] sm:$0xff]  }
  0x75   :  { %578 = vmatpush1.bf16.msra.mxu0 %v1311_v56  ;;  %v1340_v56 = vld [vmem:[%s1871_s7 + $0x8] sm:$0xff]  }
  0x76   :  { %579 = vmatprep.subr.bf16.mxu0 %v1316_v57  ;;  %v1341_v57 = vld [vmem:[%s1871_s7 + $0x50] sm:$0xff]  }
  0x79   :  { %580 = vmatpush1.bf16.msra.mxu0 %v1314_v58  ;;  %v1342_v58 = vld [vmem:[%s1871_s7 + $0x10] sm:$0xff]  }
  0x7a   :  { %581 = vmatprep.subr.bf16.mxu0 %v1319_v59  ;;  %v1343_v59 = vld [vmem:[%s1871_s7 + $0x58] sm:$0xff]  }
  0x7d   :  { %582 = vmatpush1.bf16.msra.mxu0 %v1317_v60  ;;  %v1344_v60 = vld [vmem:[%s1871_s7 + $0x18] sm:$0xff]  }
  0x7e   :  { %583 = vmatprep.subr.bf16.mxu0 %v1322_v61  ;;  %v1345_v61 = vld [vmem:[%s1871_s7 + $0x60] sm:$0xff]  }
  0x81   :  { %584 = vmatpush1.bf16.msra.mxu0 %v1320_v62  ;;  %v1346_v62 = vld [vmem:[%s1871_s7 + $0x20] sm:$0xff]  }
  0x82   :  { %585 = vmatprep.subr.bf16.mxu0 %v1325_v63  ;;  %v1347_v63 = vld [vmem:[%s1871_s7 + $0x68] sm:$0xff]  }
  0x85   :  { %586 = vmatpush1.bf16.msra.mxu0 %v1323_v0  ;;  %v1348_v0 = vld [vmem:[%s1871_s7 + $0x28] sm:$0xff]  }
  0x86   :  { %587 = vmatprep.subr.bf16.mxu0 %v1328_v34  ;;  %v1136_v34 = vld [vmem:[#allocation4] ss:$0 sm:$0xff] }
  0x89   :  { %588 = vmatpush1.bf16.msra.mxu0 %v1326_v35 }
  0x8a   :  { %1216 = vmatprep.subr.bf16.mxu0 %v1476_v36 }
 0x13e   :  { %v261_v8 = vpop.f32.mrb[0].mxu0 }
 0x13f   :  { %v262_v9 = vadd.f32 %v261_v8, %v140_v6  ;;  %v263_v10 = vpop.f32.mrb[1].mxu0  ;;  %v1351_v6 = vld [vmem:[%s1871_s7 + $0x78] sm:$0xff]   ;;  %v481_v8 = vld [vmem:[%s1870_s6] sm:$0x3] }
 0x140   :  { %v264_v11 = vadd.f32 %v263_v10, %v144_v7  ;;  %v265_v12 = vpop.f32.mrb[2].mxu0  ;;  %v1352_v7 = vld [vmem:[%s1871_s7 + $0x38] sm:$0xff]   ;;  %v490_v10 = vrot.slane %v481_v8, %v143_v5 }
 0x141   :  { %v270_v13 = vmul.f32 0.044715, %v262_v9  ;;  %v266_v14 = vpop.f32.mrb[3].mxu0  ;;  %v268_v26 = vmul.f32 0.5, %v262_v9 }
 0x142   :  { %v271_v15 = vmul.f32 0.044715, %v264_v11  ;;  %v269_v28 = vmul.f32 0.5, %v264_v11 }
 0x143   :  { %v272_v16 = vmul.f32 %v270_v13, %v262_v9 }
 0x144   :  { %v273_v17 = vmul.f32 %v271_v15, %v264_v11 }
 0x145   :  { %v274_v18 = vmul.f32 %v272_v16, %v262_v9 }
 0x146   :  { %v275_v19 = vmul.f32 %v273_v17, %v264_v11 }
 0x147   :  { %v276_v20 = vadd.f32 %v274_v18, %v262_v9  ;;  %v486_v9 = vrot.slane %v481_v8, %v139_v3 }
 0x148   :  { %v277_v21 = vadd.f32 %v275_v19, %v264_v11 }
 0x149   :  { %v278_v22 = vmul.f32 0.7978846, %v276_v20 }
 0x14a   :  { %v279_v23 = vmul.f32 0.7978846, %v277_v21 }
 0x14b   :  { %1361 = vtanh.f32 %v278_v22 }
 0x14c   :  { %1363 = vtanh.f32 %v279_v23 }
 0x155   :  { %v1362_v24 = vpop.eup %1361 }
 0x156   :  { %v1364_v25 = vpop.eup %1363  ;;  %v282_v27 = vadd.f32 1.0, %v1362_v24 }
 0x157   :  { %v283_v29 = vadd.f32 1.0, %v1364_v25 }
 0x158   :  { %v284_v30 = vmul.f32 %v282_v27, %v268_v26 }
 0x159   :  { %v285_v31 = vmul.f32 %v283_v29, %v269_v28 }
 0x15a   :  { %v318_v33 = vpack.c.bf16 %v284_v30, %v284_v30 }
 0x15b   :  { %v319_v32 = vpack.c.bf16 %v285_v31, %v285_v31 }
 0x15d   :  { %455 = vmatprep.mubr.bf16.mxu1 %v319_v32 }
 0x15e   :  { %456 = vmatmul.mubr.bf16.vlgmr.msra.gmra.mrb[0].mxu1 %v318_v33  ;;  %v1353_v33 = vld [vmem:[#allocation6] sm:$0xff]  }
 0x15f   :  { %1177 = vmatpush3.bf16.msra.mxu1 %v1338_v54 }
 0x160   :  { %1178 = vmatprep.subr.bf16.mxu1 %v1339_v55 }
 0x163   :  { %1179 = vmatpush3.bf16.msra.mxu1 %v1340_v56  ;;  %v1360_v56 = vld [vmem:[#allocation6 + $0x38] sm:$0xff]  }
 0x164   :  { %1180 = vmatprep.subr.bf16.mxu1 %v1341_v57 }
 0x167   :  { %1181 = vmatpush3.bf16.msra.mxu1 %v1342_v58 }
 0x168   :  { %1182 = vmatprep.subr.bf16.mxu1 %v1343_v59 }
 0x16b   :  { %1183 = vmatpush3.bf16.msra.mxu1 %v1344_v60  ;;  %v1119_v60 = vld [vmem:[%s1872_s8] ss:$0 sm:$0xff] }
 0x16c   :  { %1184 = vmatprep.subr.bf16.mxu1 %v1345_v61 }
 0x16f   :  { %1185 = vmatpush3.bf16.msra.mxu1 %v1346_v62 }
 0x170   :  { %1186 = vmatprep.subr.bf16.mxu1 %v1347_v63 }
 0x173   :  { %1187 = vmatpush3.bf16.msra.mxu1 %v1348_v0 }
 0x174   :  { %1188 = vmatprep.subr.bf16.mxu1 %v1349_v1 }
 0x177   :  { %1189 = vmatpush3.bf16.msra.mxu1 %v1350_v4  ;;  %v1145_v4 = vld [vmem:[#allocation7] ss:$0 sm:$0xff] }
 0x178   :  { %1190 = vmatprep.subr.bf16.mxu1 %v1351_v6 }
 0x17b   :  { %1191 = vmatpush3.bf16.msra.mxu1 %v1352_v7 }
 0x17c   :  { %1236 = vmatprep.subr.bf16.mxu1 %v1476_v36 }
 0x231   :  { %v1170_v38 = vpop.f32.mrb[0].mxu1 }
 0x232   :  { %v1171_v40 = vpop.f32.mrb[1].mxu1 }
 0x233   :  { %v1172_v41 = vadd.f32 %v1171_v40, %v1170_v38  ;;  %v1173_v42 = vpop.f32.mrb[2].mxu1  ;;  %v1354_v40 = vld [vmem:[#allocation6 + $0x8] sm:$0xff]  }
 0x234   :  { %v1174_v43 = vpop.f32.mrb[3].mxu1 }
 0x235   :  { %v458_v44 = vadd.f32 %v1172_v41, %v1086_v39 }
 0x237   :  { %463 = vst [vmem:[%s1877_s13] sm:$0x3] %v458_v44  ;;  %v480_v46 = vpack.c.bf16 %v458_v44, %v458_v44 }
 0x239   :  { %606 = vmatmul.mubr.bf16.vlgmr.msra.gmra.mrb[4].mxu0 %v480_v46 }
 0x23a   :  { %1217 = vmatpush3.bf16.msra.mxu0 %v1329_v45  ;;  %1232 = vmatprep.mubr.msk.bf16.mxu0 %vm1477_vm1, %v1476_v36  ;;  %v1355_v45 = vld [vmem:[#allocation6 + $0x10] sm:$0xff]  }
 0x23b   :  { %1218 = vmatprep.subr.bf16.mxu0 %v1476_v36 }
 0x23e   :  { %1219 = vmatpush3.bf16.msra.mxu0 %v1330_v47 }
 0x23f   :  { %1220 = vmatprep.subr.bf16.mxu0 %v1476_v36 }
 0x242   :  { %1221 = vmatpush3.bf16.msra.mxu0 %v1331_v48  ;;  %v1356_v48 = vld [vmem:[#allocation6 + $0x18] sm:$0xff]  }
 0x243   :  { %1222 = vmatprep.subr.bf16.mxu0 %v1476_v36 }
 0x246   :  { %1223 = vmatpush3.bf16.msra.mxu0 %v1332_v49 }
 0x247   :  { %1224 = vmatprep.subr.bf16.mxu0 %v1476_v36 }
 0x24a   :  { %1225 = vmatpush3.bf16.msra.mxu0 %v1333_v50  ;;  %v1357_v50 = vld [vmem:[#allocation6 + $0x20] sm:$0xff]  }
 0x24b   :  { %1226 = vmatprep.subr.bf16.mxu0 %v1476_v36 }
 0x24e   :  { %1227 = vmatpush3.bf16.msra.mxu0 %v1334_v51  ;;  %v1358_v51 = vld [vmem:[#allocation6 + $0x28] sm:$0xff]  }
 0x24f   :  { %1228 = vmatprep.subr.bf16.mxu0 %v1476_v36 }
 0x252   :  { %1229 = vmatpush3.bf16.msra.mxu0 %v1335_v52  ;;  %v1359_v52 = vld [vmem:[#allocation6 + $0x30] sm:$0xff]  }
 0x253   :  { %1230 = vmatprep.subr.bf16.mxu0 %v1476_v36 }
 0x256   :  { %1231 = vmatpush3.bf16.msra.mxu0 %v1336_v53 }
 0x259   :  { %1233 = vmatmul.mubr.bf16.vlgmr.msra.gmra.mrb[8].mxu0 %v480_v46 }
 0x30c   :  { %v607_v11 = vpop.f32.mrb[4].mxu0 }
 0x30d   :  { %v608_v12 = vadd.f32 %v607_v11, %v486_v9  ;;  %v609_v13 = vpop.f32.mrb[5].mxu0 }
 0x30e   :  { %v610_v14 = vadd.f32 %v609_v13, %v490_v10  ;;  %v611_v15 = vpop.f32.mrb[6].mxu0 }
 0x30f   :  { %v616_v16 = vmul.f32 0.044715, %v608_v12  ;;  %v612_v17 = vpop.f32.mrb[7].mxu0  ;;  %v614_v5 = vmul.f32 0.5, %v608_v12 }
 0x310   :  { %v617_v18 = vmul.f32 0.044715, %v610_v14  ;;  %v615_v28 = vmul.f32 0.5, %v610_v14 }
 0x311   :  { %v618_v19 = vmul.f32 %v616_v16, %v608_v12 }
 0x312   :  { %v619_v20 = vmul.f32 %v617_v18, %v610_v14 }
 0x313   :  { %v620_v21 = vmul.f32 %v618_v19, %v608_v12 }
 0x314   :  { %v621_v22 = vmul.f32 %v619_v20, %v610_v14 }
 0x315   :  { %v622_v23 = vadd.f32 %v620_v21, %v608_v12 }
 0x316   :  { %v623_v24 = vadd.f32 %v621_v22, %v610_v14 }
 0x317   :  { %v624_v25 = vmul.f32 0.7978846, %v622_v23 }
 0x318   :  { %v625_v26 = vmul.f32 0.7978846, %v623_v24 }
 0x319   :  { %1365 = vtanh.f32 %v624_v25 }
 0x31a   :  { %1367 = vtanh.f32 %v625_v26 }
 0x323   :  { %v1366_v2 = vpop.eup %1365 }
 0x324   :  { %v1368_v3 = vpop.eup %1367  ;;  %v628_v27 = vadd.f32 1.0, %v1366_v2 }
 0x325   :  { %v629_v29 = vadd.f32 1.0, %v1368_v3 }
 0x326   :  { %v630_v30 = vmul.f32 %v628_v27, %v614_v5 }
 0x327   :  { %v631_v31 = vmul.f32 %v629_v29, %v615_v28 }
 0x328   :  { %v664_v35 = vpack.c.bf16 %v630_v30, %v630_v30 }
 0x329   :  { %v665_v32 = vpack.c.bf16 %v631_v31, %v631_v31 }
 0x32b   :  { %801 = vmatprep.mubr.bf16.mxu1 %v665_v32 }
 0x32c   :  { %v915_v37 = vpop.f32.mrb[8].mxu0  ;;  %802 = vmatmul.mubr.bf16.vlgmr.msra.gmra.mrb[4].mxu1 %v664_v35 }
 0x32d   :  { %v916_v38 = vadd.f32 %v1136_v34, %v915_v37  ;;  %v1234_v39 = vpop.f32.mrb[9].mxu0  ;;  %1237 = vmatpush3.bf16.msra.mxu1 %v1353_v33  ;;  %1252 = vmatprep.mubr.msk.bf16.mxu1 %vm1477_vm1, %v1476_v36 }
 0x32e   :  { %v918_v41 = vpop.f32.mrb[10].mxu0  ;;  %1238 = vmatprep.subr.bf16.mxu1 %v1476_v36 }
 0x32f   :  { %v922_v42 = vmul.f32 0.044715, %v916_v38  ;;  %v1235_v43 = vpop.f32.mrb[11].mxu0  ;;  %v921_v54 = vmul.f32 0.5, %v916_v38 }
 0x331   :  { %v923_v44 = vmul.f32 %v922_v42, %v916_v38  ;;  %1239 = vmatpush3.bf16.msra.mxu1 %v1354_v40 }
 0x332   :  { %1240 = vmatprep.subr.bf16.mxu1 %v1476_v36 }
 0x333   :  { %v924_v46 = vmul.f32 %v923_v44, %v916_v38 }
 0x335   :  { %v925_v47 = vadd.f32 %v924_v46, %v916_v38  ;;  %1241 = vmatpush3.bf16.msra.mxu1 %v1355_v45 }
 0x336   :  { %1242 = vmatprep.subr.bf16.mxu1 %v1476_v36 }
 0x337   :  { %v926_v49 = vmul.f32 0.7978846, %v925_v47 }
 0x339   :  { %1243 = vmatpush3.bf16.msra.mxu1 %v1356_v48  ;;  %1369 = vtanh.f32 %v926_v49 }
 0x33a   :  { %1244 = vmatprep.subr.bf16.mxu1 %v1476_v36 }
 0x33d   :  { %1245 = vmatpush3.bf16.msra.mxu1 %v1357_v50 }
 0x33e   :  { %1246 = vmatprep.subr.bf16.mxu1 %v1476_v36 }
 0x341   :  { %1247 = vmatpush3.bf16.msra.mxu1 %v1358_v51 }
 0x342   :  { %1248 = vmatprep.subr.bf16.mxu1 %v1476_v36 }
 0x343   :  { %v1370_v53 = vpop.eup %1369 }
 0x344   :  { %v928_v55 = vadd.f32 1.0, %v1370_v53 }
 0x345   :  { %1249 = vmatpush3.bf16.msra.mxu1 %v1359_v52 }
 0x346   :  { %1250 = vmatprep.subr.bf16.mxu1 %v1476_v36  ;;  %v929_v57 = vmul.f32 %v928_v55, %v921_v54 }
 0x348   :  { %v946_v58 = vpack.c.bf16 %v929_v57, %v929_v57 }
 0x349   :  { %1251 = vmatpush3.bf16.msra.mxu1 %v1360_v56 }
 0x34c   :  { %1253 = vmatmul.mubr.bf16.vlgmr.msra.gmra.mrb[8].mxu1 %v946_v58 }
 0x3ff   :  { %v1192_v59 = vpop.f32.mrb[4].mxu1 }
 0x400   :  { %v1193_v61 = vpop.f32.mrb[5].mxu1 }
 0x401   :  { %v1194_v62 = vadd.f32 %v1193_v61, %v1192_v59  ;;  %v1195_v63 = vpop.f32.mrb[6].mxu1 }
 0x402   :  { %v1196_v0 = vpop.f32.mrb[7].mxu1 }
 0x403   :  { %v804_v1 = vadd.f32 %v1194_v62, %v1119_v60 }
 0x405   :  { %809 = vst [vmem:[%s1878_s14] sm:$0x3] %v804_v1 }
 0x41f   :  { %v1036_v36 = vpop.f32.mrb[8].mxu1 }
 0x420   :  { %v1037_v6 = vadd.f32 %v1145_v4, %v1036_v36  ;;  %v1254_v7 = vpop.f32.mrb[9].mxu1 }
 0x421   :  { %v1039_v8 = vpop.f32.mrb[10].mxu1 }
 0x422   :  { %v1255_v9 = vpop.f32.mrb[11].mxu1  ;;  %v1043_v10 = vsel %vm1042_vm2, %v1037_v6, -inf }
 0x423   :  { %1044 = vmax.xlane.f32.xlu0 %v1043_v10 }
 0x4b0   :  { %v1045_v11 = vpop.xlane.xlu0 %1044 }
 0x4b1   :  { %v1046_v12 = vsub.f32 %v1037_v6, %v1045_v11 }
 0x4b3   :  { %v1047_v13 = vmul.f32 1.442695, %v1046_v12 }
 0x4b5   :  { %1371 = vpow2.f32 %v1047_v13 }
 0x4bf   :  { %v1372_v14 = vpop.eup %1371 }
 0x4c0   :  { %v1049_v15 = vsel %vm1042_vm2, %v1372_v14, 0.0 }
 0x4c1   :  { %1050 = vadd.xlane.f32.xlu0 %v1049_v15 }
 0x54e   :  { %v1051_v16 = vpop.xlane.xlu0 %1050 }
 0x54f   :  { %1373 = vrcp.f32 %v1051_v16 }
 0x559   :  { %v1374_v17 = vpop.eup %1373 }
 0x55a   :  { %v1053_v18 = vmul.f32 %v1374_v17, %v1372_v14 }
 0x55c   :  { %1054 = vst [vmem:[%s1879_s15] sm:$0x3] %v1053_v18 }
 0x55d   :  { %1067 = vsyncpa [#allocation3], 1 }
 0x55e   :  { %1068 = vsyncpa [#allocation5], 1 }
 0x55f   :  { %1069 = vsyncpa [#allocation8], 1 }

// kernel: maxv1_forward.5
= control target key start
LH: loop header
LB: loop body
LE: loop exit
PB: predicated region body
PF: predicated region fallthrough
CT: control target
= control target key end

     0   :  { %v1918_v1 = vmov 0   ;;  %v1919_v20 = vmov 0.0   ;;  %vm1920_vm0 = vmmov 0   ;;  %v82_v21 = vlaneseq  ;;  %s1922_s28 = smov 64   ;;  %s1923_s16 = smov 32   ;;  %s2405_s1 = inlined_call_operand.vmem [shape: bf16[128,384], index: 1, kind: input, shape index: {}]   ;;  %s2406_s0 = inlined_call_operand.vmem [shape: f32[16,128], index: 0, kind: input, shape index: {}]   ;;  %s2407_s2 = inlined_call_operand.vmem [shape: f32[1,384], index: 2, kind: input, shape index: {}]   ;;  %s2408_s3 = inlined_call_operand.vmem [shape: bf16[128,128], index: 3, kind: input, shape index: {}]   ;;  %s2409_s4 = inlined_call_operand.vmem [shape: f32[1,128], index: 4, kind: input, shape index: {}]   ;;  %s2410_s7 = inlined_call_operand.vmem [shape: bf16[128,256], index: 7, kind: input, shape index: {}]   ;;  %s2411_s5 = inlined_call_operand.vmem [shape: f32[1,128], index: 5, kind: input, shape index: {}]   ;;  %s2412_s6 = inlined_call_operand.vmem [shape: f32[1,128], index: 6, kind: input, shape index: {}]   ;;  %s2413_s9 = inlined_call_operand.vmem [shape: bf16[256,128], index: 9, kind: input, shape index: {}]   ;;  %s2414_s8 = inlined_call_operand.vmem [shape: f32[1,256], index: 8, kind: input, shape index: {}]   ;;  %s2415_s10 = inlined_call_operand.vmem [shape: f32[1,128], index: 10, kind: input, shape index: {}]   ;;  %s2416_s11 = inlined_call_operand.vmem [shape: f32[1,128], index: 11, kind: input, shape index: {}]   ;;  %s2417_s12 = inlined_call_operand.vmem [shape: f32[1,128], index: 12, kind: input, shape index: {}]   ;;  %s2418_s13 = inlined_call_operand.vmem [shape: f32[16,128], index: 13, kind: output, shape index: {}]  }
   0x1   :  { %v1790_v0 = vld [vmem:[%s2405_s1 + $0x4] ss:$12 sps:$4 sm:$0xff]   ;;  %257 = vmatprep.mubr.bf16.mxu0 %v1918_v1  ;;  %v1792_v2 = vld [vmem:[%s2405_s1] ss:$12 sps:$4 sm:$0xff]   ;;  %v1793_v3 = vld [vmem:[%s2405_s1 + $0x1c] ss:$12 sps:$4 sm:$0xff]   ;;  %1684 = vmatprep.subr.bf16.mxu1 %v1919_v20 }
   0x2   :  { %225 = vmatprep.subr.bf16.mxu0 %v1790_v0  ;;  %v1795_v4 = vld [vmem:[%s2405_s1 + $0x18] ss:$12 sps:$4 sm:$0xff]   ;;  %v1796_v5 = vld [vmem:[%s2405_s1 + $0x34] ss:$12 sps:$4 sm:$0xff]   ;;  %v1798_v6 = vld [vmem:[%s2405_s1 + $0x30] ss:$12 sps:$4 sm:$0xff]   ;;  %1700 = vmatprep.mubr.msk.bf16.mxu1 %vm1920_vm0, %v1919_v20 }
   0x3   :  { %226 = vmatpush1.bf16.msra.mxu0 %v1792_v2  ;;  %v1799_v7 = vld [vmem:[%s2405_s1 + $0x4c] ss:$12 sps:$4 sm:$0xff]   ;;  %v1801_v8 = vld [vmem:[%s2405_s1 + $0x48] ss:$12 sps:$4 sm:$0xff]   ;;  %v1802_v9 = vld [vmem:[%s2405_s1 + $0x64] ss:$12 sps:$4 sm:$0xff]  }
   0x4   :  { %227 = vmatprep.subr.bf16.mxu0 %v1793_v3  ;;  %v1804_v10 = vld [vmem:[%s2405_s1 + $0x60] ss:$12 sps:$4 sm:$0xff]   ;;  %v1805_v11 = vld [vmem:[%s2405_s1 + $0x7c] ss:$12 sps:$4 sm:$0xff]   ;;  %v1807_v12 = vld [vmem:[%s2405_s1 + $0x78] ss:$12 sps:$4 sm:$0xff]  }
   0x5   :  { %v1808_v13 = vld [vmem:[%s2405_s1 + $0x94] ss:$12 sps:$4 sm:$0xff]   ;;  %v1810_v14 = vld [vmem:[%s2405_s1 + $0x90] ss:$12 sps:$4 sm:$0xff]   ;;  %v1811_v15 = vld [vmem:[%s2405_s1 + $0xac] ss:$12 sps:$4 sm:$0xff]  }
   0x6   :  { %v1813_v16 = vld [vmem:[%s2405_s1 + $0xa8] ss:$12 sps:$4 sm:$0xff]   ;;  %v2046_v17 = vld [vmem:[%s2406_s0] sm:$0xff]  ;;  %v2061_v22 = vshrl.u32 %v82_v21, 7  ;;  %vm336_vm1 = vcmask 261120   ;;  %v313_v47 = vand.u32 127, %v82_v21 }
   0x7   :  { %228 = vmatpush1.bf16.msra.mxu0 %v1795_v4  ;;  %v2051_v18 = vld [vmem:[%s2406_s0 + $0x8] sm:$0xff]  ;;  %v2067_v24 = vld [vmem:[%s2407_s2] sm:$0x7]  ;;  %v1816_v41 = vld [vmem:[%s2405_s1 + $0x38] ss:$12 sps:$4 sm:$0xff]   ;;  %vm388_vm9 = vcmask 130048  }
   0x8   :  { %229 = vmatprep.subr.bf16.mxu0 %v1796_v5  ;;  %v79_v19 = vpack.c.bf16 %v2051_v18, %v2046_v17  ;;  %v84_v23 = vsub.s32 0, %v2061_v22  ;;  %v88_v25 = vsub.s32 1, %v2061_v22  ;;  %v1814_v39 = vld [vmem:[%s2405_s1 + $0x8] ss:$12 sps:$4 sm:$0xff]   ;;  %v1815_v40 = vld [vmem:[%s2405_s1 + $0x20] ss:$12 sps:$4 sm:$0xff]   ;;  %v314_v50 = vsub.s32 %v2061_v22, %v313_v47 }
   0x9   :  { %1685 = vmatpush3.bf16.msra.mxu1 %v1814_v39  ;;  %v1817_v42 = vld [vmem:[%s2405_s1 + $0x50] ss:$12 sps:$4 sm:$0xff]   ;;  %v1818_v43 = vld [vmem:[%s2405_s1 + $0x68] ss:$12 sps:$4 sm:$0xff]   ;;  %v1819_v44 = vld [vmem:[%s2405_s1 + $0x80] ss:$12 sps:$4 sm:$0xff]  }
   0xa   :  { %v85_v26 = vrot.slane %v2067_v24, %v84_v23  ;;  %v89_v28 = vrot.slane %v2067_v24, %v88_v25  ;;  %1686 = vmatprep.subr.bf16.mxu1 %v1919_v20  ;;  %v1820_v45 = vld [vmem:[%s2405_s1 + $0x98] ss:$12 sps:$4 sm:$0xff]   ;;  %v1821_v46 = vld [vmem:[%s2405_s1 + $0xb0] ss:$12 sps:$4 sm:$0xff]   ;;  %v311_v48 = vadd.s32 8, %v2061_v22  ;;  %vm316_vm4 = vcmp.eq.s32.totalorder %v314_v50, 0 }
   0xb   :  { %230 = vmatpush1.bf16.msra.mxu0 %v1798_v6  ;;  %vm322_vm5 = vcmp.eq.s32.totalorder %v314_v50, 4294967288  ;;  %s1921_s1 = smov 96   ;;  %v1828_v56 = vld [vmem:[%s2408_s3 + $0x30] sm:$0xff]  }
   0xc   :  { %231 = vmatprep.subr.bf16.mxu0 %v1799_v7  ;;  %v315_v49 = vsub.s32 %v311_v48, %v313_v47  ;;  %vm2123_vm8 = vmor %vm316_vm4, %vm322_vm5 }
   0xd   :  { %1687 = vmatpush3.bf16.msra.mxu1 %v1815_v40 }
   0xe   :  { %1688 = vmatprep.subr.bf16.mxu1 %v1919_v20  ;;  %vm317_vm2 = vcmp.eq.s32.totalorder %v315_v49, 0  ;;  %vm319_vm3 = vcmp.eq.s32.totalorder %v315_v49, 8  ;;  %vm323_vm7 = vcmp.eq.s32.totalorder %v315_v49, 4294967288 }
   0xf   :  { %232 = vmatpush1.bf16.msra.mxu0 %v1801_v8  ;;  %vm321_vm6 = vmor %vm317_vm2, %vm319_vm3 }
  0x10   :  { %233 = vmatprep.subr.bf16.mxu0 %v1802_v9  ;;  %vm2127_vm10 = vmor %vm321_vm6, %vm323_vm7 }
  0x11   :  { %1689 = vmatpush3.bf16.msra.mxu1 %v1816_v41 }
  0x12   :  { %1690 = vmatprep.subr.bf16.mxu1 %v1919_v20 }
  0x13   :  { %234 = vmatpush1.bf16.msra.mxu0 %v1804_v10  ;;  %v92_v10 = vsub.s32 2, %v2061_v22 }
  0x14   :  { %235 = vmatprep.subr.bf16.mxu0 %v1805_v11 }
  0x15   :  { %1691 = vmatpush3.bf16.msra.mxu1 %v1817_v42 }
  0x16   :  { %1692 = vmatprep.subr.bf16.mxu1 %v1919_v20 }
  0x17   :  { %236 = vmatpush1.bf16.msra.mxu0 %v1807_v12 }
  0x18   :  { %237 = vmatprep.subr.bf16.mxu0 %v1808_v13  ;;  %v93_v13 = vrot.slane %v2067_v24, %v92_v10 }
  0x19   :  { %1693 = vmatpush3.bf16.msra.mxu1 %v1818_v43 }
  0x1a   :  { %1694 = vmatprep.subr.bf16.mxu1 %v1919_v20 }
  0x1b   :  { %238 = vmatpush1.bf16.msra.mxu0 %v1810_v14 }
  0x1c   :  { %239 = vmatprep.subr.bf16.mxu0 %v1811_v15 }
  0x1d   :  { %1695 = vmatpush3.bf16.msra.mxu1 %v1819_v44 }
  0x1e   :  { %1696 = vmatprep.subr.bf16.mxu1 %v1919_v20 }
  0x1f   :  { %240 = vmatpush1.bf16.msra.mxu0 %v1813_v16 }
  0x20   :  { %1704 = vmatprep.subr.bf16.mxu0 %v1919_v20 }
  0x21   :  { %1697 = vmatpush3.bf16.msra.mxu1 %v1820_v45 }
  0x22   :  { %258 = vmatmul.mubr.bf16.vlgmr.msra.gmra.mrb[0].mxu0 %v79_v19  ;;  %1698 = vmatprep.subr.bf16.mxu1 %v1919_v20 }
  0x23   :  { %1706 = vmatprep.mubr.msk.bf16.mxu0 %vm1920_vm0, %v1919_v20 }
  0x25   :  { %1699 = vmatpush3.bf16.msra.mxu1 %v1821_v46 }
  0x26   :  { %1710 = vmatprep.subr.bf16.mxu1 %v1919_v20 }
  0x28   :  { %1701 = vmatmul.mubr.bf16.vlgmr.msra.gmra.mrb[0].mxu1 %v79_v19 }
  0x29   :  { %1712 = vmatprep.mubr.msk.bf16.mxu1 %vm1920_vm0, %v1919_v20 }
  0xf5   :  { %v259_v27 = vpop.f32.mrb[0].mxu0 }
  0xf6   :  { %v261_v29 = vpop.f32.mrb[1].mxu0  ;;  %v260_v31 = vadd.f32 %v259_v27, %v85_v26 }
  0xf7   :  { %v263_v30 = vpop.f32.mrb[2].mxu0  ;;  %v262_v34 = vadd.f32 %v261_v29, %v89_v28 }
  0xf8   :  { %v264_v32 = vadd.f32 %v263_v30, %v85_v26  ;;  %v265_v33 = vpop.f32.mrb[3].mxu0  ;;  %v1822_v26 = vld [vmem:[%s2408_s3] sm:$0xff]  }
  0xf9   :  { %v266_v35 = vadd.f32 %v265_v33, %v89_v28 }
  0xfa   :  { %v2076_v36 = vpack.c.bf16 %v264_v32, %v260_v31 }
  0xfb   :  { %v2078_v37 = vpack.c.bf16 %v266_v35, %v262_v34  ;;  %v302_v11 = vpop.f32.mrb[0].mxu1 }
  0xfc   :  { %v1702_v12 = vpop.f32.mrb[1].mxu1  ;;  %v303_v16 = vadd.f32 %v302_v11, %v93_v13 }
  0xfd   :  { %v341_v38 = vsel %vm336_vm1, %v2078_v37, 0  ;;  %v305_v14 = vpop.f32.mrb[2].mxu1 }
  0xfe   :  { %1705 = vmatpush3.bf16.xpose.msra.mxu0 %v341_v38  ;;  %v1703_v15 = vpop.f32.mrb[3].mxu1  ;;  %v306_v19 = vadd.f32 %v305_v14, %v93_v13  ;;  %v1823_v38 = vld [vmem:[%s2408_s3 + $0x8] sm:$0xff]  }
  0xff   :  { %1716 = vmatprep.subr.bf16.mxu0 %v1919_v20 }
 0x100   :  { %v2145_v21 = vpack.c.bf16 %v306_v19, %v303_v16 }
 0x102   :  { %1711 = vmatpush3.bf16.msra.mxu1 %v2145_v21 }
 0x103   :  { %1724 = vmatprep.subr.bf16.mxu1 %v1919_v20 }
 0x105   :  { %1707 = vmatmul.mubr.msk.bf16.vlgmr.msra.gmra.mrb[4].mxu0 %vm336_vm1, %v2076_v36 }
 0x106   :  { %1720 = vmatprep.mubr.msk.bf16.mxu0 %vm1920_vm0, %v1919_v20  ;;  %1717 = vmatpush3.bf16.msra.mxu0 %v1822_v26 }
 0x107   :  { %1718 = vmatprep.subr.bf16.mxu0 %v1919_v20 }
 0x10a   :  { %1719 = vmatpush3.bf16.msra.mxu0 %v1823_v38 }
 0x10b   :  { %1730 = vmatprep.subr.bf16.mxu0 %v1919_v20 }
 0x1d8   :  { %v377_v51 = vpop.f32.mrb[4].mxu0 }
 0x1d9   :  { %v384_v53 = vmul.f32 0.17677669, %v377_v51  ;;  %v1708_v54 = vpop.f32.mrb[5].mxu0 }
 0x1da   :  { %v380_v55 = vpop.f32.mrb[6].mxu0 }
 0x1db   :  { %v385_v57 = vmul.f32 0.17677669, %v380_v55  ;;  %v1709_v58 = vpop.f32.mrb[7].mxu0  ;;  %v386_v59 = vsel %vm2123_vm8, %v384_v53, -1e+30 }
 0x1dc   :  { %v389_v60 = vsel %vm388_vm9, %v386_v59, -inf }
 0x1dd   :  { %390 = vmax.xlane.f32.xlu0 %v389_v60  ;;  %v387_v61 = vsel %vm2127_vm10, %v385_v57, -1e+30 }
 0x1de   :  { %v392_v62 = vsel %vm388_vm9, %v387_v61, -inf }
 0x1e1   :  { %393 = vmax.xlane.f32.xlu0 %v392_v62 }
 0x1f7   :  { %523 = vrot.lane.b32.xlu0 %v2078_v37, %s1921_s1 }
 0x26a   :  { %v391_v63 = vpop.xlane.xlu0 %390 }
 0x26b   :  { %v395_v0 = vsub.f32 %v386_v59, %v391_v63 }
 0x26d   :  { %v397_v2 = vmul.f32 1.442695, %v395_v0 }
 0x26e   :  { %v394_v3 = vpop.xlane.xlu0 %393 }
 0x26f   :  { %1870 = vpow2.f32 %v397_v2  ;;  %v396_v4 = vsub.f32 %v387_v61, %v394_v3  ;;  %v1824_v3 = vld [vmem:[%s2408_s3 + $0x10] sm:$0xff]  }
 0x271   :  { %v399_v5 = vmul.f32 1.442695, %v396_v4 }
 0x272   :  { %v524_v32 = vpop.permute.xlu0 %523 }
 0x273   :  { %1872 = vpow2.f32 %v399_v5  ;;  %v529_v34 = vsel %vm336_vm1, %v524_v32, 0 }
 0x279   :  { %v1871_v6 = vpop.eup %1870 }
 0x27a   :  { %v401_v7 = vsel %vm388_vm9, %v1871_v6, 0.0 }
 0x27b   :  { %402 = vadd.xlane.f32.xlu1 %v401_v7 }
 0x27d   :  { %v1873_v8 = vpop.eup %1872 }
 0x27e   :  { %v404_v9 = vsel %vm388_vm9, %v1873_v8, 0.0 }
 0x27f   :  { %405 = vadd.xlane.f32.xlu1 %v404_v9 }
 0x290   :  { %520 = vrot.lane.b32.xlu1 %v2076_v36, %s1921_s1 }
 0x308   :  { %v403_v24 = vpop.xlane.xlu1 %402 }
 0x309   :  { %1874 = vrcp.f32 %v403_v24  ;;  %v1825_v24 = vld [vmem:[%s2408_s3 + $0x18] sm:$0xff]  }
 0x30c   :  { %v406_v27 = vpop.xlane.xlu1 %405 }
 0x30d   :  { %1876 = vrcp.f32 %v406_v27 }
 0x310   :  { %v521_v35 = vpop.permute.xlu1 %520 }
 0x313   :  { %v1875_v28 = vpop.eup %1874 }
 0x314   :  { %v408_v30 = vmul.f32 %v1875_v28, %v1871_v6 }
 0x317   :  { %v1877_v29 = vpop.eup %1876 }
 0x318   :  { %v410_v31 = vmul.f32 %v1877_v29, %v1873_v8 }
 0x31a   :  { %v411_v33 = vpack.c.bf16 %v410_v31, %v408_v30 }
 0x31c   :  { %1713 = vmatmul.mubr.msk.bf16.vlgmr.msra.gmra.mrb[4].mxu1 %vm388_vm9, %v411_v33 }
 0x31d   :  { %1725 = vmatpush3.bf16.xpose.msra.mxu1 %v529_v34  ;;  %1726 = vmatprep.mubr.msk.bf16.mxu1 %vm1920_vm0, %v1919_v20 }
 0x31e   :  { %1736 = vmatprep.subr.bf16.mxu1 %v1919_v20 }
 0x324   :  { %1727 = vmatmul.mubr.msk.bf16.vlgmr.msra.gmra.mrb[8].mxu1 %vm336_vm1, %v521_v35 }
 0x325   :  { %1740 = vmatprep.mubr.msk.bf16.mxu1 %vm1920_vm0, %v1919_v20  ;;  %1737 = vmatpush3.bf16.msra.mxu1 %v1824_v3 }
 0x326   :  { %1738 = vmatprep.subr.bf16.mxu1 %v1919_v20 }
 0x329   :  { %1739 = vmatpush3.bf16.msra.mxu1 %v1825_v24 }
 0x32a   :  { %1750 = vmatprep.subr.bf16.mxu1 %v1919_v20 }
 0x3ef   :  { %v449_v39 = vpop.f32.mrb[4].mxu1 }
 0x3f0   :  { %v1714_v40 = vpop.f32.mrb[5].mxu1 }
 0x3f1   :  { %v452_v41 = vpop.f32.mrb[6].mxu1 }
 0x3f2   :  { %v460_v42 = vpack.c.bf16 %v452_v41, %v449_v39  ;;  %v1715_v43 = vpop.f32.mrb[7].mxu1 }
 0x3f4   :  { %1721 = vmatmul.mubr.msk.bf16.vlgmr.msra.gmra.mrb[8].mxu0 %vm336_vm1, %v460_v42 }
 0x3f5   :  { %1732 = vmatprep.mubr.msk.bf16.mxu0 %vm1920_vm0, %v1919_v20 }
 0x3f7   :  { %v565_v44 = vpop.f32.mrb[8].mxu1 }
 0x3f8   :  { %v572_v45 = vmul.f32 0.17677669, %v565_v44  ;;  %v1728_v46 = vpop.f32.mrb[9].mxu1 }
 0x3f9   :  { %v568_v47 = vpop.f32.mrb[10].mxu1 }
 0x3fa   :  { %v573_v48 = vmul.f32 0.17677669, %v568_v47  ;;  %v1729_v49 = vpop.f32.mrb[11].mxu1  ;;  %v574_v50 = vsel %vm2123_vm8, %v572_v45, -1e+30 }
 0x3fb   :  { %v576_v51 = vsel %vm388_vm9, %v574_v50, -inf }
 0x3fc   :  { %577 = vmax.xlane.f32.xlu1 %v576_v51  ;;  %v575_v53 = vsel %vm2127_vm10, %v573_v48, -1e+30 }
 0x3fd   :  { %v579_v54 = vsel %vm388_vm9, %v575_v53, -inf }
 0x3fe   :  { %580 = vmax.xlane.f32.xlu0 %v579_v54 }
 0x489   :  { %v578_v55 = vpop.xlane.xlu1 %577 }
 0x48a   :  { %v582_v57 = vsub.f32 %v574_v50, %v578_v55 }
 0x48b   :  { %v581_v58 = vpop.xlane.xlu0 %580 }
 0x48c   :  { %v584_v59 = vmul.f32 1.442695, %v582_v57  ;;  %v583_v60 = vsub.f32 %v575_v53, %v581_v58  ;;  %v1826_v57 = vld [vmem:[%s2408_s3 + $0x20] sm:$0xff]  }
 0x48e   :  { %1878 = vpow2.f32 %v584_v59  ;;  %v586_v61 = vmul.f32 1.442695, %v583_v60 }
 0x490   :  { %1880 = vpow2.f32 %v586_v61 }
 0x498   :  { %v1879_v62 = vpop.eup %1878 }
 0x499   :  { %v588_v63 = vsel %vm388_vm9, %v1879_v62, 0.0 }
 0x49a   :  { %v1881_v0 = vpop.eup %1880  ;;  %589 = vadd.xlane.f32.xlu0 %v588_v63 }
 0x49b   :  { %v591_v2 = vsel %vm388_vm9, %v1881_v0, 0.0 }
 0x49c   :  { %592 = vadd.xlane.f32.xlu1 %v591_v2 }
 0x4ad   :  { %712 = vrot.lane.b32.xlu1 %v2078_v37, %s1922_s28 }
 0x4b0   :  { %600 = vrot.lane.b32.xlu0 %v2145_v21, %s1921_s1 }
 0x4b1   :  { %710 = vrot.lane.b32.xlu1 %v2076_v36, %s1922_s28 }
 0x4c7   :  { %v2186_v4 = vpop.f32.mrb[8].mxu0 }
 0x4c8   :  { %v1722_v5 = vpop.f32.mrb[9].mxu0 }
 0x4c9   :  { %v2188_v6 = vpop.f32.mrb[10].mxu0 }
 0x4ca   :  { %v1723_v7 = vpop.f32.mrb[11].mxu0 }
 0x527   :  { %v590_v8 = vpop.xlane.xlu0 %589 }
 0x528   :  { %1882 = vrcp.f32 %v590_v8 }
 0x529   :  { %v593_v9 = vpop.xlane.xlu1 %592 }
 0x52a   :  { %1884 = vrcp.f32 %v593_v9 }
 0x52b   :  { %v601_v10 = vpop.permute.xlu0 %600 }
 0x52c   :  { %1731 = vmatpush3.bf16.msra.mxu0 %v601_v10 }
 0x52d   :  { %1744 = vmatprep.subr.bf16.mxu0 %v1919_v20  ;;  %v713_v15 = vpop.permute.xlu1 %712 }
 0x52e   :  { %v718_v19 = vsel %vm336_vm1, %v713_v15, 0 }
 0x531   :  { %v711_v26 = vpop.permute.xlu1 %710 }
 0x532   :  { %v1883_v11 = vpop.eup %1882 }
 0x533   :  { %v595_v13 = vmul.f32 %v1883_v11, %v1879_v62 }
 0x534   :  { %v1885_v12 = vpop.eup %1884 }
 0x535   :  { %v597_v14 = vmul.f32 %v1885_v12, %v1881_v0  ;;  %v1827_v12 = vld [vmem:[%s2408_s3 + $0x28] sm:$0xff]  }
 0x537   :  { %v598_v16 = vpack.c.bf16 %v597_v14, %v595_v13 }
 0x539   :  { %1733 = vmatmul.mubr.msk.bf16.vlgmr.msra.gmra.mrb[12].mxu0 %vm388_vm9, %v598_v16 }
 0x53a   :  { %1745 = vmatpush3.bf16.xpose.msra.mxu0 %v718_v19  ;;  %1746 = vmatprep.mubr.msk.bf16.mxu0 %vm1920_vm0, %v1919_v20 }
 0x53b   :  { %1756 = vmatprep.subr.bf16.mxu0 %v1919_v20 }
 0x541   :  { %1747 = vmatmul.mubr.msk.bf16.vlgmr.msra.gmra.mrb[16].mxu0 %vm336_vm1, %v711_v26 }
 0x542   :  { %1760 = vmatprep.mubr.msk.bf16.mxu0 %vm1920_vm0, %v1919_v20  ;;  %1757 = vmatpush3.bf16.msra.mxu0 %v1826_v57 }
 0x543   :  { %1758 = vmatprep.subr.bf16.mxu0 %v1919_v20 }
 0x546   :  { %1759 = vmatpush3.bf16.msra.mxu0 %v1827_v12 }
 0x547   :  { %1770 = vmatprep.subr.bf16.mxu0 %v1919_v20 }
 0x60c   :  { %v640_v27 = vpop.f32.mrb[12].mxu0 }
 0x60d   :  { %v1734_v28 = vpop.f32.mrb[13].mxu0 }
 0x60e   :  { %v643_v29 = vpop.f32.mrb[14].mxu0 }
 0x60f   :  { %v651_v30 = vpack.c.bf16 %v643_v29, %v640_v27  ;;  %v1735_v31 = vpop.f32.mrb[15].mxu0 }
 0x611   :  { %1741 = vmatmul.mubr.msk.bf16.vlgmr.msra.gmra.mrb[12].mxu1 %vm336_vm1, %v651_v30 }
 0x612   :  { %1752 = vmatprep.mubr.msk.bf16.mxu1 %vm1920_vm0, %v1919_v20 }
 0x614   :  { %v754_v32 = vpop.f32.mrb[16].mxu0 }
 0x615   :  { %v761_v33 = vmul.f32 0.17677669, %v754_v32  ;;  %v1748_v34 = vpop.f32.mrb[17].mxu0 }
 0x616   :  { %v757_v35 = vpop.f32.mrb[18].mxu0 }
 0x617   :  { %v762_v38 = vmul.f32 0.17677669, %v757_v35  ;;  %v1749_v39 = vpop.f32.mrb[19].mxu0  ;;  %v763_v40 = vsel %vm2123_vm8, %v761_v33, -1e+30 }
 0x618   :  { %v765_v41 = vsel %vm388_vm9, %v763_v40, -inf }
 0x619   :  { %766 = vmax.xlane.f32.xlu1 %v765_v41  ;;  %v764_v42 = vsel %vm2127_vm10, %v762_v38, -1e+30 }
 0x61a   :  { %v768_v43 = vsel %vm388_vm9, %v764_v42, -inf }
 0x61b   :  { %769 = vmax.xlane.f32.xlu0 %v768_v43 }
 0x62a   :  { %788 = vrot.lane.b32.xlu1 %v2145_v21, %s1922_s28 }
 0x62e   :  { %898 = vrot.lane.b32.xlu1 %v2076_v36, %s1923_s16  ;;  %v1567_v36 = vld [vmem:[%s2409_s4] ss:$0 sm:$0xff] }
 0x62f   :  { %v517_v58 = vadd.f32 %v1567_v36, %v2186_v4  ;;  %v518_v60 = vadd.f32 %v1567_v36, %v2188_v6 }
 0x6a6   :  { %v767_v44 = vpop.xlane.xlu1 %766 }
 0x6a7   :  { %v771_v45 = vsub.f32 %v763_v40, %v767_v44 }
 0x6a8   :  { %v770_v46 = vpop.xlane.xlu0 %769 }
 0x6a9   :  { %v773_v47 = vmul.f32 1.442695, %v771_v45  ;;  %v772_v48 = vsub.f32 %v764_v42, %v770_v46 }
 0x6aa   :  { %v789_v49 = vpop.permute.xlu1 %788 }
 0x6ab   :  { %1886 = vpow2.f32 %v773_v47  ;;  %v775_v50 = vmul.f32 1.442695, %v772_v48  ;;  %1751 = vmatpush3.bf16.msra.mxu1 %v789_v49 }
 0x6ac   :  { %1764 = vmatprep.subr.bf16.mxu1 %v1919_v20 }
 0x6ad   :  { %1888 = vpow2.f32 %v775_v50 }
 0x6ae   :  { %v899_v6 = vpop.permute.xlu1 %898 }
 0x6b5   :  { %v1887_v51 = vpop.eup %1886 }
 0x6b6   :  { %v777_v53 = vsel %vm388_vm9, %v1887_v51, 0.0 }
 0x6b7   :  { %v1889_v54 = vpop.eup %1888  ;;  %778 = vadd.xlane.f32.xlu0 %v777_v53 }
 0x6b8   :  { %v780_v55 = vsel %vm388_vm9, %v1889_v54, 0.0 }
 0x6bb   :  { %781 = vadd.xlane.f32.xlu0 %v780_v55 }
 0x6d1   :  { %900 = vrot.lane.b32.xlu0 %v2078_v37, %s1923_s16 }
 0x6e4   :  { %v701_v59 = vpop.f32.mrb[12].mxu1 }
 0x6e5   :  { %v2230_v61 = vadd.f32 %v701_v59, %v517_v58  ;;  %v1742_v62 = vpop.f32.mrb[13].mxu1 }
 0x6e6   :  { %v704_v37 = vpop.f32.mrb[14].mxu1 }
 0x6e7   :  { %v2232_v63 = vadd.f32 %v704_v37, %v518_v60  ;;  %v1743_v0 = vpop.f32.mrb[15].mxu1 }
 0x744   :  { %v779_v2 = vpop.xlane.xlu0 %778 }
 0x745   :  { %1890 = vrcp.f32 %v779_v2 }
 0x748   :  { %v782_v3 = vpop.xlane.xlu0 %781 }
 0x749   :  { %1892 = vrcp.f32 %v782_v3 }
 0x74c   :  { %v901_v9 = vpop.permute.xlu0 %900 }
 0x74d   :  { %v906_v11 = vsel %vm336_vm1, %v901_v9, 0  ;;  %v1830_v9 = vld [vmem:[%s2410_s7] ss:$8 sps:$4 sm:$0xff]  }
 0x74f   :  { %v1891_v5 = vpop.eup %1890 }
 0x750   :  { %v784_v8 = vmul.f32 %v1891_v5, %v1887_v51 }
 0x753   :  { %v1893_v7 = vpop.eup %1892 }
 0x754   :  { %v786_v4 = vmul.f32 %v1893_v7, %v1889_v54 }
 0x756   :  { %v787_v10 = vpack.c.bf16 %v786_v4, %v784_v8 }
 0x758   :  { %1753 = vmatmul.mubr.msk.bf16.vlgmr.msra.gmra.mrb[16].mxu1 %vm388_vm9, %v787_v10  ;;  %v1832_v10 = vld [vmem:[%s2410_s7 + $0x4] ss:$8 sps:$4 sm:$0xff]  }
 0x759   :  { %1765 = vmatpush3.bf16.xpose.msra.mxu1 %v906_v11  ;;  %1766 = vmatprep.mubr.msk.bf16.mxu1 %vm1920_vm0, %v1919_v20  ;;  %v1833_v11 = vld [vmem:[%s2410_s7 + $0x10] ss:$8 sps:$4 sm:$0xff]  }
 0x75a   :  { %1776 = vmatprep.subr.bf16.mxu1 %v1919_v20 }
 0x760   :  { %1767 = vmatmul.mubr.msk.bf16.vlgmr.msra.gmra.mrb[20].mxu1 %vm336_vm1, %v899_v6 }
 0x761   :  { %1780 = vmatprep.mubr.msk.bf16.mxu1 %vm1920_vm0, %v1919_v20  ;;  %1777 = vmatpush3.bf16.msra.mxu1 %v1828_v56  ;;  %v1588_v56 = vld [vmem:[%s2411_s5] ss:$0 sm:$0xff] }
 0x762   :  { %1778 = vmatprep.subr.bf16.mxu1 %v1919_v20 }
 0x82b   :  { %v828_v13 = vpop.f32.mrb[16].mxu1 }
 0x82c   :  { %v1754_v14 = vpop.f32.mrb[17].mxu1 }
 0x82d   :  { %v831_v15 = vpop.f32.mrb[18].mxu1 }
 0x82e   :  { %v839_v16 = vpack.c.bf16 %v831_v15, %v828_v13  ;;  %v1755_v19 = vpop.f32.mrb[19].mxu1 }
 0x830   :  { %1761 = vmatmul.mubr.msk.bf16.vlgmr.msra.gmra.mrb[20].mxu0 %vm336_vm1, %v839_v16 }
 0x831   :  { %1772 = vmatprep.mubr.msk.bf16.mxu0 %vm1920_vm0, %v1919_v20  ;;  %v1829_v20 = vld [vmem:[%s2408_s3 + $0x38] sm:$0xff]  }
 0x832   :  { %1779 = vmatpush3.bf16.msra.mxu1 %v1829_v20  ;;  %v1860_v20 = vld [vmem:[%s2413_s9 + $0x58] sm:$0xff]  }
 0x833   :  { %v942_v26 = vpop.f32.mrb[20].mxu1 }
 0x834   :  { %v949_v24 = vmul.f32 0.17677669, %v942_v26  ;;  %v1768_v27 = vpop.f32.mrb[21].mxu1  ;;  %v1838_v26 = vld [vmem:[%s2410_s7 + $0x24] ss:$8 sps:$4 sm:$0xff]  }
 0x835   :  { %v945_v28 = vpop.f32.mrb[22].mxu1  ;;  %v1841_v27 = vld [vmem:[%s2410_s7 + $0x34] ss:$8 sps:$4 sm:$0xff]  }
 0x836   :  { %v950_v29 = vmul.f32 0.17677669, %v945_v28  ;;  %v1769_v30 = vpop.f32.mrb[23].mxu1  ;;  %v951_v31 = vsel %vm2123_vm8, %v949_v24, -1e+30 }
 0x837   :  { %v953_v32 = vsel %vm388_vm9, %v951_v31, -inf  ;;  %v1836_v24 = vld [vmem:[%s2410_s7 + $0x20] ss:$8 sps:$4 sm:$0xff]   ;;  %v1839_v28 = vld [vmem:[%s2410_s7 + $0x30] ss:$8 sps:$4 sm:$0xff]  }
 0x838   :  { %954 = vmax.xlane.f32.xlu1 %v953_v32  ;;  %v952_v33 = vsel %vm2127_vm10, %v950_v29, -1e+30  ;;  %v1844_v29 = vld [vmem:[%s2410_s7 + $0x44] ss:$8 sps:$4 sm:$0xff]   ;;  %v1842_v30 = vld [vmem:[%s2410_s7 + $0x40] ss:$8 sps:$4 sm:$0xff]  }
 0x839   :  { %v956_v34 = vsel %vm388_vm9, %v952_v33, -inf  ;;  %v1845_v32 = vld [vmem:[%s2410_s7 + $0x50] ss:$8 sps:$4 sm:$0xff]  }
 0x83a   :  { %957 = vmax.xlane.f32.xlu0 %v956_v34  ;;  %v1848_v34 = vld [vmem:[%s2410_s7 + $0x60] ss:$8 sps:$4 sm:$0xff]  }
 0x8c5   :  { %v955_v35 = vpop.xlane.xlu1 %954 }
 0x8c6   :  { %v959_v38 = vsub.f32 %v951_v31, %v955_v35  ;;  %v1847_v31 = vld [vmem:[%s2410_s7 + $0x54] ss:$8 sps:$4 sm:$0xff]  }
 0x8c7   :  { %v958_v39 = vpop.xlane.xlu0 %957  ;;  %v1853_v35 = vld [vmem:[%s2410_s7 + $0x74] ss:$8 sps:$4 sm:$0xff]  }
 0x8c8   :  { %v961_v40 = vmul.f32 1.442695, %v959_v38  ;;  %v960_v41 = vsub.f32 %v952_v33, %v958_v39  ;;  %v1850_v33 = vld [vmem:[%s2410_s7 + $0x64] ss:$8 sps:$4 sm:$0xff]   ;;  %v1851_v38 = vld [vmem:[%s2410_s7 + $0x70] ss:$8 sps:$4 sm:$0xff]  }
 0x8ca   :  { %1894 = vpow2.f32 %v961_v40  ;;  %v963_v42 = vmul.f32 1.442695, %v960_v41 }
 0x8cc   :  { %1896 = vpow2.f32 %v963_v42 }
 0x8d4   :  { %v1895_v43 = vpop.eup %1894 }
 0x8d5   :  { %v965_v52 = vsel %vm388_vm9, %v1895_v43, 0.0 }
 0x8d6   :  { %v1897_v44 = vpop.eup %1896  ;;  %966 = vadd.xlane.f32.xlu0 %v965_v52 }
 0x8d7   :  { %v968_v45 = vsel %vm388_vm9, %v1897_v44, 0.0 }
 0x8d8   :  { %969 = vadd.xlane.f32.xlu1 %v968_v45 }
 0x8ec   :  { %976 = vrot.lane.b32.xlu0 %v2145_v21, %s1923_s16 }
 0x903   :  { %v889_v46 = vpop.f32.mrb[20].mxu0 }
 0x904   :  { %v896_v47 = vadd.f32 %v889_v46, %v2230_v61  ;;  %v1762_v48 = vpop.f32.mrb[21].mxu0 }
 0x905   :  { %v892_v49 = vpop.f32.mrb[22].mxu0 }
 0x906   :  { %v897_v50 = vadd.f32 %v892_v49, %v2232_v63  ;;  %v1763_v51 = vpop.f32.mrb[23].mxu0  ;;  %v1589_v49 = vld [vmem:[%s2412_s6] ss:$0 sm:$0xff] }
 0x963   :  { %v967_v53 = vpop.xlane.xlu0 %966 }
 0x964   :  { %1898 = vrcp.f32 %v967_v53 }
 0x965   :  { %v970_v54 = vpop.xlane.xlu1 %969 }
 0x966   :  { %1900 = vrcp.f32 %v970_v54 }
 0x967   :  { %v977_v21 = vpop.permute.xlu0 %976 }
 0x968   :  { %1771 = vmatpush3.bf16.msra.mxu0 %v977_v21  ;;  %v1854_v21 = vld [vmem:[%s2413_s9 + $0x40] sm:$0xff]  }
 0x969   :  { %1238 = vmatprep.subr.bf16.mxu0 %v1832_v10  ;;  %1662 = vmatprep.subr.bf16.mxu1 %v1854_v21 }
 0x96e   :  { %v1899_v55 = vpop.eup %1898 }
 0x96f   :  { %v972_v57 = vmul.f32 %v1899_v55, %v1895_v43  ;;  %v1855_v55 = vld [vmem:[%s2413_s9] sm:$0xff]  }
 0x970   :  { %v1901_v36 = vpop.eup %1900 }
 0x971   :  { %v974_v58 = vmul.f32 %v1901_v36, %v1897_v44  ;;  %v1856_v36 = vld [vmem:[%s2413_s9 + $0x48] sm:$0xff]  }
 0x973   :  { %v975_v59 = vpack.c.bf16 %v974_v58, %v972_v57  ;;  %v1857_v57 = vld [vmem:[%s2413_s9 + $0x8] sm:$0xff]   ;;  %v1858_v58 = vld [vmem:[%s2413_s9 + $0x50] sm:$0xff]  }
 0x975   :  { %1773 = vmatmul.mubr.msk.bf16.vlgmr.msra.gmra.mrb[24].mxu0 %vm388_vm9, %v975_v59  ;;  %v1859_v59 = vld [vmem:[%s2413_s9 + $0x10] sm:$0xff]  }
 0x976   :  { %1270 = vmatprep.mubr.bf16.mxu0 %v1918_v1  ;;  %1239 = vmatpush1.bf16.msra.mxu0 %v1830_v9 }
 0xa48   :  { %v1016_v60 = vpop.f32.mrb[24].mxu0 }
 0xa49   :  { %v1774_v61 = vpop.f32.mrb[25].mxu0 }
 0xa4a   :  { %v1019_v62 = vpop.f32.mrb[26].mxu0  ;;  %v1862_v61 = vld [vmem:[%s2413_s9 + $0x60] sm:$0xff]  }
 0xa4b   :  { %v1027_v37 = vpack.c.bf16 %v1019_v62, %v1016_v60  ;;  %v1775_v63 = vpop.f32.mrb[27].mxu0  ;;  %v1861_v60 = vld [vmem:[%s2413_s9 + $0x18] sm:$0xff]   ;;  %v1863_v62 = vld [vmem:[%s2413_s9 + $0x20] sm:$0xff]  }
 0xa4c   :  { %v1865_v63 = vld [vmem:[%s2413_s9 + $0x28] sm:$0xff]  }
 0xa4d   :  { %1781 = vmatmul.mubr.msk.bf16.vlgmr.msra.gmra.mrb[24].mxu1 %vm336_vm1, %v1027_v37  ;;  %v1864_v37 = vld [vmem:[%s2413_s9 + $0x68] sm:$0xff]  }
 0xa4e   :  { %1663 = vmatpush3.bf16.msra.mxu1 %v1855_v55 }
 0xa4f   :  { %1664 = vmatprep.subr.bf16.mxu1 %v1856_v36 }
 0xa52   :  { %1665 = vmatpush3.bf16.msra.mxu1 %v1857_v57 }
 0xa53   :  { %1666 = vmatprep.subr.bf16.mxu1 %v1858_v58  ;;  %v1606_v58 = vld [vmem:[%s2415_s10] ss:$0 sm:$0xff] }
 0xa56   :  { %1667 = vmatpush3.bf16.msra.mxu1 %v1859_v59 }
 0xa57   :  { %1668 = vmatprep.subr.bf16.mxu1 %v1860_v20 }
 0xa5a   :  { %1669 = vmatpush3.bf16.msra.mxu1 %v1861_v60 }
 0xa5b   :  { %1670 = vmatprep.subr.bf16.mxu1 %v1862_v61 }
 0xa5e   :  { %1671 = vmatpush3.bf16.msra.mxu1 %v1863_v62 }
 0xa5f   :  { %1672 = vmatprep.subr.bf16.mxu1 %v1864_v37 }
 0xa62   :  { %1673 = vmatpush3.bf16.msra.mxu1 %v1865_v63 }
 0xb20   :  { %v1077_v0 = vpop.f32.mrb[24].mxu1 }
 0xb21   :  { %v1084_v2 = vadd.f32 %v1077_v0, %v896_v47  ;;  %v1782_v3 = vpop.f32.mrb[25].mxu1  ;;  %v1866_v0 = vld [vmem:[%s2413_s9 + $0x70] sm:$0xff]  }
 0xb22   :  { %v1080_v5 = vpop.f32.mrb[26].mxu1  ;;  %1674 = vmatprep.subr.bf16.mxu1 %v1866_v0  ;;  %v1868_v3 = vld [vmem:[%s2413_s9 + $0x78] sm:$0xff]  }
 0xb23   :  { %v1085_v7 = vadd.f32 %v1080_v5, %v897_v50  ;;  %v1783_v8 = vpop.f32.mrb[27].mxu1  ;;  %v1086_v1 = vadd.f32 %v1084_v2, %v2046_v17  ;;  %v1835_v17 = vld [vmem:[%s2410_s7 + $0x14] ss:$8 sps:$4 sm:$0xff]  }
 0xb24   :  { %1240 = vmatprep.subr.bf16.mxu0 %v1835_v17  ;;  %v1867_v2 = vld [vmem:[%s2413_s9 + $0x30] sm:$0xff]   ;;  %v1869_v5 = vld [vmem:[%s2413_s9 + $0x38] sm:$0xff]  }
 0xb25   :  { %1090 = vadd.xlane.f32.xlu1 %v1086_v1  ;;  %v1087_v4 = vadd.f32 %v1085_v7, %v2051_v18  ;;  %1241 = vmatpush1.bf16.msra.mxu0 %v1833_v11  ;;  %v1146_v7 = vld [vmem:[%s2414_s8] sm:$0x3] }
 0xb26   :  { %1242 = vmatprep.subr.bf16.mxu0 %v1838_v26  ;;  %1675 = vmatpush3.bf16.msra.mxu1 %v1867_v2  ;;  %v1151_v8 = vrot.slane %v1146_v7, %v84_v23 }
 0xb27   :  { %1676 = vmatprep.subr.bf16.mxu1 %v1868_v3 }
 0xb29   :  { %1092 = vadd.xlane.f32.xlu1 %v1087_v4  ;;  %1243 = vmatpush1.bf16.msra.mxu0 %v1836_v24 }
 0xb2a   :  { %1244 = vmatprep.subr.bf16.mxu0 %v1841_v27  ;;  %1677 = vmatpush3.bf16.msra.mxu1 %v1869_v5 }
 0xb2d   :  { %1245 = vmatpush1.bf16.msra.mxu0 %v1839_v28 }
 0xb2e   :  { %1246 = vmatprep.subr.bf16.mxu0 %v1844_v29 }
 0xb31   :  { %1247 = vmatpush1.bf16.msra.mxu0 %v1842_v30 }
 0xb32   :  { %1248 = vmatprep.subr.bf16.mxu0 %v1847_v31 }
 0xb35   :  { %1249 = vmatpush1.bf16.msra.mxu0 %v1845_v32 }
 0xb36   :  { %1250 = vmatprep.subr.bf16.mxu0 %v1850_v33 }
 0xb39   :  { %1251 = vmatpush1.bf16.msra.mxu0 %v1848_v34 }
 0xb3a   :  { %1252 = vmatprep.subr.bf16.mxu0 %v1853_v35 }
 0xb3d   :  { %1253 = vmatpush1.bf16.msra.mxu0 %v1851_v38 }
 0xbb2   :  { %v1091_v18 = vpop.xlane.xlu1 %1090 }
 0xbb3   :  { %v1095_v6 = vmul.f32 0.0078125, %v1091_v18 }
 0xbb5   :  { %v1097_v12 = vsub.f32 %v1086_v1, %v1095_v6  ;;  %v1155_v1 = vrot.slane %v1146_v7, %v88_v25 }
 0xbb6   :  { %v1093_v13 = vpop.xlane.xlu1 %1092 }
 0xbb7   :  { %v1096_v14 = vmul.f32 0.0078125, %v1093_v13  ;;  %v1099_v15 = vmul.f32 %v1097_v12, %v1097_v12 }
 0xbb9   :  { %v1098_v16 = vsub.f32 %v1087_v4, %v1096_v14  ;;  %1101 = vadd.xlane.f32.xlu1 %v1099_v15 }
 0xbbb   :  { %v1100_v19 = vmul.f32 %v1098_v16, %v1098_v16 }
 0xbbd   :  { %1103 = vadd.xlane.f32.xlu1 %v1100_v19 }
 0xc46   :  { %v1102_v39 = vpop.xlane.xlu1 %1101 }
 0xc47   :  { %v1105_v40 = vmul.f32 0.0078125, %v1102_v39 }
 0xc49   :  { %v1107_v41 = vadd.f32 1e-05, %v1105_v40 }
 0xc4a   :  { %v1104_v42 = vpop.xlane.xlu1 %1103 }
 0xc4b   :  { %1902 = vrsqrt.f32 %v1107_v41  ;;  %v1106_v43 = vmul.f32 0.0078125, %v1104_v42 }
 0xc4d   :  { %v1108_v52 = vadd.f32 1e-05, %v1106_v43 }
 0xc4f   :  { %1904 = vrsqrt.f32 %v1108_v52 }
 0xc55   :  { %v1903_v44 = vpop.eup %1902 }
 0xc56   :  { %v1111_v45 = vmul.f32 %v1903_v44, %v1097_v12 }
 0xc58   :  { %v1119_v48 = vmul.f32 %v1588_v56, %v1111_v45 }
 0xc59   :  { %v1905_v46 = vpop.eup %1904 }
 0xc5a   :  { %v1112_v47 = vmul.f32 %v1905_v46, %v1098_v16  ;;  %v2327_v51 = vadd.f32 %v1589_v49, %v1119_v48 }
 0xc5c   :  { %v1120_v50 = vmul.f32 %v1588_v56, %v1112_v47 }
 0xc5e   :  { %v2329_v53 = vadd.f32 %v1589_v49, %v1120_v50 }
 0xc60   :  { %v1145_v54 = vpack.c.bf16 %v2329_v53, %v2327_v51 }
 0xc62   :  { %1271 = vmatmul.mubr.bf16.vlgmr.msra.gmra.mrb[28].mxu0 %v1145_v54 }
 0xd35   :  { %v1272_v4 = vpop.f32.mrb[28].mxu0 }
 0xd36   :  { %v1273_v9 = vadd.f32 %v1272_v4, %v1151_v8  ;;  %v1274_v10 = vpop.f32.mrb[29].mxu0 }
 0xd37   :  { %v1275_v11 = vadd.f32 %v1274_v10, %v1155_v1  ;;  %v1276_v17 = vpop.f32.mrb[30].mxu0 }
 0xd38   :  { %v1285_v18 = vmul.f32 0.044715, %v1273_v9  ;;  %v1277_v6 = vadd.f32 %v1276_v17, %v1151_v8  ;;  %v1278_v12 = vpop.f32.mrb[31].mxu0  ;;  %v1281_v44 = vmul.f32 0.5, %v1273_v9 }
 0xd39   :  { %v1286_v13 = vmul.f32 0.044715, %v1275_v11  ;;  %v1279_v14 = vadd.f32 %v1278_v12, %v1155_v1  ;;  %v1282_v46 = vmul.f32 0.5, %v1275_v11 }
 0xd3a   :  { %v1289_v15 = vmul.f32 %v1285_v18, %v1273_v9  ;;  %v1287_v16 = vmul.f32 0.044715, %v1277_v6  ;;  %v1283_v45 = vmul.f32 0.5, %v1277_v6 }
 0xd3b   :  { %v1290_v19 = vmul.f32 %v1286_v13, %v1275_v11  ;;  %v1288_v26 = vmul.f32 0.044715, %v1279_v14  ;;  %v1284_v47 = vmul.f32 0.5, %v1279_v14  ;;  %v1623_v13 = vld [vmem:[%s2416_s11] ss:$0 sm:$0xff] }
 0xd3c   :  { %v1293_v24 = vmul.f32 %v1289_v15, %v1273_v9  ;;  %v1291_v27 = vmul.f32 %v1287_v16, %v1277_v6  ;;  %v1624_v15 = vld [vmem:[%s2417_s12] ss:$0 sm:$0xff] }
 0xd3d   :  { %v1294_v23 = vmul.f32 %v1290_v19, %v1275_v11  ;;  %v1292_v28 = vmul.f32 %v1288_v26, %v1279_v14 }
 0xd3e   :  { %v1297_v22 = vadd.f32 %v1293_v24, %v1273_v9  ;;  %v1295_v25 = vmul.f32 %v1291_v27, %v1277_v6 }
 0xd3f   :  { %v1296_v29 = vmul.f32 %v1292_v28, %v1279_v14  ;;  %v1298_v30 = vadd.f32 %v1294_v23, %v1275_v11 }
 0xd40   :  { %v1301_v31 = vmul.f32 0.7978846, %v1297_v22  ;;  %v1299_v32 = vadd.f32 %v1295_v25, %v1277_v6 }
 0xd41   :  { %v1300_v33 = vadd.f32 %v1296_v29, %v1279_v14  ;;  %v1302_v34 = vmul.f32 0.7978846, %v1298_v30 }
 0xd42   :  { %1906 = vtanh.f32 %v1301_v31  ;;  %v1303_v35 = vmul.f32 0.7978846, %v1299_v32 }
 0xd43   :  { %v1304_v38 = vmul.f32 0.7978846, %v1300_v33  ;;  %1908 = vtanh.f32 %v1302_v34 }
 0xd44   :  { %1910 = vtanh.f32 %v1303_v35 }
 0xd45   :  { %1912 = vtanh.f32 %v1304_v38 }
 0xd4c   :  { %v1907_v39 = vpop.eup %1906 }
 0xd4d   :  { %v1909_v40 = vpop.eup %1908  ;;  %v1309_v41 = vadd.f32 1.0, %v1907_v39 }
 0xd4e   :  { %v1911_v42 = vpop.eup %1910  ;;  %v1310_v43 = vadd.f32 1.0, %v1909_v40 }
 0xd4f   :  { %v1913_v52 = vpop.eup %1912  ;;  %v1311_v56 = vadd.f32 1.0, %v1911_v42  ;;  %v1313_v49 = vmul.f32 %v1309_v41, %v1281_v44 }
 0xd50   :  { %v1312_v48 = vadd.f32 1.0, %v1913_v52  ;;  %v1314_v54 = vmul.f32 %v1310_v43, %v1282_v46 }
 0xd51   :  { %v1315_v50 = vmul.f32 %v1311_v56, %v1283_v45 }
 0xd52   :  { %v1316_v21 = vmul.f32 %v1312_v48, %v1284_v47 }
 0xd53   :  { %v1349_v55 = vpack.c.bf16 %v1315_v50, %v1313_v49 }
 0xd54   :  { %v1350_v36 = vpack.c.bf16 %v1316_v21, %v1314_v54 }
 0xd56   :  { %1486 = vmatprep.mubr.bf16.mxu1 %v1350_v36 }
 0xd57   :  { %1487 = vmatmul.mubr.bf16.vlgmr.msra.gmra.mrb[28].mxu1 %v1349_v55 }
 0xe2a   :  { %v1678_v57 = vpop.f32.mrb[28].mxu1 }
 0xe2b   :  { %v1679_v59 = vpop.f32.mrb[29].mxu1 }
 0xe2c   :  { %v1680_v20 = vadd.f32 %v1679_v59, %v1678_v57  ;;  %v1681_v60 = vpop.f32.mrb[30].mxu1 }
 0xe2d   :  { %v1682_v61 = vpop.f32.mrb[31].mxu1 }
 0xe2e   :  { %v1489_v62 = vadd.f32 %v1680_v20, %v1606_v58  ;;  %v1683_v37 = vadd.f32 %v1682_v61, %v1681_v60 }
 0xe30   :  { %v1492_v63 = vadd.f32 %v1683_v37, %v1606_v58  ;;  %v1495_v0 = vadd.f32 %v1489_v62, %v2327_v51 }
 0xe32   :  { %1499 = vadd.xlane.f32.xlu1 %v1495_v0  ;;  %v1496_v2 = vadd.f32 %v1492_v63, %v2329_v53 }
 0xe36   :  { %1501 = vadd.xlane.f32.xlu1 %v1496_v2 }
 0xebf   :  { %v1500_v3 = vpop.xlane.xlu1 %1499 }
 0xec0   :  { %v1503_v5 = vmul.f32 0.0078125, %v1500_v3 }
 0xec2   :  { %v1505_v7 = vsub.f32 %v1495_v0, %v1503_v5 }
 0xec3   :  { %v1502_v8 = vpop.xlane.xlu1 %1501 }
 0xec4   :  { %v1504_v1 = vmul.f32 0.0078125, %v1502_v8  ;;  %v1507_v4 = vmul.f32 %v1505_v7, %v1505_v7 }
 0xec6   :  { %v1506_v9 = vsub.f32 %v1496_v2, %v1504_v1  ;;  %1509 = vadd.xlane.f32.xlu0 %v1507_v4 }
 0xec8   :  { %v1508_v10 = vmul.f32 %v1506_v9, %v1506_v9 }
 0xeca   :  { %1511 = vadd.xlane.f32.xlu1 %v1508_v10 }
 0xf53   :  { %v1510_v11 = vpop.xlane.xlu0 %1509 }
 0xf54   :  { %v1513_v17 = vmul.f32 0.0078125, %v1510_v11 }
 0xf56   :  { %v1515_v18 = vadd.f32 1e-05, %v1513_v17 }
 0xf57   :  { %v1512_v6 = vpop.xlane.xlu1 %1511 }
 0xf58   :  { %1914 = vrsqrt.f32 %v1515_v18  ;;  %v1514_v51 = vmul.f32 0.0078125, %v1512_v6 }
 0xf5a   :  { %v1516_v12 = vadd.f32 1e-05, %v1514_v51 }
 0xf5c   :  { %1916 = vrsqrt.f32 %v1516_v12 }
 0xf62   :  { %v1915_v53 = vpop.eup %1914 }
 0xf63   :  { %v1519_v14 = vmul.f32 %v1915_v53, %v1505_v7 }
 0xf65   :  { %v1527_v16 = vmul.f32 %v1623_v13, %v1519_v14 }
 0xf66   :  { %v1917_v19 = vpop.eup %1916 }
 0xf67   :  { %v1535_v26 = vadd.f32 %v1624_v15, %v1527_v16  ;;  %v1520_v24 = vmul.f32 %v1917_v19, %v1506_v9 }
 0xf69   :  { %1537 = vst [vmem:[%s2418_s13] sm:$0xff] %v1535_v26  ;;  %v1528_v27 = vmul.f32 %v1623_v13, %v1520_v24 }
 0xf6b   :  { %v1536_v23 = vadd.f32 %v1624_v15, %v1528_v27 }
 0xf6d   :  { %1538 = vst [vmem:[%s2418_s13 + $0x8] sm:$0xff] %v1536_v23 }

// kernel: maxv1_forward.4
= control target key start
LH: loop header
LB: loop body
LE: loop exit
PB: predicated region body
PF: predicated region fallthrough
CT: control target
= control target key end

     0   :  { %18 = vsyncpa [#allocation3], 0  ;;  %s2423_s0 = inlined_call_operand.vmem [shape: f32[16,128], index: 0, kind: input, shape index: {}]   ;;  %s2424_s1 = inlined_call_operand.vmem [shape: bf16[128,384], index: 1, kind: input, shape index: {}]   ;;  %s2425_s2 = inlined_call_operand.vmem [shape: f32[1,384], index: 2, kind: input, shape index: {}]   ;;  %s2426_s3 = inlined_call_operand.vmem [shape: bf16[128,128], index: 3, kind: input, shape index: {}]   ;;  %s2427_s4 = inlined_call_operand.vmem [shape: f32[1,128], index: 4, kind: input, shape index: {}]   ;;  %s2428_s5 = inlined_call_operand.vmem [shape: f32[1,128], index: 5, kind: input, shape index: {}]   ;;  %s2429_s6 = inlined_call_operand.vmem [shape: f32[1,128], index: 6, kind: input, shape index: {}]   ;;  %s2430_s7 = inlined_call_operand.hbm [shape: bf16[128,256], index: 7, kind: input, shape index: {}]   ;;  %s2431_s8 = inlined_call_operand.vmem [shape: f32[1,256], index: 8, kind: input, shape index: {}]   ;;  %s2432_s9 = inlined_call_operand.hbm [shape: bf16[256,128], index: 9, kind: input, shape index: {}]   ;;  %s2433_s10 = inlined_call_operand.vmem [shape: f32[1,128], index: 10, kind: input, shape index: {}]   ;;  %s2434_s11 = inlined_call_operand.vmem [shape: f32[1,128], index: 11, kind: input, shape index: {}]   ;;  %s2435_s12 = inlined_call_operand.vmem [shape: f32[1,128], index: 12, kind: input, shape index: {}]   ;;  %s2436_s13 = inlined_call_operand.vmem [shape: f32[16,128], index: 13, kind: output, shape index: {}]  }
   0x1   :  { %19 = vsyncpa [#allocation5], 0  ;;  %s2001_s25 = smov [#allocation2]   ;;  %s1953_s29 = scalar_lea.hbm %s2430_s7, 2048 }
   0x2   :  { %s39_s26 = sshll.u32 %s2001_s25, 4  ;;  %p1954_p0 = scmp.ne.s32.totalorder %s2430_s7, %s1953_s29  ;;  %s40_s26 = int_to_ptr.vmem [resolvable:$true] %s39_s26 }
   0x3   :  { %p1957_p1 = scmp.lt.u32.totalorder %s1953_s29, %s2430_s7 }
   0x5   :  { %p1959_p2 = pnand %p1957_p1, %p1954_p0 }
   0x7   :  { %1962 = shalt.err (!%p1959_p2)
}
   0x8   :  { %s1963_s17 = scalar_lea.vmem %s40_s26, 2048  ;;  %p1968_p4 = scmp.lt.s32.totalorder %s40_s26, %s40_s26 }
   0x9   :  { %p1964_p3 = scmp.ne.s32.totalorder %s40_s26, %s1963_s17  ;;  %p1969_p5 = scmp.lt.s32.totalorder %s1963_s17, %s1963_s17 }
   0xb   :  { %p1970_p6 = por %p1969_p5, %p1968_p4 }
   0xd   :  { %p1971_p7 = pnand %p1970_p6, %p1964_p3 }
   0xf   :  { %1974 = shalt.err (!%p1971_p7)
}
  0x10   :  { %s2002_s18 = smov 128   ;;  %s2003_s19 = smov 8  }
  0x11   :  { %45 = dma.hbm_to_vmem [thread:$0]  %s2430_s7, 2048, %s40_s26, [#allocation3], %s2002_s18, %s2002_s18, %s2003_s19  }
  0x12   :  { %s2004_s22 = smov [#allocation4]   ;;  %s1975_s27 = scalar_lea.hbm %s2432_s9, 2048 }
  0x13   :  { %s53_s23 = sshll.u32 %s2004_s22, 4  ;;  %p1976_p8 = scmp.ne.s32.totalorder %s2432_s9, %s1975_s27  ;;  %s54_s23 = int_to_ptr.vmem [resolvable:$true] %s53_s23 }
  0x14   :  { %p1979_p9 = scmp.lt.u32.totalorder %s1975_s27, %s2432_s9 }
  0x16   :  { %p1981_p10 = pnand %p1979_p9, %p1976_p8 }
  0x18   :  { %1984 = shalt.err (!%p1981_p10)
}
  0x19   :  { %s1985_s15 = scalar_lea.vmem %s54_s23, 2048  ;;  %p1990_p12 = scmp.lt.s32.totalorder %s54_s23, %s54_s23 }
  0x1a   :  { %p1986_p11 = scmp.ne.s32.totalorder %s54_s23, %s1985_s15  ;;  %p1991_p13 = scmp.lt.s32.totalorder %s1985_s15, %s1985_s15 }
  0x1c   :  { %p1992_p0 = por %p1991_p13, %p1990_p12 }
  0x1e   :  { %p1993_p1 = pnand %p1992_p0, %p1986_p11 }
  0x20   :  { %1996 = shalt.err (!%p1993_p1)
}
  0x21   :  { %s2005_s7 = smov 64   ;;  %s2006_s26 = smov 4  }
  0x22   :  { %59 = dma.hbm_to_vmem [thread:$0]  %s2432_s9, 2048, %s54_s23, [#allocation5], %s2005_s7, %s2005_s7, %s2006_s26  }
  0x23   :  { %1997 = dma.done.wait [#allocation3], 2048  }
  0x24   :  { %1998 = vsyncadd [#allocation3], 4294965248 }
  0x25   :  { %1999 = dma.done.wait [#allocation5], 2048  }
  0x26   :  { %2000 = vsyncadd [#allocation5], 4294965248  ;;  %v2007_v0 = vmov 0   ;;  %v1825_v1 = vld [vmem:[%s2424_s1 + $0x4] ss:$12 sps:$4 sm:$0xff]   ;;  %v2165_v18 = vld [vmem:[%s2423_s0 + $0x8] sm:$0xff]  ;;  %v110_v21 = vlaneseq }
  0x27   :  { %285 = vmatprep.mubr.bf16.mxu0 %v2007_v0  ;;  %v1827_v2 = vld [vmem:[%s2424_s1] ss:$12 sps:$4 sm:$0xff]   ;;  %253 = vmatprep.subr.bf16.mxu0 %v1825_v1  ;;  %v1828_v3 = vld [vmem:[%s2424_s1 + $0x1c] ss:$12 sps:$4 sm:$0xff]   ;;  %v1830_v4 = vld [vmem:[%s2424_s1 + $0x18] ss:$12 sps:$4 sm:$0xff]  }
  0x28   :  { %254 = vmatpush1.bf16.msra.mxu0 %v1827_v2  ;;  %v1831_v5 = vld [vmem:[%s2424_s1 + $0x34] ss:$12 sps:$4 sm:$0xff]   ;;  %v1833_v6 = vld [vmem:[%s2424_s1 + $0x30] ss:$12 sps:$4 sm:$0xff]   ;;  %v1834_v7 = vld [vmem:[%s2424_s1 + $0x4c] ss:$12 sps:$4 sm:$0xff]  }
  0x29   :  { %255 = vmatprep.subr.bf16.mxu0 %v1828_v3  ;;  %v1836_v8 = vld [vmem:[%s2424_s1 + $0x48] ss:$12 sps:$4 sm:$0xff]   ;;  %v1837_v9 = vld [vmem:[%s2424_s1 + $0x64] ss:$12 sps:$4 sm:$0xff]   ;;  %v1839_v10 = vld [vmem:[%s2424_s1 + $0x60] ss:$12 sps:$4 sm:$0xff]  }
  0x2a   :  { %v1840_v11 = vld [vmem:[%s2424_s1 + $0x7c] ss:$12 sps:$4 sm:$0xff]   ;;  %v1842_v12 = vld [vmem:[%s2424_s1 + $0x78] ss:$12 sps:$4 sm:$0xff]   ;;  %v1843_v13 = vld [vmem:[%s2424_s1 + $0x94] ss:$12 sps:$4 sm:$0xff]  }
  0x2b   :  { %v1845_v14 = vld [vmem:[%s2424_s1 + $0x90] ss:$12 sps:$4 sm:$0xff]   ;;  %v1846_v15 = vld [vmem:[%s2424_s1 + $0xac] ss:$12 sps:$4 sm:$0xff]   ;;  %v1848_v16 = vld [vmem:[%s2424_s1 + $0xa8] ss:$12 sps:$4 sm:$0xff]  }
  0x2c   :  { %256 = vmatpush1.bf16.msra.mxu0 %v1830_v4  ;;  %v2160_v17 = vld [vmem:[%s2423_s0] sm:$0xff]  ;;  %v2008_v20 = vmov 0.0   ;;  %vm2009_vm0 = vmmov 0   ;;  %v2175_v22 = vshrl.u32 %v110_v21, 7  ;;  %vm364_vm1 = vcmask 261120   ;;  %s2011_s22 = smov 32  }
  0x2d   :  { %257 = vmatprep.subr.bf16.mxu0 %v1831_v5  ;;  %v107_v19 = vpack.c.bf16 %v2165_v18, %v2160_v17  ;;  %1714 = vmatprep.subr.bf16.mxu1 %v2008_v20  ;;  %v2181_v24 = vld [vmem:[%s2425_s2] sm:$0x7]  ;;  %v1849_v39 = vld [vmem:[%s2424_s1 + $0x8] ss:$12 sps:$4 sm:$0xff]   ;;  %v1851_v41 = vld [vmem:[%s2424_s1 + $0x38] ss:$12 sps:$4 sm:$0xff]  }
  0x2e   :  { %1730 = vmatprep.mubr.msk.bf16.mxu1 %vm2009_vm0, %v2008_v20  ;;  %v112_v23 = vsub.s32 0, %v2175_v22  ;;  %v116_v25 = vsub.s32 1, %v2175_v22  ;;  %1715 = vmatpush3.bf16.msra.mxu1 %v1849_v39  ;;  %v1850_v40 = vld [vmem:[%s2424_s1 + $0x20] ss:$12 sps:$4 sm:$0xff]   ;;  %v1852_v42 = vld [vmem:[%s2424_s1 + $0x50] ss:$12 sps:$4 sm:$0xff]  }
  0x2f   :  { %1716 = vmatprep.subr.bf16.mxu1 %v2008_v20  ;;  %v1853_v43 = vld [vmem:[%s2424_s1 + $0x68] ss:$12 sps:$4 sm:$0xff]   ;;  %v1854_v44 = vld [vmem:[%s2424_s1 + $0x80] ss:$12 sps:$4 sm:$0xff]   ;;  %v1855_v45 = vld [vmem:[%s2424_s1 + $0x98] ss:$12 sps:$4 sm:$0xff]  }
  0x30   :  { %258 = vmatpush1.bf16.msra.mxu0 %v1833_v6  ;;  %v113_v26 = vrot.slane %v2181_v24, %v112_v23  ;;  %v117_v28 = vrot.slane %v2181_v24, %v116_v25  ;;  %v1856_v46 = vld [vmem:[%s2424_s1 + $0xb0] ss:$12 sps:$4 sm:$0xff]   ;;  %v341_v47 = vand.u32 127, %v110_v21  ;;  %v339_v48 = vadd.s32 8, %v2175_v22  ;;  %s2010_s1 = smov 96  }
  0x31   :  { %259 = vmatprep.subr.bf16.mxu0 %v1834_v7  ;;  %vm416_vm9 = vcmask 130048   ;;  %v1863_v56 = vld [vmem:[%s2426_s3 + $0x30] sm:$0xff]  }
  0x32   :  { %1717 = vmatpush3.bf16.msra.mxu1 %v1850_v40  ;;  %v343_v49 = vsub.s32 %v339_v48, %v341_v47  ;;  %v342_v50 = vsub.s32 %v2175_v22, %v341_v47 }
  0x33   :  { %1718 = vmatprep.subr.bf16.mxu1 %v2008_v20 }
  0x34   :  { %260 = vmatpush1.bf16.msra.mxu0 %v1836_v8  ;;  %vm345_vm2 = vcmp.eq.s32.totalorder %v343_v49, 0  ;;  %vm347_vm3 = vcmp.eq.s32.totalorder %v343_v49, 8  ;;  %vm344_vm4 = vcmp.eq.s32.totalorder %v342_v50, 0  ;;  %vm350_vm5 = vcmp.eq.s32.totalorder %v342_v50, 4294967288 }
  0x35   :  { %261 = vmatprep.subr.bf16.mxu0 %v1837_v9  ;;  %vm349_vm6 = vmor %vm345_vm2, %vm347_vm3  ;;  %vm351_vm7 = vcmp.eq.s32.totalorder %v343_v49, 4294967288 }
  0x36   :  { %1719 = vmatpush3.bf16.msra.mxu1 %v1851_v41  ;;  %vm2237_vm8 = vmor %vm344_vm4, %vm350_vm5 }
  0x37   :  { %1720 = vmatprep.subr.bf16.mxu1 %v2008_v20  ;;  %vm2241_vm10 = vmor %vm349_vm6, %vm351_vm7 }
  0x38   :  { %262 = vmatpush1.bf16.msra.mxu0 %v1839_v10  ;;  %v120_v10 = vsub.s32 2, %v2175_v22 }
  0x39   :  { %263 = vmatprep.subr.bf16.mxu0 %v1840_v11 }
  0x3a   :  { %1721 = vmatpush3.bf16.msra.mxu1 %v1852_v42 }
  0x3b   :  { %1722 = vmatprep.subr.bf16.mxu1 %v2008_v20 }
  0x3c   :  { %264 = vmatpush1.bf16.msra.mxu0 %v1842_v12 }
  0x3d   :  { %265 = vmatprep.subr.bf16.mxu0 %v1843_v13  ;;  %v121_v13 = vrot.slane %v2181_v24, %v120_v10 }
  0x3e   :  { %1723 = vmatpush3.bf16.msra.mxu1 %v1853_v43 }
  0x3f   :  { %1724 = vmatprep.subr.bf16.mxu1 %v2008_v20 }
  0x40   :  { %266 = vmatpush1.bf16.msra.mxu0 %v1845_v14 }
  0x41   :  { %267 = vmatprep.subr.bf16.mxu0 %v1846_v15 }
  0x42   :  { %1725 = vmatpush3.bf16.msra.mxu1 %v1854_v44 }
  0x43   :  { %1726 = vmatprep.subr.bf16.mxu1 %v2008_v20 }
  0x44   :  { %268 = vmatpush1.bf16.msra.mxu0 %v1848_v16 }
  0x45   :  { %1734 = vmatprep.subr.bf16.mxu0 %v2008_v20 }
  0x46   :  { %1727 = vmatpush3.bf16.msra.mxu1 %v1855_v45 }
  0x47   :  { %286 = vmatmul.mubr.bf16.vlgmr.msra.gmra.mrb[0].mxu0 %v107_v19  ;;  %1728 = vmatprep.subr.bf16.mxu1 %v2008_v20 }
  0x48   :  { %1736 = vmatprep.mubr.msk.bf16.mxu0 %vm2009_vm0, %v2008_v20 }
  0x4a   :  { %1729 = vmatpush3.bf16.msra.mxu1 %v1856_v46 }
  0x4b   :  { %1740 = vmatprep.subr.bf16.mxu1 %v2008_v20 }
  0x4d   :  { %1731 = vmatmul.mubr.bf16.vlgmr.msra.gmra.mrb[0].mxu1 %v107_v19 }
  0x4e   :  { %1742 = vmatprep.mubr.msk.bf16.mxu1 %vm2009_vm0, %v2008_v20 }
 0x11a   :  { %v287_v27 = vpop.f32.mrb[0].mxu0 }
 0x11b   :  { %v289_v29 = vpop.f32.mrb[1].mxu0  ;;  %v288_v31 = vadd.f32 %v287_v27, %v113_v26 }
 0x11c   :  { %v291_v30 = vpop.f32.mrb[2].mxu0  ;;  %v290_v34 = vadd.f32 %v289_v29, %v117_v28 }
 0x11d   :  { %v292_v32 = vadd.f32 %v291_v30, %v113_v26  ;;  %v293_v33 = vpop.f32.mrb[3].mxu0  ;;  %v1857_v26 = vld [vmem:[%s2426_s3] sm:$0xff]  }
 0x11e   :  { %v294_v35 = vadd.f32 %v293_v33, %v117_v28 }
 0x11f   :  { %v2190_v36 = vpack.c.bf16 %v292_v32, %v288_v31 }
 0x120   :  { %v2192_v37 = vpack.c.bf16 %v294_v35, %v290_v34  ;;  %v330_v11 = vpop.f32.mrb[0].mxu1 }
 0x121   :  { %v1732_v12 = vpop.f32.mrb[1].mxu1  ;;  %v331_v16 = vadd.f32 %v330_v11, %v121_v13 }
 0x122   :  { %v369_v38 = vsel %vm364_vm1, %v2192_v37, 0  ;;  %v333_v14 = vpop.f32.mrb[2].mxu1 }
 0x123   :  { %1735 = vmatpush3.bf16.xpose.msra.mxu0 %v369_v38  ;;  %v1733_v15 = vpop.f32.mrb[3].mxu1  ;;  %v334_v19 = vadd.f32 %v333_v14, %v121_v13  ;;  %v1858_v38 = vld [vmem:[%s2426_s3 + $0x8] sm:$0xff]  }
 0x124   :  { %1746 = vmatprep.subr.bf16.mxu0 %v2008_v20 }
 0x125   :  { %v2259_v21 = vpack.c.bf16 %v334_v19, %v331_v16 }
 0x127   :  { %1741 = vmatpush3.bf16.msra.mxu1 %v2259_v21 }
 0x128   :  { %1754 = vmatprep.subr.bf16.mxu1 %v2008_v20 }
 0x12a   :  { %1737 = vmatmul.mubr.msk.bf16.vlgmr.msra.gmra.mrb[4].mxu0 %vm364_vm1, %v2190_v36 }
 0x12b   :  { %1750 = vmatprep.mubr.msk.bf16.mxu0 %vm2009_vm0, %v2008_v20  ;;  %1747 = vmatpush3.bf16.msra.mxu0 %v1857_v26 }
 0x12c   :  { %1748 = vmatprep.subr.bf16.mxu0 %v2008_v20 }
 0x12f   :  { %1749 = vmatpush3.bf16.msra.mxu0 %v1858_v38 }
 0x130   :  { %1760 = vmatprep.subr.bf16.mxu0 %v2008_v20 }
 0x1fd   :  { %v405_v51 = vpop.f32.mrb[4].mxu0 }
 0x1fe   :  { %v412_v53 = vmul.f32 0.17677669, %v405_v51  ;;  %v1738_v54 = vpop.f32.mrb[5].mxu0 }
 0x1ff   :  { %v408_v55 = vpop.f32.mrb[6].mxu0 }
 0x200   :  { %v413_v57 = vmul.f32 0.17677669, %v408_v55  ;;  %v1739_v58 = vpop.f32.mrb[7].mxu0  ;;  %v414_v59 = vsel %vm2237_vm8, %v412_v53, -1e+30 }
 0x201   :  { %v417_v60 = vsel %vm416_vm9, %v414_v59, -inf }
 0x202   :  { %418 = vmax.xlane.f32.xlu0 %v417_v60  ;;  %v415_v61 = vsel %vm2241_vm10, %v413_v57, -1e+30 }
 0x203   :  { %v420_v62 = vsel %vm416_vm9, %v415_v61, -inf }
 0x206   :  { %421 = vmax.xlane.f32.xlu0 %v420_v62 }
 0x21c   :  { %551 = vrot.lane.b32.xlu0 %v2192_v37, %s2010_s1 }
 0x28f   :  { %v419_v63 = vpop.xlane.xlu0 %418 }
 0x290   :  { %v423_v1 = vsub.f32 %v414_v59, %v419_v63 }
 0x292   :  { %v425_v2 = vmul.f32 1.442695, %v423_v1 }
 0x293   :  { %v422_v3 = vpop.xlane.xlu0 %421 }
 0x294   :  { %1905 = vpow2.f32 %v425_v2  ;;  %v424_v4 = vsub.f32 %v415_v61, %v422_v3  ;;  %v1859_v3 = vld [vmem:[%s2426_s3 + $0x10] sm:$0xff]  }
 0x296   :  { %v427_v5 = vmul.f32 1.442695, %v424_v4 }
 0x297   :  { %v552_v32 = vpop.permute.xlu0 %551 }
 0x298   :  { %1907 = vpow2.f32 %v427_v5  ;;  %v557_v34 = vsel %vm364_vm1, %v552_v32, 0 }
 0x29e   :  { %v1906_v6 = vpop.eup %1905 }
 0x29f   :  { %v429_v7 = vsel %vm416_vm9, %v1906_v6, 0.0 }
 0x2a0   :  { %430 = vadd.xlane.f32.xlu1 %v429_v7 }
 0x2a2   :  { %v1908_v8 = vpop.eup %1907 }
 0x2a3   :  { %v432_v9 = vsel %vm416_vm9, %v1908_v8, 0.0 }
 0x2a4   :  { %433 = vadd.xlane.f32.xlu1 %v432_v9 }
 0x2b5   :  { %548 = vrot.lane.b32.xlu1 %v2190_v36, %s2010_s1 }
 0x32d   :  { %v431_v24 = vpop.xlane.xlu1 %430 }
 0x32e   :  { %1909 = vrcp.f32 %v431_v24  ;;  %v1860_v24 = vld [vmem:[%s2426_s3 + $0x18] sm:$0xff]  }
 0x331   :  { %v434_v27 = vpop.xlane.xlu1 %433 }
 0x332   :  { %1911 = vrcp.f32 %v434_v27 }
 0x335   :  { %v549_v35 = vpop.permute.xlu1 %548 }
 0x338   :  { %v1910_v28 = vpop.eup %1909 }
 0x339   :  { %v436_v30 = vmul.f32 %v1910_v28, %v1906_v6 }
 0x33c   :  { %v1912_v29 = vpop.eup %1911 }
 0x33d   :  { %v438_v31 = vmul.f32 %v1912_v29, %v1908_v8 }
 0x33f   :  { %v439_v33 = vpack.c.bf16 %v438_v31, %v436_v30 }
 0x341   :  { %1743 = vmatmul.mubr.msk.bf16.vlgmr.msra.gmra.mrb[4].mxu1 %vm416_vm9, %v439_v33 }
 0x342   :  { %1755 = vmatpush3.bf16.xpose.msra.mxu1 %v557_v34  ;;  %1756 = vmatprep.mubr.msk.bf16.mxu1 %vm2009_vm0, %v2008_v20 }
 0x343   :  { %1766 = vmatprep.subr.bf16.mxu1 %v2008_v20 }
 0x349   :  { %1757 = vmatmul.mubr.msk.bf16.vlgmr.msra.gmra.mrb[8].mxu1 %vm364_vm1, %v549_v35 }
 0x34a   :  { %1770 = vmatprep.mubr.msk.bf16.mxu1 %vm2009_vm0, %v2008_v20  ;;  %1767 = vmatpush3.bf16.msra.mxu1 %v1859_v3 }
 0x34b   :  { %1768 = vmatprep.subr.bf16.mxu1 %v2008_v20 }
 0x34e   :  { %1769 = vmatpush3.bf16.msra.mxu1 %v1860_v24 }
 0x34f   :  { %1780 = vmatprep.subr.bf16.mxu1 %v2008_v20 }
 0x414   :  { %v477_v39 = vpop.f32.mrb[4].mxu1 }
 0x415   :  { %v1744_v40 = vpop.f32.mrb[5].mxu1 }
 0x416   :  { %v480_v41 = vpop.f32.mrb[6].mxu1 }
 0x417   :  { %v488_v42 = vpack.c.bf16 %v480_v41, %v477_v39  ;;  %v1745_v43 = vpop.f32.mrb[7].mxu1 }
 0x419   :  { %1751 = vmatmul.mubr.msk.bf16.vlgmr.msra.gmra.mrb[8].mxu0 %vm364_vm1, %v488_v42 }
 0x41a   :  { %1762 = vmatprep.mubr.msk.bf16.mxu0 %vm2009_vm0, %v2008_v20 }
 0x41c   :  { %v593_v44 = vpop.f32.mrb[8].mxu1 }
 0x41d   :  { %v600_v45 = vmul.f32 0.17677669, %v593_v44  ;;  %v1758_v46 = vpop.f32.mrb[9].mxu1 }
 0x41e   :  { %v596_v47 = vpop.f32.mrb[10].mxu1 }
 0x41f   :  { %v601_v48 = vmul.f32 0.17677669, %v596_v47  ;;  %v1759_v49 = vpop.f32.mrb[11].mxu1  ;;  %v602_v50 = vsel %vm2237_vm8, %v600_v45, -1e+30 }
 0x420   :  { %v604_v51 = vsel %vm416_vm9, %v602_v50, -inf }
 0x421   :  { %605 = vmax.xlane.f32.xlu1 %v604_v51  ;;  %v603_v53 = vsel %vm2241_vm10, %v601_v48, -1e+30 }
 0x422   :  { %v607_v54 = vsel %vm416_vm9, %v603_v53, -inf }
 0x423   :  { %608 = vmax.xlane.f32.xlu0 %v607_v54 }
 0x4ae   :  { %v606_v55 = vpop.xlane.xlu1 %605 }
 0x4af   :  { %v610_v57 = vsub.f32 %v602_v50, %v606_v55 }
 0x4b0   :  { %v609_v58 = vpop.xlane.xlu0 %608 }
 0x4b1   :  { %v612_v59 = vmul.f32 1.442695, %v610_v57  ;;  %v611_v60 = vsub.f32 %v603_v53, %v609_v58  ;;  %v1861_v57 = vld [vmem:[%s2426_s3 + $0x20] sm:$0xff]  }
 0x4b3   :  { %1913 = vpow2.f32 %v612_v59  ;;  %v614_v61 = vmul.f32 1.442695, %v611_v60 }
 0x4b5   :  { %1915 = vpow2.f32 %v614_v61 }
 0x4bd   :  { %v1914_v62 = vpop.eup %1913 }
 0x4be   :  { %v616_v63 = vsel %vm416_vm9, %v1914_v62, 0.0 }
 0x4bf   :  { %v1916_v1 = vpop.eup %1915  ;;  %617 = vadd.xlane.f32.xlu0 %v616_v63 }
 0x4c0   :  { %v619_v2 = vsel %vm416_vm9, %v1916_v1, 0.0 }
 0x4c1   :  { %620 = vadd.xlane.f32.xlu1 %v619_v2 }
 0x4d2   :  { %740 = vrot.lane.b32.xlu1 %v2192_v37, %s2005_s7 }
 0x4d5   :  { %628 = vrot.lane.b32.xlu0 %v2259_v21, %s2010_s1 }
 0x4d6   :  { %738 = vrot.lane.b32.xlu1 %v2190_v36, %s2005_s7 }
 0x4ec   :  { %v2300_v4 = vpop.f32.mrb[8].mxu0 }
 0x4ed   :  { %v1752_v5 = vpop.f32.mrb[9].mxu0 }
 0x4ee   :  { %v2302_v6 = vpop.f32.mrb[10].mxu0 }
 0x4ef   :  { %v1753_v7 = vpop.f32.mrb[11].mxu0 }
 0x54c   :  { %v618_v8 = vpop.xlane.xlu0 %617 }
 0x54d   :  { %1917 = vrcp.f32 %v618_v8 }
 0x54e   :  { %v621_v9 = vpop.xlane.xlu1 %620 }
 0x54f   :  { %1919 = vrcp.f32 %v621_v9 }
 0x550   :  { %v629_v10 = vpop.permute.xlu0 %628 }
 0x551   :  { %1761 = vmatpush3.bf16.msra.mxu0 %v629_v10 }
 0x552   :  { %1774 = vmatprep.subr.bf16.mxu0 %v2008_v20  ;;  %v741_v15 = vpop.permute.xlu1 %740 }
 0x553   :  { %v746_v19 = vsel %vm364_vm1, %v741_v15, 0 }
 0x556   :  { %v739_v26 = vpop.permute.xlu1 %738 }
 0x557   :  { %v1918_v11 = vpop.eup %1917 }
 0x558   :  { %v623_v13 = vmul.f32 %v1918_v11, %v1914_v62 }
 0x559   :  { %v1920_v12 = vpop.eup %1919 }
 0x55a   :  { %v625_v14 = vmul.f32 %v1920_v12, %v1916_v1  ;;  %v1862_v12 = vld [vmem:[%s2426_s3 + $0x28] sm:$0xff]  }
 0x55c   :  { %v626_v16 = vpack.c.bf16 %v625_v14, %v623_v13 }
 0x55e   :  { %1763 = vmatmul.mubr.msk.bf16.vlgmr.msra.gmra.mrb[12].mxu0 %vm416_vm9, %v626_v16 }
 0x55f   :  { %1775 = vmatpush3.bf16.xpose.msra.mxu0 %v746_v19  ;;  %1776 = vmatprep.mubr.msk.bf16.mxu0 %vm2009_vm0, %v2008_v20 }
 0x560   :  { %1786 = vmatprep.subr.bf16.mxu0 %v2008_v20 }
 0x566   :  { %1777 = vmatmul.mubr.msk.bf16.vlgmr.msra.gmra.mrb[16].mxu0 %vm364_vm1, %v739_v26 }
 0x567   :  { %1790 = vmatprep.mubr.msk.bf16.mxu0 %vm2009_vm0, %v2008_v20  ;;  %1787 = vmatpush3.bf16.msra.mxu0 %v1861_v57 }
 0x568   :  { %1788 = vmatprep.subr.bf16.mxu0 %v2008_v20 }
 0x56b   :  { %1789 = vmatpush3.bf16.msra.mxu0 %v1862_v12 }
 0x56c   :  { %1800 = vmatprep.subr.bf16.mxu0 %v2008_v20 }
 0x631   :  { %v668_v27 = vpop.f32.mrb[12].mxu0 }
 0x632   :  { %v1764_v28 = vpop.f32.mrb[13].mxu0 }
 0x633   :  { %v671_v29 = vpop.f32.mrb[14].mxu0 }
 0x634   :  { %v679_v30 = vpack.c.bf16 %v671_v29, %v668_v27  ;;  %v1765_v31 = vpop.f32.mrb[15].mxu0 }
 0x636   :  { %1771 = vmatmul.mubr.msk.bf16.vlgmr.msra.gmra.mrb[12].mxu1 %vm364_vm1, %v679_v30 }
 0x637   :  { %1782 = vmatprep.mubr.msk.bf16.mxu1 %vm2009_vm0, %v2008_v20 }
 0x639   :  { %v782_v32 = vpop.f32.mrb[16].mxu0 }
 0x63a   :  { %v789_v33 = vmul.f32 0.17677669, %v782_v32  ;;  %v1778_v34 = vpop.f32.mrb[17].mxu0 }
 0x63b   :  { %v785_v35 = vpop.f32.mrb[18].mxu0 }
 0x63c   :  { %v790_v38 = vmul.f32 0.17677669, %v785_v35  ;;  %v1779_v39 = vpop.f32.mrb[19].mxu0  ;;  %v791_v40 = vsel %vm2237_vm8, %v789_v33, -1e+30 }
 0x63d   :  { %v793_v41 = vsel %vm416_vm9, %v791_v40, -inf }
 0x63e   :  { %794 = vmax.xlane.f32.xlu1 %v793_v41  ;;  %v792_v42 = vsel %vm2241_vm10, %v790_v38, -1e+30 }
 0x63f   :  { %v796_v43 = vsel %vm416_vm9, %v792_v42, -inf }
 0x640   :  { %797 = vmax.xlane.f32.xlu0 %v796_v43 }
 0x64f   :  { %816 = vrot.lane.b32.xlu1 %v2259_v21, %s2005_s7 }
 0x653   :  { %926 = vrot.lane.b32.xlu1 %v2190_v36, %s2011_s22  ;;  %v1597_v36 = vld [vmem:[%s2427_s4] ss:$0 sm:$0xff] }
 0x654   :  { %v545_v58 = vadd.f32 %v1597_v36, %v2300_v4  ;;  %v546_v60 = vadd.f32 %v1597_v36, %v2302_v6 }
 0x6cb   :  { %v795_v44 = vpop.xlane.xlu1 %794 }
 0x6cc   :  { %v799_v45 = vsub.f32 %v791_v40, %v795_v44 }
 0x6cd   :  { %v798_v46 = vpop.xlane.xlu0 %797 }
 0x6ce   :  { %v801_v47 = vmul.f32 1.442695, %v799_v45  ;;  %v800_v48 = vsub.f32 %v792_v42, %v798_v46 }
 0x6cf   :  { %v817_v49 = vpop.permute.xlu1 %816 }
 0x6d0   :  { %1921 = vpow2.f32 %v801_v47  ;;  %v803_v50 = vmul.f32 1.442695, %v800_v48  ;;  %1781 = vmatpush3.bf16.msra.mxu1 %v817_v49 }
 0x6d1   :  { %1794 = vmatprep.subr.bf16.mxu1 %v2008_v20 }
 0x6d2   :  { %1923 = vpow2.f32 %v803_v50 }
 0x6d3   :  { %v927_v6 = vpop.permute.xlu1 %926 }
 0x6da   :  { %v1922_v51 = vpop.eup %1921 }
 0x6db   :  { %v805_v53 = vsel %vm416_vm9, %v1922_v51, 0.0 }
 0x6dc   :  { %v1924_v54 = vpop.eup %1923  ;;  %806 = vadd.xlane.f32.xlu0 %v805_v53 }
 0x6dd   :  { %v808_v55 = vsel %vm416_vm9, %v1924_v54, 0.0 }
 0x6e0   :  { %809 = vadd.xlane.f32.xlu0 %v808_v55 }
 0x6f6   :  { %928 = vrot.lane.b32.xlu0 %v2192_v37, %s2011_s22 }
 0x709   :  { %v729_v59 = vpop.f32.mrb[12].mxu1 }
 0x70a   :  { %v2344_v61 = vadd.f32 %v729_v59, %v545_v58  ;;  %v1772_v62 = vpop.f32.mrb[13].mxu1 }
 0x70b   :  { %v732_v37 = vpop.f32.mrb[14].mxu1 }
 0x70c   :  { %v2346_v63 = vadd.f32 %v732_v37, %v546_v60  ;;  %v1773_v1 = vpop.f32.mrb[15].mxu1 }
 0x769   :  { %v807_v2 = vpop.xlane.xlu0 %806 }
 0x76a   :  { %1925 = vrcp.f32 %v807_v2 }
 0x76d   :  { %v810_v3 = vpop.xlane.xlu0 %809 }
 0x76e   :  { %1927 = vrcp.f32 %v810_v3 }
 0x771   :  { %v929_v9 = vpop.permute.xlu0 %928 }
 0x772   :  { %v934_v11 = vsel %vm364_vm1, %v929_v9, 0  ;;  %v1865_v9 = vld [vmem:[#allocation2] ss:$8 sps:$4 sm:$0xff]  }
 0x774   :  { %v1926_v5 = vpop.eup %1925 }
 0x775   :  { %v812_v8 = vmul.f32 %v1926_v5, %v1922_v51 }
 0x778   :  { %v1928_v7 = vpop.eup %1927 }
 0x779   :  { %v814_v4 = vmul.f32 %v1928_v7, %v1924_v54 }
 0x77b   :  { %v815_v10 = vpack.c.bf16 %v814_v4, %v812_v8 }
 0x77d   :  { %1783 = vmatmul.mubr.msk.bf16.vlgmr.msra.gmra.mrb[16].mxu1 %vm416_vm9, %v815_v10  ;;  %v1867_v10 = vld [vmem:[#allocation2 + $0x4] ss:$8 sps:$4 sm:$0xff]  }
 0x77e   :  { %1795 = vmatpush3.bf16.xpose.msra.mxu1 %v934_v11  ;;  %1796 = vmatprep.mubr.msk.bf16.mxu1 %vm2009_vm0, %v2008_v20  ;;  %v1870_v11 = vld [vmem:[#allocation2 + $0x14] ss:$8 sps:$4 sm:$0xff]  }
 0x77f   :  { %1806 = vmatprep.subr.bf16.mxu1 %v2008_v20 }
 0x785   :  { %1797 = vmatmul.mubr.msk.bf16.vlgmr.msra.gmra.mrb[20].mxu1 %vm364_vm1, %v927_v6  ;;  %v1868_v6 = vld [vmem:[#allocation2 + $0x10] ss:$8 sps:$4 sm:$0xff]  }
 0x786   :  { %1810 = vmatprep.mubr.msk.bf16.mxu1 %vm2009_vm0, %v2008_v20  ;;  %1807 = vmatpush3.bf16.msra.mxu1 %v1863_v56  ;;  %v1618_v56 = vld [vmem:[%s2428_s5] ss:$0 sm:$0xff] }
 0x787   :  { %1808 = vmatprep.subr.bf16.mxu1 %v2008_v20 }
 0x850   :  { %v856_v13 = vpop.f32.mrb[16].mxu1 }
 0x851   :  { %v1784_v14 = vpop.f32.mrb[17].mxu1 }
 0x852   :  { %v859_v15 = vpop.f32.mrb[18].mxu1 }
 0x853   :  { %v867_v16 = vpack.c.bf16 %v859_v15, %v856_v13  ;;  %v1785_v19 = vpop.f32.mrb[19].mxu1 }
 0x855   :  { %1791 = vmatmul.mubr.msk.bf16.vlgmr.msra.gmra.mrb[20].mxu0 %vm364_vm1, %v867_v16 }
 0x856   :  { %1802 = vmatprep.mubr.msk.bf16.mxu0 %vm2009_vm0, %v2008_v20  ;;  %v1864_v20 = vld [vmem:[%s2426_s3 + $0x38] sm:$0xff]  }
 0x857   :  { %1809 = vmatpush3.bf16.msra.mxu1 %v1864_v20  ;;  %v1895_v20 = vld [vmem:[#allocation4 + $0x58] sm:$0xff]  }
 0x858   :  { %v970_v26 = vpop.f32.mrb[20].mxu1 }
 0x859   :  { %v977_v24 = vmul.f32 0.17677669, %v970_v26  ;;  %v1798_v27 = vpop.f32.mrb[21].mxu1 }
 0x85a   :  { %v973_v28 = vpop.f32.mrb[22].mxu1  ;;  %v1876_v27 = vld [vmem:[#allocation2 + $0x34] ss:$8 sps:$4 sm:$0xff]  }
 0x85b   :  { %v978_v29 = vmul.f32 0.17677669, %v973_v28  ;;  %v1799_v30 = vpop.f32.mrb[23].mxu1  ;;  %v979_v31 = vsel %vm2237_vm8, %v977_v24, -1e+30 }
 0x85c   :  { %v981_v32 = vsel %vm416_vm9, %v979_v31, -inf  ;;  %v1871_v24 = vld [vmem:[#allocation2 + $0x20] ss:$8 sps:$4 sm:$0xff]   ;;  %v1874_v28 = vld [vmem:[#allocation2 + $0x30] ss:$8 sps:$4 sm:$0xff]  }
 0x85d   :  { %982 = vmax.xlane.f32.xlu1 %v981_v32  ;;  %v980_v33 = vsel %vm2241_vm10, %v978_v29, -1e+30  ;;  %v1879_v29 = vld [vmem:[#allocation2 + $0x44] ss:$8 sps:$4 sm:$0xff]   ;;  %v1877_v30 = vld [vmem:[#allocation2 + $0x40] ss:$8 sps:$4 sm:$0xff]  }
 0x85e   :  { %v984_v34 = vsel %vm416_vm9, %v980_v33, -inf  ;;  %v1880_v32 = vld [vmem:[#allocation2 + $0x50] ss:$8 sps:$4 sm:$0xff]  }
 0x85f   :  { %985 = vmax.xlane.f32.xlu0 %v984_v34  ;;  %v1883_v34 = vld [vmem:[#allocation2 + $0x60] ss:$8 sps:$4 sm:$0xff]  }
 0x8ea   :  { %v983_v35 = vpop.xlane.xlu1 %982 }
 0x8eb   :  { %v987_v38 = vsub.f32 %v979_v31, %v983_v35  ;;  %v1882_v31 = vld [vmem:[#allocation2 + $0x54] ss:$8 sps:$4 sm:$0xff]  }
 0x8ec   :  { %v986_v39 = vpop.xlane.xlu0 %985  ;;  %v1888_v35 = vld [vmem:[#allocation2 + $0x74] ss:$8 sps:$4 sm:$0xff]  }
 0x8ed   :  { %v989_v40 = vmul.f32 1.442695, %v987_v38  ;;  %v988_v41 = vsub.f32 %v980_v33, %v986_v39  ;;  %v1885_v33 = vld [vmem:[#allocation2 + $0x64] ss:$8 sps:$4 sm:$0xff]   ;;  %v1886_v38 = vld [vmem:[#allocation2 + $0x70] ss:$8 sps:$4 sm:$0xff]  }
 0x8ef   :  { %1929 = vpow2.f32 %v989_v40  ;;  %v991_v42 = vmul.f32 1.442695, %v988_v41 }
 0x8f1   :  { %1931 = vpow2.f32 %v991_v42 }
 0x8f9   :  { %v1930_v43 = vpop.eup %1929 }
 0x8fa   :  { %v993_v52 = vsel %vm416_vm9, %v1930_v43, 0.0 }
 0x8fb   :  { %v1932_v44 = vpop.eup %1931  ;;  %994 = vadd.xlane.f32.xlu0 %v993_v52 }
 0x8fc   :  { %v996_v45 = vsel %vm416_vm9, %v1932_v44, 0.0 }
 0x8fd   :  { %997 = vadd.xlane.f32.xlu1 %v996_v45 }
 0x911   :  { %1004 = vrot.lane.b32.xlu0 %v2259_v21, %s2011_s22 }
 0x928   :  { %v917_v46 = vpop.f32.mrb[20].mxu0 }
 0x929   :  { %v924_v47 = vadd.f32 %v917_v46, %v2344_v61  ;;  %v1792_v48 = vpop.f32.mrb[21].mxu0 }
 0x92a   :  { %v920_v49 = vpop.f32.mrb[22].mxu0 }
 0x92b   :  { %v925_v50 = vadd.f32 %v920_v49, %v2346_v63  ;;  %v1793_v51 = vpop.f32.mrb[23].mxu0  ;;  %v1619_v49 = vld [vmem:[%s2429_s6] ss:$0 sm:$0xff] }
 0x988   :  { %v995_v53 = vpop.xlane.xlu0 %994 }
 0x989   :  { %1933 = vrcp.f32 %v995_v53 }
 0x98a   :  { %v998_v54 = vpop.xlane.xlu1 %997 }
 0x98b   :  { %1935 = vrcp.f32 %v998_v54 }
 0x98c   :  { %v1005_v21 = vpop.permute.xlu0 %1004 }
 0x98d   :  { %1801 = vmatpush3.bf16.msra.mxu0 %v1005_v21  ;;  %v1889_v21 = vld [vmem:[#allocation4 + $0x40] sm:$0xff]  }
 0x98e   :  { %1266 = vmatprep.subr.bf16.mxu0 %v1867_v10  ;;  %1692 = vmatprep.subr.bf16.mxu1 %v1889_v21 }
 0x993   :  { %v1934_v55 = vpop.eup %1933 }
 0x994   :  { %v1000_v57 = vmul.f32 %v1934_v55, %v1930_v43  ;;  %v1890_v55 = vld [vmem:[#allocation4] sm:$0xff]  }
 0x995   :  { %v1936_v36 = vpop.eup %1935 }
 0x996   :  { %v1002_v58 = vmul.f32 %v1936_v36, %v1932_v44  ;;  %v1891_v36 = vld [vmem:[#allocation4 + $0x48] sm:$0xff]  }
 0x998   :  { %v1003_v59 = vpack.c.bf16 %v1002_v58, %v1000_v57  ;;  %v1892_v57 = vld [vmem:[#allocation4 + $0x8] sm:$0xff]   ;;  %v1893_v58 = vld [vmem:[#allocation4 + $0x50] sm:$0xff]  }
 0x99a   :  { %1803 = vmatmul.mubr.msk.bf16.vlgmr.msra.gmra.mrb[24].mxu0 %vm416_vm9, %v1003_v59  ;;  %v1894_v59 = vld [vmem:[#allocation4 + $0x10] sm:$0xff]  }
 0x99b   :  { %1298 = vmatprep.mubr.bf16.mxu0 %v2007_v0  ;;  %1267 = vmatpush1.bf16.msra.mxu0 %v1865_v9 }
 0x99c   :  { %1268 = vmatprep.subr.bf16.mxu0 %v1870_v11 }
 0x99f   :  { %1269 = vmatpush1.bf16.msra.mxu0 %v1868_v6 }
 0xa6d   :  { %v1044_v60 = vpop.f32.mrb[24].mxu0 }
 0xa6e   :  { %v1804_v61 = vpop.f32.mrb[25].mxu0 }
 0xa6f   :  { %v1047_v62 = vpop.f32.mrb[26].mxu0  ;;  %v1897_v61 = vld [vmem:[#allocation4 + $0x60] sm:$0xff]  }
 0xa70   :  { %v1055_v37 = vpack.c.bf16 %v1047_v62, %v1044_v60  ;;  %v1805_v63 = vpop.f32.mrb[27].mxu0  ;;  %v1896_v60 = vld [vmem:[#allocation4 + $0x18] sm:$0xff]   ;;  %v1898_v62 = vld [vmem:[#allocation4 + $0x20] sm:$0xff]  }
 0xa71   :  { %v1900_v63 = vld [vmem:[#allocation4 + $0x28] sm:$0xff]  }
 0xa72   :  { %1811 = vmatmul.mubr.msk.bf16.vlgmr.msra.gmra.mrb[24].mxu1 %vm364_vm1, %v1055_v37  ;;  %v1899_v37 = vld [vmem:[#allocation4 + $0x68] sm:$0xff]  }
 0xa73   :  { %1693 = vmatpush3.bf16.msra.mxu1 %v1890_v55 }
 0xa74   :  { %1694 = vmatprep.subr.bf16.mxu1 %v1891_v36 }
 0xa77   :  { %1695 = vmatpush3.bf16.msra.mxu1 %v1892_v57 }
 0xa78   :  { %1696 = vmatprep.subr.bf16.mxu1 %v1893_v58  ;;  %v1636_v58 = vld [vmem:[%s2433_s10] ss:$0 sm:$0xff] }
 0xa7b   :  { %1697 = vmatpush3.bf16.msra.mxu1 %v1894_v59 }
 0xa7c   :  { %1698 = vmatprep.subr.bf16.mxu1 %v1895_v20 }
 0xa7f   :  { %1699 = vmatpush3.bf16.msra.mxu1 %v1896_v60 }
 0xa80   :  { %1700 = vmatprep.subr.bf16.mxu1 %v1897_v61 }
 0xa83   :  { %1701 = vmatpush3.bf16.msra.mxu1 %v1898_v62 }
 0xa84   :  { %1702 = vmatprep.subr.bf16.mxu1 %v1899_v37 }
 0xa87   :  { %1703 = vmatpush3.bf16.msra.mxu1 %v1900_v63 }
 0xb45   :  { %v1105_v1 = vpop.f32.mrb[24].mxu1 }
 0xb46   :  { %v1112_v2 = vadd.f32 %v1105_v1, %v924_v47  ;;  %v1812_v3 = vpop.f32.mrb[25].mxu1  ;;  %v1901_v1 = vld [vmem:[#allocation4 + $0x70] sm:$0xff]  }
 0xb47   :  { %v1108_v5 = vpop.f32.mrb[26].mxu1  ;;  %1704 = vmatprep.subr.bf16.mxu1 %v1901_v1  ;;  %v1903_v3 = vld [vmem:[#allocation4 + $0x78] sm:$0xff]  }
 0xb48   :  { %v1113_v7 = vadd.f32 %v1108_v5, %v925_v50  ;;  %v1813_v8 = vpop.f32.mrb[27].mxu1  ;;  %v1114_v0 = vadd.f32 %v1112_v2, %v2160_v17  ;;  %v1902_v2 = vld [vmem:[#allocation4 + $0x30] sm:$0xff]   ;;  %v1904_v5 = vld [vmem:[#allocation4 + $0x38] sm:$0xff]  }
 0xb49   :  { %1705 = vmatpush3.bf16.msra.mxu1 %v1902_v2 }
 0xb4a   :  { %1118 = vadd.xlane.f32.xlu1 %v1114_v0  ;;  %v1115_v4 = vadd.f32 %v1113_v7, %v2165_v18  ;;  %v1873_v18 = vld [vmem:[#allocation2 + $0x24] ss:$8 sps:$4 sm:$0xff]   ;;  %1706 = vmatprep.subr.bf16.mxu1 %v1903_v3  ;;  %v1174_v7 = vld [vmem:[%s2431_s8] sm:$0x3] }
 0xb4b   :  { %1270 = vmatprep.subr.bf16.mxu0 %v1873_v18  ;;  %v1179_v8 = vrot.slane %v1174_v7, %v112_v23 }
 0xb4c   :  { %1271 = vmatpush1.bf16.msra.mxu0 %v1871_v24 }
 0xb4d   :  { %1272 = vmatprep.subr.bf16.mxu0 %v1876_v27  ;;  %1707 = vmatpush3.bf16.msra.mxu1 %v1904_v5 }
 0xb4e   :  { %1120 = vadd.xlane.f32.xlu1 %v1115_v4 }
 0xb50   :  { %1273 = vmatpush1.bf16.msra.mxu0 %v1874_v28 }
 0xb51   :  { %1274 = vmatprep.subr.bf16.mxu0 %v1879_v29 }
 0xb54   :  { %1275 = vmatpush1.bf16.msra.mxu0 %v1877_v30 }
 0xb55   :  { %1276 = vmatprep.subr.bf16.mxu0 %v1882_v31 }
 0xb58   :  { %1277 = vmatpush1.bf16.msra.mxu0 %v1880_v32 }
 0xb59   :  { %1278 = vmatprep.subr.bf16.mxu0 %v1885_v33 }
 0xb5c   :  { %1279 = vmatpush1.bf16.msra.mxu0 %v1883_v34 }
 0xb5d   :  { %1280 = vmatprep.subr.bf16.mxu0 %v1888_v35 }
 0xb60   :  { %1281 = vmatpush1.bf16.msra.mxu0 %v1886_v38 }
 0xbd7   :  { %v1119_v12 = vpop.xlane.xlu1 %1118 }
 0xbd8   :  { %v1123_v13 = vmul.f32 0.0078125, %v1119_v12 }
 0xbda   :  { %v1125_v14 = vsub.f32 %v1114_v0, %v1123_v13  ;;  %v1183_v0 = vrot.slane %v1174_v7, %v116_v25 }
 0xbdb   :  { %v1121_v15 = vpop.xlane.xlu1 %1120 }
 0xbdc   :  { %v1124_v16 = vmul.f32 0.0078125, %v1121_v15  ;;  %v1127_v19 = vmul.f32 %v1125_v14, %v1125_v14 }
 0xbde   :  { %v1126_v26 = vsub.f32 %v1115_v4, %v1124_v16  ;;  %1129 = vadd.xlane.f32.xlu1 %v1127_v19 }
 0xbe0   :  { %v1128_v17 = vmul.f32 %v1126_v26, %v1126_v26 }
 0xbe2   :  { %1131 = vadd.xlane.f32.xlu1 %v1128_v17 }
 0xc6b   :  { %v1130_v39 = vpop.xlane.xlu1 %1129 }
 0xc6c   :  { %v1133_v40 = vmul.f32 0.0078125, %v1130_v39 }
 0xc6e   :  { %v1135_v41 = vadd.f32 1e-05, %v1133_v40 }
 0xc6f   :  { %v1132_v42 = vpop.xlane.xlu1 %1131 }
 0xc70   :  { %1937 = vrsqrt.f32 %v1135_v41  ;;  %v1134_v43 = vmul.f32 0.0078125, %v1132_v42 }
 0xc72   :  { %v1136_v52 = vadd.f32 1e-05, %v1134_v43 }
 0xc74   :  { %1939 = vrsqrt.f32 %v1136_v52 }
 0xc7a   :  { %v1938_v44 = vpop.eup %1937 }
 0xc7b   :  { %v1139_v45 = vmul.f32 %v1938_v44, %v1125_v14 }
 0xc7d   :  { %v1147_v48 = vmul.f32 %v1618_v56, %v1139_v45 }
 0xc7e   :  { %v1940_v46 = vpop.eup %1939 }
 0xc7f   :  { %v1140_v47 = vmul.f32 %v1940_v46, %v1126_v26  ;;  %v2393_v51 = vadd.f32 %v1619_v49, %v1147_v48 }
 0xc81   :  { %v1148_v50 = vmul.f32 %v1618_v56, %v1140_v47 }
 0xc83   :  { %v2395_v53 = vadd.f32 %v1619_v49, %v1148_v50 }
 0xc85   :  { %v1173_v54 = vpack.c.bf16 %v2395_v53, %v2393_v51 }
 0xc87   :  { %1299 = vmatmul.mubr.bf16.vlgmr.msra.gmra.mrb[28].mxu0 %v1173_v54 }
 0xd5a   :  { %v1300_v4 = vpop.f32.mrb[28].mxu0 }
 0xd5b   :  { %v1301_v9 = vadd.f32 %v1300_v4, %v1179_v8  ;;  %v1302_v10 = vpop.f32.mrb[29].mxu0 }
 0xd5c   :  { %v1303_v11 = vadd.f32 %v1302_v10, %v1183_v0  ;;  %v1304_v6 = vpop.f32.mrb[30].mxu0 }
 0xd5d   :  { %v1313_v12 = vmul.f32 0.044715, %v1301_v9  ;;  %v1305_v13 = vadd.f32 %v1304_v6, %v1179_v8  ;;  %v1306_v14 = vpop.f32.mrb[31].mxu0  ;;  %v1309_v44 = vmul.f32 0.5, %v1301_v9 }
 0xd5e   :  { %v1314_v15 = vmul.f32 0.044715, %v1303_v11  ;;  %v1307_v16 = vadd.f32 %v1306_v14, %v1183_v0  ;;  %v1310_v46 = vmul.f32 0.5, %v1303_v11 }
 0xd5f   :  { %v1317_v19 = vmul.f32 %v1313_v12, %v1301_v9  ;;  %v1315_v26 = vmul.f32 0.044715, %v1305_v13  ;;  %v1311_v45 = vmul.f32 0.5, %v1305_v13 }
 0xd60   :  { %v1318_v17 = vmul.f32 %v1314_v15, %v1303_v11  ;;  %v1316_v18 = vmul.f32 0.044715, %v1307_v16  ;;  %v1312_v47 = vmul.f32 0.5, %v1307_v16  ;;  %v1653_v15 = vld [vmem:[%s2434_s11] ss:$0 sm:$0xff] }
 0xd61   :  { %v1321_v24 = vmul.f32 %v1317_v19, %v1301_v9  ;;  %v1319_v27 = vmul.f32 %v1315_v26, %v1305_v13  ;;  %v1654_v19 = vld [vmem:[%s2435_s12] ss:$0 sm:$0xff] }
 0xd62   :  { %v1322_v23 = vmul.f32 %v1318_v17, %v1303_v11  ;;  %v1320_v28 = vmul.f32 %v1316_v18, %v1307_v16 }
 0xd63   :  { %v1325_v22 = vadd.f32 %v1321_v24, %v1301_v9  ;;  %v1323_v25 = vmul.f32 %v1319_v27, %v1305_v13 }
 0xd64   :  { %v1324_v29 = vmul.f32 %v1320_v28, %v1307_v16  ;;  %v1326_v30 = vadd.f32 %v1322_v23, %v1303_v11 }
 0xd65   :  { %v1329_v31 = vmul.f32 0.7978846, %v1325_v22  ;;  %v1327_v32 = vadd.f32 %v1323_v25, %v1305_v13 }
 0xd66   :  { %v1328_v33 = vadd.f32 %v1324_v29, %v1307_v16  ;;  %v1330_v34 = vmul.f32 0.7978846, %v1326_v30 }
 0xd67   :  { %1941 = vtanh.f32 %v1329_v31  ;;  %v1331_v35 = vmul.f32 0.7978846, %v1327_v32 }
 0xd68   :  { %v1332_v38 = vmul.f32 0.7978846, %v1328_v33  ;;  %1943 = vtanh.f32 %v1330_v34 }
 0xd69   :  { %1945 = vtanh.f32 %v1331_v35 }
 0xd6a   :  { %1947 = vtanh.f32 %v1332_v38 }
 0xd71   :  { %v1942_v39 = vpop.eup %1941 }
 0xd72   :  { %v1944_v40 = vpop.eup %1943  ;;  %v1337_v41 = vadd.f32 1.0, %v1942_v39 }
 0xd73   :  { %v1946_v42 = vpop.eup %1945  ;;  %v1338_v43 = vadd.f32 1.0, %v1944_v40 }
 0xd74   :  { %v1948_v52 = vpop.eup %1947  ;;  %v1339_v56 = vadd.f32 1.0, %v1946_v42  ;;  %v1341_v49 = vmul.f32 %v1337_v41, %v1309_v44 }
 0xd75   :  { %v1340_v48 = vadd.f32 1.0, %v1948_v52  ;;  %v1342_v54 = vmul.f32 %v1338_v43, %v1310_v46 }
 0xd76   :  { %v1343_v50 = vmul.f32 %v1339_v56, %v1311_v45 }
 0xd77   :  { %v1344_v21 = vmul.f32 %v1340_v48, %v1312_v47 }
 0xd78   :  { %v1377_v55 = vpack.c.bf16 %v1343_v50, %v1341_v49 }
 0xd79   :  { %v1378_v36 = vpack.c.bf16 %v1344_v21, %v1342_v54 }
 0xd7b   :  { %1514 = vmatprep.mubr.bf16.mxu1 %v1378_v36 }
 0xd7c   :  { %1515 = vmatmul.mubr.bf16.vlgmr.msra.gmra.mrb[28].mxu1 %v1377_v55 }
 0xe4f   :  { %v1708_v57 = vpop.f32.mrb[28].mxu1 }
 0xe50   :  { %v1709_v59 = vpop.f32.mrb[29].mxu1 }
 0xe51   :  { %v1710_v20 = vadd.f32 %v1709_v59, %v1708_v57  ;;  %v1711_v60 = vpop.f32.mrb[30].mxu1 }
 0xe52   :  { %v1712_v61 = vpop.f32.mrb[31].mxu1 }
 0xe53   :  { %v1517_v62 = vadd.f32 %v1710_v20, %v1636_v58  ;;  %v1713_v37 = vadd.f32 %v1712_v61, %v1711_v60 }
 0xe55   :  { %v1520_v63 = vadd.f32 %v1713_v37, %v1636_v58  ;;  %v1523_v1 = vadd.f32 %v1517_v62, %v2393_v51 }
 0xe57   :  { %1527 = vadd.xlane.f32.xlu1 %v1523_v1  ;;  %v1524_v2 = vadd.f32 %v1520_v63, %v2395_v53 }
 0xe5b   :  { %1529 = vadd.xlane.f32.xlu1 %v1524_v2 }
 0xee4   :  { %v1528_v3 = vpop.xlane.xlu1 %1527 }
 0xee5   :  { %v1531_v5 = vmul.f32 0.0078125, %v1528_v3 }
 0xee7   :  { %v1533_v7 = vsub.f32 %v1523_v1, %v1531_v5 }
 0xee8   :  { %v1530_v8 = vpop.xlane.xlu1 %1529 }
 0xee9   :  { %v1532_v0 = vmul.f32 0.0078125, %v1530_v8  ;;  %v1535_v4 = vmul.f32 %v1533_v7, %v1533_v7 }
 0xeeb   :  { %v1534_v9 = vsub.f32 %v1524_v2, %v1532_v0  ;;  %1537 = vadd.xlane.f32.xlu0 %v1535_v4 }
 0xeed   :  { %v1536_v10 = vmul.f32 %v1534_v9, %v1534_v9 }
 0xeef   :  { %1539 = vadd.xlane.f32.xlu1 %v1536_v10 }
 0xf78   :  { %v1538_v11 = vpop.xlane.xlu0 %1537 }
 0xf79   :  { %v1541_v6 = vmul.f32 0.0078125, %v1538_v11 }
 0xf7b   :  { %v1543_v12 = vadd.f32 1e-05, %v1541_v6 }
 0xf7c   :  { %v1540_v13 = vpop.xlane.xlu1 %1539 }
 0xf7d   :  { %1949 = vrsqrt.f32 %v1543_v12  ;;  %v1542_v51 = vmul.f32 0.0078125, %v1540_v13 }
 0xf7f   :  { %v1544_v14 = vadd.f32 1e-05, %v1542_v51 }
 0xf81   :  { %1951 = vrsqrt.f32 %v1544_v14 }
 0xf87   :  { %v1950_v53 = vpop.eup %1949 }
 0xf88   :  { %v1547_v16 = vmul.f32 %v1950_v53, %v1533_v7 }
 0xf8a   :  { %v1555_v26 = vmul.f32 %v1653_v15, %v1547_v16 }
 0xf8b   :  { %v1952_v17 = vpop.eup %1951 }
 0xf8c   :  { %v1563_v18 = vadd.f32 %v1654_v19, %v1555_v26  ;;  %v1548_v24 = vmul.f32 %v1952_v17, %v1534_v9 }
 0xf8e   :  { %1565 = vst [vmem:[%s2436_s13] sm:$0xff] %v1563_v18  ;;  %v1556_v27 = vmul.f32 %v1653_v15, %v1548_v24 }
 0xf90   :  { %v1564_v23 = vadd.f32 %v1654_v19, %v1556_v27 }
 0xf92   :  { %1566 = vst [vmem:[%s2436_s13 + $0x8] sm:$0xff] %v1564_v23 }
 0xf93   :  { %1571 = vsyncpa [#allocation3], 1 }
 0xf94   :  { %1572 = vsyncpa [#allocation5], 1 }

// kernel: maxv1_forward.7
= control target key start
LH: loop header
LB: loop body
LE: loop exit
PB: predicated region body
PF: predicated region fallthrough
CT: control target
= control target key end

     0   :  { %s3738_s0 = inlined_call_operand.vmem [shape: f32[2,128], index: 0, kind: input, shape index: {}]   ;;  %s3739_s1 = inlined_call_operand.vmem [shape: f32[2,128], index: 1, kind: input, shape index: {}]   ;;  %s3740_s2 = inlined_call_operand.vmem [shape: f32[2,128], index: 2, kind: input, shape index: {}]   ;;  %s3741_s3 = inlined_call_operand.vmem [shape: f32[128,128], index: 3, kind: input, shape index: {}]   ;;  %s3742_s4 = inlined_call_operand.vmem [shape: bf16[128,128], index: 4, kind: input, shape index: {}]   ;;  %s3743_s5 = inlined_call_operand.hbm [shape: f32[1,128], index: 5, kind: input, shape index: {}]   ;;  %s3744_s6 = inlined_call_operand.vmem [shape: bf16[128,256], index: 6, kind: input, shape index: {}]   ;;  %s3745_s7 = inlined_call_operand.vmem [shape: f32[1,256], index: 7, kind: input, shape index: {}]   ;;  %s3746_s8 = inlined_call_operand.vmem [shape: bf16[128,128], index: 8, kind: input, shape index: {}]   ;;  %s3747_s9 = inlined_call_operand.hbm [shape: f32[1,128], index: 9, kind: input, shape index: {}]   ;;  %s3748_s10 = inlined_call_operand.vmem [shape: bf16[128,256], index: 10, kind: input, shape index: {}]   ;;  %s3749_s11 = inlined_call_operand.vmem [shape: bf16[128,256], index: 11, kind: input, shape index: {}]   ;;  %s3750_s12 = inlined_call_operand.vmem [shape: bf16[128,256], index: 12, kind: input, shape index: {}]   ;;  %s3751_s13 = inlined_call_operand.vmem [shape: f32[1,256], index: 13, kind: input, shape index: {}]   ;;  %s3752_s14 = inlined_call_operand.vmem [shape: bf16[256,256], index: 14, kind: input, shape index: {}]   ;;  %s3753_s15 = inlined_call_operand.vmem [shape: f32[1,256], index: 15, kind: input, shape index: {}]   ;;  %s3754_s16 = inlined_call_operand.hbm [shape: f32[2,256], index: 16, kind: output, shape index: {0}]   ;;  %s3755_s17 = inlined_call_operand.hbm [shape: f32[2,128], index: 17, kind: output, shape index: {1}]  }
   0x1   :  { %3757 = sst [smem:[#allocation14_spill]] %s3738_s0 }
   0x2   :  { %3758 = sst [smem:[#allocation15_spill]] %s3739_s1 }
   0x3   :  { %23 = vsyncpa [#allocation3], 0 }
   0x4   :  { %24 = vsyncpa [#allocation6], 0 }
   0x5   :  { %25 = vsyncpa [#allocation4], 0 }
   0x6   :  { %26 = vsyncpa [#allocation9], 0  ;;  %s2796_s24 = smov [#allocation2]   ;;  %s2797_s26 = smov [#allocation5]  }
   0x7   :  { %s43_s25 = sshll.u32 %s2796_s24, 4  ;;  %s59_s27 = sshll.u32 %s2797_s26, 4  ;;  %s44_s25 = int_to_ptr.vmem [resolvable:$true] %s43_s25  ;;  %s60_s27 = int_to_ptr.vmem [resolvable:$true] %s59_s27 }
   0x8   :  { %s2700_s0 = scalar_lea.hbm %s3743_s5, 16 }
   0x9   :  { %p2701_p0 = scmp.ne.s32.totalorder %s3743_s5, %s2700_s0  ;;  %p2704_p1 = scmp.lt.u32.totalorder %s2700_s0, %s3743_s5 }
   0xb   :  { %p2706_p2 = pnand %p2704_p1, %p2701_p0 }
   0xd   :  { %2709 = shalt.err (!%p2706_p2)
}
   0xe   :  { %s2710_s20 = scalar_lea.vmem %s44_s25, 16  ;;  %s2714_s21 = scalar_lea.vmem %s44_s25, 32 }
   0xf   :  { %p2711_p3 = scmp.ne.s32.totalorder %s44_s25, %s2710_s20  ;;  %p2715_p4 = scmp.lt.s32.totalorder %s44_s25, %s44_s25 }
  0x10   :  { %p2716_p5 = scmp.lt.s32.totalorder %s2714_s21, %s2710_s20 }
  0x12   :  { %p2717_p6 = por %p2716_p5, %p2715_p4 }
  0x14   :  { %p2718_p7 = pnand %p2717_p6, %p2711_p3 }
  0x16   :  { %2721 = shalt.err (!%p2718_p7)
}
  0x17   :  { %46 = dma.hbm_to_vmem [thread:$0]  %s3743_s5, 16, %s44_s25, [#allocation3]  }
  0x18   :  { %s2722_s28 = scalar_lea.hbm %s3747_s9, 16 }
  0x19   :  { %p2723_p8 = scmp.ne.s32.totalorder %s3747_s9, %s2722_s28  ;;  %p2726_p9 = scmp.lt.u32.totalorder %s2722_s28, %s3747_s9 }
  0x1b   :  { %p2728_p10 = pnand %p2726_p9, %p2723_p8 }
  0x1d   :  { %2731 = shalt.err (!%p2728_p10)
}
  0x1e   :  { %s2732_s19 = scalar_lea.vmem %s60_s27, 16  ;;  %s2736_s1 = scalar_lea.vmem %s60_s27, 32 }
  0x1f   :  { %p2733_p11 = scmp.ne.s32.totalorder %s60_s27, %s2732_s19  ;;  %p2737_p12 = scmp.lt.s32.totalorder %s60_s27, %s60_s27 }
  0x20   :  { %p2738_p13 = scmp.lt.s32.totalorder %s2736_s1, %s2732_s19 }
  0x22   :  { %p2739_p0 = por %p2738_p13, %p2737_p12 }
  0x24   :  { %p2740_p1 = pnand %p2739_p0, %p2733_p11 }
  0x26   :  { %2743 = shalt.err (!%p2740_p1)
}
  0x27   :  { %62 = dma.hbm_to_vmem [thread:$0]  %s3747_s9, 16, %s60_s27, [#allocation6]  }
  0x28   :  { %2788 = dma.done.wait [#allocation3], 16  }
  0x29   :  { %2789 = vsyncadd [#allocation3], 4294967280 }
  0x2a   :  { %2790 = dma.done.wait [#allocation6], 16  }
  0x2b   :  { %2791 = vsyncadd [#allocation6], 4294967280  ;;  %v2798_v0 = vmov 0   ;;  %v2799_v1 = vmov 0.0   ;;  %vm2800_vm0 = vmmov 0   ;;  %v2543_v12 = vld [vmem:[%s3742_s4] sm:$0xff]   ;;  %v237_v52 = vlaneseq }
  0x2c   :  { %359 = vmatprep.mubr.bf16.mxu0 %v2798_v0  ;;  %2297 = vmatprep.subr.bf16.mxu1 %v2799_v1  ;;  %v2519_v2 = vld [vmem:[%s3744_s6 + $0x4] ss:$8 sps:$4 sm:$0xff]   ;;  %v2521_v3 = vld [vmem:[%s3744_s6] ss:$8 sps:$4 sm:$0xff]   ;;  %v2522_v4 = vld [vmem:[%s3744_s6 + $0x14] ss:$8 sps:$4 sm:$0xff]  }
  0x2d   :  { %2313 = vmatprep.mubr.msk.bf16.mxu1 %vm2800_vm0, %v2799_v1  ;;  %327 = vmatprep.subr.bf16.mxu0 %v2519_v2  ;;  %v2524_v5 = vld [vmem:[%s3744_s6 + $0x10] ss:$8 sps:$4 sm:$0xff]   ;;  %v2525_v6 = vld [vmem:[%s3744_s6 + $0x24] ss:$8 sps:$4 sm:$0xff]   ;;  %v2527_v7 = vld [vmem:[%s3744_s6 + $0x20] ss:$8 sps:$4 sm:$0xff]  }
  0x2e   :  { %328 = vmatpush1.bf16.msra.mxu0 %v2521_v3  ;;  %v2528_v8 = vld [vmem:[%s3744_s6 + $0x34] ss:$8 sps:$4 sm:$0xff]   ;;  %v2530_v9 = vld [vmem:[%s3744_s6 + $0x30] ss:$8 sps:$4 sm:$0xff]   ;;  %v2531_v10 = vld [vmem:[%s3744_s6 + $0x44] ss:$8 sps:$4 sm:$0xff]   ;;  %2298 = vmatpush3.bf16.msra.mxu1 %v2543_v12 }
  0x2f   :  { %329 = vmatprep.subr.bf16.mxu0 %v2522_v4  ;;  %v2533_v11 = vld [vmem:[%s3744_s6 + $0x40] ss:$8 sps:$4 sm:$0xff]   ;;  %v2534_v13 = vld [vmem:[%s3744_s6 + $0x54] ss:$8 sps:$4 sm:$0xff]   ;;  %2299 = vmatprep.subr.bf16.mxu1 %v2799_v1  ;;  %v2536_v15 = vld [vmem:[%s3744_s6 + $0x50] ss:$8 sps:$4 sm:$0xff]  }
  0x30   :  { %v2544_v14 = vld [vmem:[%s3742_s4 + $0x8] sm:$0xff]   ;;  %v2545_v17 = vld [vmem:[%s3742_s4 + $0x10] sm:$0xff]   ;;  %v2546_v20 = vld [vmem:[%s3742_s4 + $0x18] sm:$0xff]   ;;  %s3759_s24 = sld [smem:[#allocation14_spill]]  ;;  %v238_v53 = vshrl.u32 %v237_v52, 7  ;;  %vm467_vm1 = vcmask 261120  }
  0x31   :  { %v2537_v16 = vld [vmem:[%s3744_s6 + $0x64] ss:$8 sps:$4 sm:$0xff]   ;;  %v2539_v18 = vld [vmem:[%s3744_s6 + $0x60] ss:$8 sps:$4 sm:$0xff]   ;;  %v2540_v19 = vld [vmem:[%s3744_s6 + $0x74] ss:$8 sps:$4 sm:$0xff]  }
  0x32   :  { %330 = vmatpush1.bf16.msra.mxu0 %v2524_v5  ;;  %2300 = vmatpush3.bf16.msra.mxu1 %v2544_v14  ;;  %v2542_v21 = vld [vmem:[%s3744_s6 + $0x70] ss:$8 sps:$4 sm:$0xff]   ;;  %v195_v22 = vld [vmem:[%s3741_s3] sm:$0xff]  ;;  %v196_v23 = vld [vmem:[%s3741_s3 + $0x8] sm:$0xff]  ;;  %v3068_v54 = vsub.s32 0, %v238_v53  ;;  %v3073_v56 = vsub.s32 1, %v238_v53 }
  0x33   :  { %331 = vmatprep.subr.bf16.mxu0 %v2525_v6  ;;  %2301 = vmatprep.subr.bf16.mxu1 %v2799_v1  ;;  %v2547_v24 = vld [vmem:[%s3742_s4 + $0x20] sm:$0xff]   ;;  %v227_v25 = vpack.c.bf16 %v196_v23, %v195_v22  ;;  %v2548_v26 = vld [vmem:[%s3742_s4 + $0x28] sm:$0xff]   ;;  %v197_v27 = vld [vmem:[%s3741_s3 + $0x10] sm:$0xff]  ;;  %vm537_vm3 = vcmask 1041408   ;;  %s2802_s25 = smov 64   ;;  %s2803_s27 = smov 32  }
  0x34   :  { %v198_v28 = vld [vmem:[%s3741_s3 + $0x18] sm:$0xff]  ;;  %v2549_v29 = vld [vmem:[%s3742_s4 + $0x30] sm:$0xff]   ;;  %v199_v33 = vld [vmem:[%s3741_s3 + $0x20] sm:$0xff]  ;;  %s3760_s6 = sld [smem:[#allocation15_spill]] }
  0x35   :  { %v228_v30 = vpack.c.bf16 %v198_v28, %v197_v27  ;;  %v2550_v31 = vld [vmem:[%s3742_s4 + $0x38] sm:$0xff]   ;;  %v200_v34 = vld [vmem:[%s3741_s3 + $0x28] sm:$0xff]  ;;  %v201_v37 = vld [vmem:[%s3741_s3 + $0x30] sm:$0xff] }
  0x36   :  { %332 = vmatpush1.bf16.msra.mxu0 %v2527_v7  ;;  %2302 = vmatpush3.bf16.msra.mxu1 %v2545_v17  ;;  %v82_v32 = vld [vmem:[%s3759_s24] sm:$0x3]  ;;  %v229_v36 = vpack.c.bf16 %v200_v34, %v199_v33  ;;  %v202_v38 = vld [vmem:[%s3741_s3 + $0x38] sm:$0xff]  ;;  %v204_v41 = vld [vmem:[%s3741_s3 + $0x48] sm:$0xff] }
  0x37   :  { %333 = vmatprep.subr.bf16.mxu0 %v2528_v8  ;;  %2303 = vmatprep.subr.bf16.mxu1 %v2799_v1  ;;  %v99_v35 = vpack.c.bf16 %v82_v32, %v82_v32  ;;  %v230_v39 = vpack.c.bf16 %v202_v38, %v201_v37  ;;  %v203_v40 = vld [vmem:[%s3741_s3 + $0x40] sm:$0xff]  ;;  %v205_v43 = vld [vmem:[%s3741_s3 + $0x50] sm:$0xff]  ;;  %v206_v44 = vld [vmem:[%s3741_s3 + $0x58] sm:$0xff] }
  0x38   :  { %v231_v42 = vpack.c.bf16 %v204_v41, %v203_v40  ;;  %v232_v45 = vpack.c.bf16 %v206_v44, %v205_v43  ;;  %v207_v46 = vld [vmem:[%s3741_s3 + $0x60] sm:$0xff]  ;;  %v208_v47 = vld [vmem:[%s3741_s3 + $0x68] sm:$0xff]  ;;  %v209_v49 = vld [vmem:[%s3741_s3 + $0x70] sm:$0xff] }
  0x39   :  { %v233_v48 = vpack.c.bf16 %v208_v47, %v207_v46  ;;  %v210_v50 = vld [vmem:[%s3741_s3 + $0x78] sm:$0xff]  ;;  %v235_v55 = vld [vmem:[%s3745_s7] sm:$0x3]  ;;  %s2801_s3 = smov 96  }
  0x3a   :  { %334 = vmatpush1.bf16.msra.mxu0 %v2530_v9  ;;  %2304 = vmatpush3.bf16.msra.mxu1 %v2546_v20  ;;  %v234_v51 = vpack.c.bf16 %v210_v50, %v209_v49  ;;  %v3076_v57 = vrot.slane %v235_v55, %v3068_v54  ;;  %v3079_v59 = vrot.slane %v235_v55, %v3073_v56 }
  0x3b   :  { %335 = vmatprep.subr.bf16.mxu0 %v2531_v10  ;;  %2305 = vmatprep.subr.bf16.mxu1 %v2799_v1 }
  0x3e   :  { %336 = vmatpush1.bf16.msra.mxu0 %v2533_v11  ;;  %2306 = vmatpush3.bf16.msra.mxu1 %v2547_v24 }
  0x3f   :  { %337 = vmatprep.subr.bf16.mxu0 %v2534_v13  ;;  %2307 = vmatprep.subr.bf16.mxu1 %v2799_v1 }
  0x42   :  { %338 = vmatpush1.bf16.msra.mxu0 %v2536_v15  ;;  %2308 = vmatpush3.bf16.msra.mxu1 %v2548_v26 }
  0x43   :  { %339 = vmatprep.subr.bf16.mxu0 %v2537_v16  ;;  %2309 = vmatprep.subr.bf16.mxu1 %v2799_v1 }
  0x46   :  { %340 = vmatpush1.bf16.msra.mxu0 %v2539_v18  ;;  %2310 = vmatpush3.bf16.msra.mxu1 %v2549_v29 }
  0x47   :  { %341 = vmatprep.subr.bf16.mxu0 %v2540_v19  ;;  %2311 = vmatprep.subr.bf16.mxu1 %v2799_v1 }
  0x4a   :  { %342 = vmatpush1.bf16.msra.mxu0 %v2542_v21  ;;  %2312 = vmatpush3.bf16.msra.mxu1 %v2550_v31 }
  0x4b   :  { %2317 = vmatprep.subr.bf16.mxu0 %v2799_v1  ;;  %2337 = vmatprep.subr.bf16.mxu1 %v2799_v1 }
  0x4d   :  { %360 = vmatmul.mubr.bf16.vlgmr.msra.gmra.mrb[0].mxu0 %v227_v25  ;;  %2314 = vmatmul.mubr.bf16.vlgmr.msra.gmra.mrb[0].mxu1 %v99_v35 }
  0x4e   :  { %369 = vmatprep.mubr.bf16.mxu0 %v2798_v0  ;;  %2353 = vmatprep.mubr.msk.bf16.mxu1 %vm2800_vm0, %v2799_v1 }
  0x55   :  { %370 = vmatmul.mubr.bf16.gmra.mrb[4].mxu0 %v228_v30 }
  0x56   :  { %379 = vmatprep.mubr.bf16.mxu0 %v2798_v0 }
  0x5d   :  { %380 = vmatmul.mubr.bf16.gmra.mrb[8].mxu0 %v229_v36 }
  0x5e   :  { %389 = vmatprep.mubr.bf16.mxu0 %v2798_v0 }
  0x65   :  { %390 = vmatmul.mubr.bf16.gmra.mrb[12].mxu0 %v230_v39 }
  0x66   :  { %399 = vmatprep.mubr.bf16.mxu0 %v2798_v0 }
  0x6d   :  { %400 = vmatmul.mubr.bf16.gmra.mrb[16].mxu0 %v231_v42 }
  0x6e   :  { %409 = vmatprep.mubr.bf16.mxu0 %v2798_v0 }
  0x75   :  { %410 = vmatmul.mubr.bf16.gmra.mrb[20].mxu0 %v232_v45 }
  0x76   :  { %419 = vmatprep.mubr.bf16.mxu0 %v2798_v0 }
  0x7d   :  { %420 = vmatmul.mubr.bf16.gmra.mrb[24].mxu0 %v233_v48 }
  0x7e   :  { %429 = vmatprep.mubr.bf16.mxu0 %v2798_v0 }
  0x85   :  { %430 = vmatmul.mubr.bf16.gmra.mrb[28].mxu0 %v234_v51 }
  0x86   :  { %2333 = vmatprep.mubr.msk.bf16.mxu0 %vm2800_vm0, %v2799_v1 }
 0x120   :  { %v361_v58 = vpop.f32.mrb[0].mxu0  ;;  %v3102_v17 = vpop.f32.mrb[0].mxu1 }
 0x121   :  { %v363_v60 = vpop.f32.mrb[1].mxu0  ;;  %v362_v62 = vadd.f32 %v361_v58, %v3076_v57  ;;  %v2315_v19 = vpop.f32.mrb[1].mxu1 }
 0x122   :  { %v365_v61 = vpop.f32.mrb[2].mxu0  ;;  %v364_v3 = vadd.f32 %v363_v60, %v3079_v59  ;;  %v192_v21 = vpop.f32.mrb[2].mxu1 }
 0x123   :  { %v366_v63 = vadd.f32 %v365_v61, %v3076_v57  ;;  %v367_v2 = vpop.f32.mrb[3].mxu0  ;;  %v2316_v23 = vpop.f32.mrb[3].mxu1 }
 0x124   :  { %v368_v4 = vadd.f32 %v367_v2, %v3079_v59 }
 0x125   :  { %v3085_v5 = vpack.c.bf16 %v366_v63, %v362_v62 }
 0x126   :  { %v3087_v6 = vpack.c.bf16 %v368_v4, %v364_v3 }
 0x127   :  { %662 = vrot.lane.b32.xlu1 %v3085_v5, %s2801_s3  ;;  %v472_v7 = vsel %vm467_vm1, %v3085_v5, 0 }
 0x128   :  { %v371_v8 = vpop.f32.mrb[4].mxu0  ;;  %2318 = vmatpush3.bf16.xpose.msra.mxu0 %v472_v7  ;;  %2338 = vmatpush3.bf16.msra.mxu1 %v3087_v6 }
 0x129   :  { %v373_v9 = vpop.f32.mrb[5].mxu0  ;;  %2319 = vmatprep.subr.bf16.mxu0 %v2799_v1  ;;  %2339 = vmatprep.subr.bf16.mxu1 %v2799_v1  ;;  %v372_v11 = vadd.f32 %v371_v8, %v3076_v57 }
 0x12a   :  { %v375_v10 = vpop.f32.mrb[6].mxu0  ;;  %v374_v14 = vadd.f32 %v373_v9, %v3079_v59 }
 0x12b   :  { %v376_v12 = vadd.f32 %v375_v10, %v3076_v57  ;;  %v377_v13 = vpop.f32.mrb[7].mxu0 }
 0x12c   :  { %v378_v15 = vadd.f32 %v377_v13, %v3079_v59 }
 0x12d   :  { %v3100_v16 = vpack.c.bf16 %v376_v12, %v372_v11 }
 0x12e   :  { %v3104_v18 = vpack.c.bf16 %v378_v15, %v374_v14 }
 0x12f   :  { %664 = vrot.lane.b32.xlu1 %v3100_v16, %s2801_s3  ;;  %v475_v20 = vsel %vm467_vm1, %v3100_v16, 0 }
 0x130   :  { %v381_v22 = vpop.f32.mrb[8].mxu0  ;;  %2320 = vmatpush3.bf16.xpose.msra.mxu0 %v475_v20  ;;  %2340 = vmatpush3.bf16.msra.mxu1 %v3104_v18 }
 0x131   :  { %v383_v24 = vpop.f32.mrb[9].mxu0  ;;  %2321 = vmatprep.subr.bf16.mxu0 %v2799_v1  ;;  %2341 = vmatprep.subr.bf16.mxu1 %v2799_v1  ;;  %v382_v26 = vadd.f32 %v381_v22, %v3076_v57 }
 0x132   :  { %v385_v25 = vpop.f32.mrb[10].mxu0  ;;  %v384_v29 = vadd.f32 %v383_v24, %v3079_v59 }
 0x133   :  { %v386_v27 = vadd.f32 %v385_v25, %v3076_v57  ;;  %v387_v28 = vpop.f32.mrb[11].mxu0 }
 0x134   :  { %v388_v30 = vadd.f32 %v387_v28, %v3079_v59 }
 0x135   :  { %v3117_v31 = vpack.c.bf16 %v386_v27, %v382_v26  ;;  %v2081_v27 = vld [vmem:[#allocation2] ss:$0 sm:$0xff] }
 0x136   :  { %v3119_v32 = vpack.c.bf16 %v388_v30, %v384_v29 }
 0x137   :  { %v478_v33 = vsel %vm467_vm1, %v3117_v31, 0 }
 0x138   :  { %v391_v34 = vpop.f32.mrb[12].mxu0  ;;  %2322 = vmatpush3.bf16.xpose.msra.mxu0 %v478_v33  ;;  %2342 = vmatpush3.bf16.msra.mxu1 %v3119_v32 }
 0x139   :  { %v393_v35 = vpop.f32.mrb[13].mxu0  ;;  %2323 = vmatprep.subr.bf16.mxu0 %v2799_v1  ;;  %2343 = vmatprep.subr.bf16.mxu1 %v2799_v1  ;;  %v392_v37 = vadd.f32 %v391_v34, %v3076_v57 }
 0x13a   :  { %v395_v36 = vpop.f32.mrb[14].mxu0  ;;  %v394_v40 = vadd.f32 %v393_v35, %v3079_v59  ;;  %v190_v35 = vadd.f32 %v2081_v27, %v3102_v17 }
 0x13b   :  { %v396_v38 = vadd.f32 %v395_v36, %v3076_v57  ;;  %v397_v39 = vpop.f32.mrb[15].mxu0 }
 0x13c   :  { %v398_v41 = vadd.f32 %v397_v39, %v3079_v59 }
 0x13d   :  { %v3130_v42 = vpack.c.bf16 %v396_v38, %v392_v37 }
 0x13e   :  { %v3132_v43 = vpack.c.bf16 %v398_v41, %v394_v40  ;;  %v3195_v40 = vpack.c.bf16 %v190_v35, %v190_v35 }
 0x13f   :  { %668 = vrot.lane.b32.xlu1 %v3130_v42, %s2801_s3  ;;  %v481_v44 = vsel %vm467_vm1, %v3130_v42, 0 }
 0x140   :  { %v401_v45 = vpop.f32.mrb[16].mxu0  ;;  %2324 = vmatpush3.bf16.xpose.msra.mxu0 %v481_v44  ;;  %2344 = vmatpush3.bf16.msra.mxu1 %v3132_v43 }
 0x141   :  { %v403_v46 = vpop.f32.mrb[17].mxu0  ;;  %2325 = vmatprep.subr.bf16.mxu0 %v2799_v1  ;;  %2345 = vmatprep.subr.bf16.mxu1 %v2799_v1  ;;  %v402_v48 = vadd.f32 %v401_v45, %v3076_v57 }
 0x142   :  { %v405_v47 = vpop.f32.mrb[18].mxu0  ;;  %v404_v51 = vadd.f32 %v403_v46, %v3079_v59 }
 0x143   :  { %v406_v49 = vadd.f32 %v405_v47, %v3076_v57  ;;  %v407_v50 = vpop.f32.mrb[19].mxu0 }
 0x144   :  { %v408_v53 = vadd.f32 %v407_v50, %v3079_v59 }
 0x145   :  { %v3145_v55 = vpack.c.bf16 %v406_v49, %v402_v48 }
 0x146   :  { %v3147_v58 = vpack.c.bf16 %v408_v53, %v404_v51 }
 0x147   :  { %670 = vrot.lane.b32.xlu1 %v3145_v55, %s2801_s3  ;;  %v484_v60 = vsel %vm467_vm1, %v3145_v55, 0 }
 0x148   :  { %v411_v61 = vpop.f32.mrb[20].mxu0  ;;  %2326 = vmatpush3.bf16.xpose.msra.mxu0 %v484_v60  ;;  %2346 = vmatpush3.bf16.msra.mxu1 %v3147_v58  ;;  %v2551_v60 = vld [vmem:[%s3746_s8] sm:$0xff]  }
 0x149   :  { %v413_v62 = vpop.f32.mrb[21].mxu0  ;;  %2327 = vmatprep.subr.bf16.mxu0 %v2799_v1  ;;  %2347 = vmatprep.subr.bf16.mxu1 %v2799_v1  ;;  %v412_v2 = vadd.f32 %v411_v61, %v3076_v57  ;;  %v2552_v61 = vld [vmem:[%s3746_s8 + $0x8] sm:$0xff]  }
 0x14a   :  { %v415_v63 = vpop.f32.mrb[22].mxu0  ;;  %v414_v7 = vadd.f32 %v413_v62, %v3079_v59 }
 0x14b   :  { %v416_v3 = vadd.f32 %v415_v63, %v3076_v57  ;;  %v417_v4 = vpop.f32.mrb[23].mxu0 }
 0x14c   :  { %v418_v8 = vadd.f32 %v417_v4, %v3079_v59 }
 0x14d   :  { %v3160_v9 = vpack.c.bf16 %v416_v3, %v412_v2 }
 0x14e   :  { %v3162_v10 = vpack.c.bf16 %v418_v8, %v414_v7 }
 0x14f   :  { %672 = vrot.lane.b32.xlu1 %v3160_v9, %s2801_s3  ;;  %v487_v11 = vsel %vm467_vm1, %v3160_v9, 0 }
 0x150   :  { %v421_v12 = vpop.f32.mrb[24].mxu0  ;;  %2328 = vmatpush3.bf16.xpose.msra.mxu0 %v487_v11  ;;  %2348 = vmatpush3.bf16.msra.mxu1 %v3162_v10 }
 0x151   :  { %v423_v13 = vpop.f32.mrb[25].mxu0  ;;  %2329 = vmatprep.subr.bf16.mxu0 %v2799_v1  ;;  %2349 = vmatprep.subr.bf16.mxu1 %v2799_v1  ;;  %v422_v15 = vadd.f32 %v421_v12, %v3076_v57 }
 0x152   :  { %v425_v14 = vpop.f32.mrb[26].mxu0  ;;  %v424_v21 = vadd.f32 %v423_v13, %v3079_v59 }
 0x153   :  { %v426_v19 = vadd.f32 %v425_v14, %v3076_v57  ;;  %v427_v20 = vpop.f32.mrb[27].mxu0 }
 0x154   :  { %v428_v22 = vadd.f32 %v427_v20, %v3079_v59 }
 0x155   :  { %v3175_v23 = vpack.c.bf16 %v426_v19, %v422_v15 }
 0x156   :  { %v3177_v24 = vpack.c.bf16 %v428_v22, %v424_v21 }
 0x157   :  { %674 = vrot.lane.b32.xlu1 %v3175_v23, %s2801_s3  ;;  %v490_v25 = vsel %vm467_vm1, %v3175_v23, 0 }
 0x158   :  { %v431_v26 = vpop.f32.mrb[28].mxu0  ;;  %2330 = vmatpush3.bf16.xpose.msra.mxu0 %v490_v25  ;;  %2350 = vmatpush3.bf16.msra.mxu1 %v3177_v24 }
 0x159   :  { %v433_v28 = vpop.f32.mrb[29].mxu0  ;;  %2331 = vmatprep.subr.bf16.mxu0 %v2799_v1  ;;  %2351 = vmatprep.subr.bf16.mxu1 %v2799_v1  ;;  %v432_v30 = vadd.f32 %v431_v26, %v3076_v57 }
 0x15a   :  { %v435_v29 = vpop.f32.mrb[30].mxu0  ;;  %v434_v36 = vadd.f32 %v433_v28, %v3079_v59 }
 0x15b   :  { %v436_v33 = vadd.f32 %v435_v29, %v3076_v57  ;;  %v437_v34 = vpop.f32.mrb[31].mxu0  ;;  %v3217_v57 = vand.u32 127, %v237_v52 }
 0x15c   :  { %v438_v37 = vadd.f32 %v437_v34, %v3079_v59 }
 0x15d   :  { %v3191_v38 = vpack.c.bf16 %v436_v33, %v432_v30  ;;  %vm442_vm2 = vcmp.lt.s32.totalorder %v3217_v57, 100 }
 0x15e   :  { %v3193_v39 = vpack.c.bf16 %v438_v37, %v434_v36 }
 0x15f   :  { %676 = vrot.lane.b32.xlu1 %v3191_v38, %s2801_s3  ;;  %v493_v41 = vsel %vm467_vm1, %v3191_v38, 0 }
 0x160   :  { %2332 = vmatpush3.bf16.xpose.msra.mxu0 %v493_v41  ;;  %2352 = vmatpush3.bf16.msra.mxu1 %v3193_v39 }
 0x161   :  { %2365 = vmatprep.subr.bf16.mxu1 %v2799_v1  ;;  %2357 = vmatprep.subr.bf16.mxu0 %v2799_v1 }
 0x163   :  { %652 = vrot.lane.b32.xlu1 %v3195_v40, %s2801_s3 }
 0x167   :  { %767 = vrot.lane.b32.xlu1 %v3087_v6, %s2801_s3  ;;  %2334 = vmatmul.mubr.msk.bf16.vlgmr.msra.gmra.mrb[32].mxu0 %vm467_vm1, %v3195_v40 }
 0x168   :  { %2361 = vmatprep.mubr.msk.bf16.mxu0 %vm2800_vm0, %v2799_v1  ;;  %2358 = vmatpush3.bf16.msra.mxu0 %v2551_v60 }
 0x169   :  { %2359 = vmatprep.subr.bf16.mxu0 %v2799_v1 }
 0x16b   :  { %771 = vrot.lane.b32.xlu1 %v3119_v32, %s2801_s3 }
 0x16c   :  { %2360 = vmatpush3.bf16.msra.mxu0 %v2552_v61 }
 0x16d   :  { %2385 = vmatprep.subr.bf16.mxu0 %v2799_v1 }
 0x16f   :  { %777 = vrot.lane.b32.xlu1 %v3162_v10, %s2801_s3 }
 0x199   :  { %v663_v3 = vpop.permute.xlu1 %662 }
 0x19a   :  { %v682_v7 = vsel %vm467_vm1, %v663_v3, 0 }
 0x1a1   :  { %v665_v8 = vpop.permute.xlu1 %664 }
 0x1a2   :  { %v685_v11 = vsel %vm467_vm1, %v665_v8, 0 }
 0x1b1   :  { %v669_v14 = vpop.permute.xlu1 %668 }
 0x1b2   :  { %v691_v15 = vsel %vm467_vm1, %v669_v14, 0 }
 0x1b9   :  { %v671_v19 = vpop.permute.xlu1 %670 }
 0x1ba   :  { %v694_v20 = vsel %vm467_vm1, %v671_v19, 0 }
 0x1c1   :  { %v673_v21 = vpop.permute.xlu1 %672 }
 0x1c2   :  { %v697_v22 = vsel %vm467_vm1, %v673_v21, 0 }
 0x1c9   :  { %v675_v25 = vpop.permute.xlu1 %674 }
 0x1ca   :  { %v700_v26 = vsel %vm467_vm1, %v675_v25, 0 }
 0x1d1   :  { %v677_v27 = vpop.permute.xlu1 %676 }
 0x1d2   :  { %v703_v28 = vsel %vm467_vm1, %v677_v27, 0  ;;  %v2553_v27 = vld [vmem:[%s3746_s8 + $0x10] sm:$0xff]  }
 0x1d5   :  { %v653_v29 = vpop.permute.xlu1 %652 }
 0x1d9   :  { %v768_v36 = vpop.permute.xlu1 %767 }
 0x23a   :  { %v529_v59 = vpop.f32.mrb[32].mxu0 }
 0x23b   :  { %v535_v17 = vmul.f32 0.17677669, %v529_v59  ;;  %v2335_v44 = vpop.f32.mrb[33].mxu0 }
 0x23c   :  { %v532_v45 = vpop.f32.mrb[34].mxu0 }
 0x23d   :  { %v2336_v46 = vpop.f32.mrb[35].mxu0  ;;  %v536_v47 = vsel %vm442_vm2, %v535_v17, -1e+30 }
 0x23e   :  { %v538_v48 = vsel %vm537_vm3, %v536_v47, -inf }
 0x23f   :  { %539 = vmax.xlane.f32.xlu0 %v538_v48 }
 0x2cc   :  { %v540_v49 = vpop.xlane.xlu0 %539 }
 0x2cd   :  { %v541_v50 = vsub.f32 %v536_v47, %v540_v49 }
 0x2cf   :  { %v542_v51 = vmul.f32 1.442695, %v541_v50 }
 0x2d1   :  { %2679 = vpow2.f32 %v542_v51 }
 0x2db   :  { %v2680_v52 = vpop.eup %2679 }
 0x2dc   :  { %v544_v53 = vsel %vm537_vm3, %v2680_v52, 0.0 }
 0x2dd   :  { %545 = vadd.xlane.f32.xlu0 %v544_v53 }
 0x2f3   :  { %666 = vrot.lane.b32.xlu0 %v3117_v31, %s2801_s3 }
 0x36a   :  { %v546_v62 = vpop.xlane.xlu0 %545 }
 0x36b   :  { %2681 = vrcp.f32 %v546_v62  ;;  %v772_v62 = vpop.permute.xlu1 %771 }
 0x36e   :  { %v667_v12 = vpop.permute.xlu0 %666 }
 0x36f   :  { %v688_v13 = vsel %vm467_vm1, %v667_v12, 0  ;;  %v778_v8 = vpop.permute.xlu1 %777 }
 0x375   :  { %v2682_v63 = vpop.eup %2681 }
 0x376   :  { %v548_v2 = vmul.f32 %v2682_v63, %v2680_v52 }
 0x378   :  { %v549_v4 = vpack.c.bf16 %v548_v2, %v548_v2 }
 0x37a   :  { %2354 = vmatmul.mubr.bf16.vlgmr.msra.gmra.mrb[4].mxu1 %v549_v4 }
 0x37b   :  { %2366 = vmatpush3.bf16.xpose.msra.mxu1 %v682_v7  ;;  %2381 = vmatprep.mubr.msk.bf16.mxu1 %vm2800_vm0, %v2799_v1 }
 0x37c   :  { %2367 = vmatprep.subr.bf16.mxu1 %v2799_v1 }
 0x383   :  { %2368 = vmatpush3.bf16.xpose.msra.mxu1 %v685_v11 }
 0x384   :  { %2369 = vmatprep.subr.bf16.mxu1 %v2799_v1 }
 0x38b   :  { %2370 = vmatpush3.bf16.xpose.msra.mxu1 %v688_v13 }
 0x38c   :  { %2371 = vmatprep.subr.bf16.mxu1 %v2799_v1 }
 0x393   :  { %2372 = vmatpush3.bf16.xpose.msra.mxu1 %v691_v15 }
 0x394   :  { %2373 = vmatprep.subr.bf16.mxu1 %v2799_v1 }
 0x39b   :  { %2374 = vmatpush3.bf16.xpose.msra.mxu1 %v694_v20 }
 0x39c   :  { %2375 = vmatprep.subr.bf16.mxu1 %v2799_v1 }
 0x3a3   :  { %2376 = vmatpush3.bf16.xpose.msra.mxu1 %v697_v22 }
 0x3a4   :  { %2377 = vmatprep.subr.bf16.mxu1 %v2799_v1 }
 0x3ab   :  { %2378 = vmatpush3.bf16.xpose.msra.mxu1 %v700_v26 }
 0x3ac   :  { %2379 = vmatprep.subr.bf16.mxu1 %v2799_v1 }
 0x3b3   :  { %2380 = vmatpush3.bf16.xpose.msra.mxu1 %v703_v28 }
 0x3b4   :  { %2433 = vmatprep.subr.bf16.mxu1 %v2799_v1 }
 0x3ba   :  { %2382 = vmatmul.mubr.msk.bf16.vlgmr.msra.gmra.mrb[8].mxu1 %vm467_vm1, %v653_v29  ;;  %v2554_v29 = vld [vmem:[%s3746_s8 + $0x18] sm:$0xff]  }
 0x3bb   :  { %2449 = vmatprep.mubr.msk.bf16.mxu1 %vm2800_vm0, %v2799_v1 }
 0x44d   :  { %v584_v30 = vpop.f32.mrb[4].mxu1 }
 0x44e   :  { %v594_v33 = vpack.c.bf16 %v584_v30, %v584_v30  ;;  %v2355_v34 = vpop.f32.mrb[5].mxu1 }
 0x44f   :  { %v587_v35 = vpop.f32.mrb[6].mxu1 }
 0x450   :  { %v2356_v37 = vpop.f32.mrb[7].mxu1  ;;  %2362 = vmatmul.mubr.msk.bf16.vlgmr.msra.gmra.mrb[36].mxu0 %vm467_vm1, %v594_v33 }
 0x451   :  { %2386 = vmatpush3.bf16.msra.mxu0 %v768_v36  ;;  %2401 = vmatprep.mubr.msk.bf16.mxu0 %vm2800_vm0, %v2799_v1 }
 0x452   :  { %2387 = vmatprep.subr.bf16.mxu0 %v2799_v1 }
 0x48d   :  { %v739_v41 = vpop.f32.mrb[8].mxu1 }
 0x48e   :  { %v745_v59 = vmul.f32 0.17677669, %v739_v41  ;;  %v2383_v17 = vpop.f32.mrb[9].mxu1 }
 0x48f   :  { %v742_v44 = vpop.f32.mrb[10].mxu1 }
 0x490   :  { %v2384_v45 = vpop.f32.mrb[11].mxu1  ;;  %v746_v46 = vsel %vm442_vm2, %v745_v59, -1e+30 }
 0x491   :  { %v747_v47 = vsel %vm537_vm3, %v746_v46, -inf }
 0x492   :  { %748 = vmax.xlane.f32.xlu0 %v747_v47 }
 0x4a8   :  { %769 = vrot.lane.b32.xlu0 %v3104_v18, %s2801_s3 }
 0x4ac   :  { %773 = vrot.lane.b32.xlu0 %v3132_v43, %s2801_s3 }
 0x4b0   :  { %775 = vrot.lane.b32.xlu0 %v3147_v58, %s2801_s3 }
 0x4b4   :  { %779 = vrot.lane.b32.xlu0 %v3177_v24, %s2801_s3 }
 0x4b8   :  { %894 = vrot.lane.b32.xlu0 %v3085_v5, %s2802_s25 }
 0x4bc   :  { %898 = vrot.lane.b32.xlu0 %v3117_v31, %s2802_s25 }
 0x4c0   :  { %902 = vrot.lane.b32.xlu0 %v3145_v55, %s2802_s25 }
 0x4c4   :  { %906 = vrot.lane.b32.xlu0 %v3175_v23, %s2802_s25 }
 0x4c8   :  { %892 = vrot.lane.b32.xlu0 %v3195_v40, %s2802_s25 }
 0x4cc   :  { %991 = vrot.lane.b32.xlu0 %v3087_v6, %s2802_s25 }
 0x4d0   :  { %993 = vrot.lane.b32.xlu0 %v3104_v18, %s2802_s25 }
 0x4d4   :  { %997 = vrot.lane.b32.xlu0 %v3132_v43, %s2802_s25 }
 0x51f   :  { %v749_v48 = vpop.xlane.xlu0 %748 }
 0x520   :  { %v750_v49 = vsub.f32 %v746_v46, %v749_v48 }
 0x522   :  { %v751_v50 = vmul.f32 1.442695, %v750_v49 }
 0x523   :  { %v770_v51 = vpop.permute.xlu0 %769  ;;  %v3286_v52 = vpop.f32.mrb[36].mxu0 }
 0x524   :  { %2683 = vpow2.f32 %v751_v50  ;;  %2388 = vmatpush3.bf16.msra.mxu0 %v770_v51  ;;  %v2363_v53 = vpop.f32.mrb[37].mxu0 }
 0x525   :  { %v647_v60 = vpop.f32.mrb[38].mxu0  ;;  %2389 = vmatprep.subr.bf16.mxu0 %v2799_v1  ;;  %v2106_v53 = vld [vmem:[#allocation5] ss:$0 sm:$0xff] }
 0x526   :  { %v2364_v61 = vpop.f32.mrb[39].mxu0  ;;  %v650_v60 = vadd.f32 %v2106_v53, %v3286_v52 }
 0x527   :  { %v774_v63 = vpop.permute.xlu0 %773 }
 0x528   :  { %2390 = vmatpush3.bf16.msra.mxu0 %v772_v62 }
 0x529   :  { %2391 = vmatprep.subr.bf16.mxu0 %v2799_v1 }
 0x52b   :  { %v776_v2 = vpop.permute.xlu0 %775 }
 0x52c   :  { %2392 = vmatpush3.bf16.msra.mxu0 %v774_v63 }
 0x52d   :  { %2393 = vmatprep.subr.bf16.mxu0 %v2799_v1 }
 0x52e   :  { %v2684_v3 = vpop.eup %2683 }
 0x52f   :  { %v780_v4 = vpop.permute.xlu0 %779  ;;  %v753_v7 = vsel %vm537_vm3, %v2684_v3, 0.0 }
 0x530   :  { %754 = vadd.xlane.f32.xlu1 %v753_v7  ;;  %2394 = vmatpush3.bf16.msra.mxu0 %v776_v2 }
 0x531   :  { %2395 = vmatprep.subr.bf16.mxu0 %v2799_v1 }
 0x533   :  { %v895_v11 = vpop.permute.xlu0 %894 }
 0x534   :  { %2396 = vmatpush3.bf16.msra.mxu0 %v778_v8  ;;  %v914_v36 = vsel %vm467_vm1, %v895_v11, 0 }
 0x535   :  { %2397 = vmatprep.subr.bf16.mxu0 %v2799_v1 }
 0x537   :  { %v899_v12 = vpop.permute.xlu0 %898 }
 0x538   :  { %2398 = vmatpush3.bf16.msra.mxu0 %v780_v4  ;;  %v920_v17 = vsel %vm467_vm1, %v899_v12, 0 }
 0x539   :  { %2399 = vmatprep.subr.bf16.mxu0 %v2799_v1 }
 0x53b   :  { %v903_v13 = vpop.permute.xlu0 %902 }
 0x53c   :  { %v926_v46 = vsel %vm467_vm1, %v903_v13, 0 }
 0x53f   :  { %v907_v14 = vpop.permute.xlu0 %906 }
 0x540   :  { %v932_v49 = vsel %vm467_vm1, %v907_v14, 0 }
 0x541   :  { %781 = vrot.lane.b32.xlu1 %v3193_v39, %s2801_s3 }
 0x543   :  { %v893_v15 = vpop.permute.xlu0 %892 }
 0x545   :  { %896 = vrot.lane.b32.xlu1 %v3100_v16, %s2802_s25 }
 0x547   :  { %v992_v19 = vpop.permute.xlu0 %991 }
 0x548   :  { %2434 = vmatpush3.bf16.msra.mxu1 %v992_v19  ;;  %v2555_v19 = vld [vmem:[%s3746_s8 + $0x20] sm:$0xff]  }
 0x549   :  { %900 = vrot.lane.b32.xlu1 %v3130_v42, %s2802_s25  ;;  %2435 = vmatprep.subr.bf16.mxu1 %v2799_v1 }
 0x54b   :  { %v994_v20 = vpop.permute.xlu0 %993 }
 0x54c   :  { %2436 = vmatpush3.bf16.msra.mxu1 %v994_v20  ;;  %v2556_v20 = vld [vmem:[%s3746_s8 + $0x28] sm:$0xff]  }
 0x54d   :  { %904 = vrot.lane.b32.xlu1 %v3160_v9, %s2802_s25  ;;  %2437 = vmatprep.subr.bf16.mxu1 %v2799_v1 }
 0x551   :  { %908 = vrot.lane.b32.xlu1 %v3191_v38, %s2802_s25 }
 0x5bd   :  { %v755_v21 = vpop.xlane.xlu1 %754 }
 0x5be   :  { %2685 = vrcp.f32 %v755_v21 }
 0x5c1   :  { %v782_v22 = vpop.permute.xlu1 %781 }
 0x5c2   :  { %2400 = vmatpush3.bf16.msra.mxu0 %v782_v22 }
 0x5c3   :  { %2405 = vmatprep.subr.bf16.mxu0 %v2799_v1 }
 0x5c5   :  { %v897_v41 = vpop.permute.xlu1 %896 }
 0x5c6   :  { %v917_v59 = vsel %vm467_vm1, %v897_v41, 0 }
 0x5c8   :  { %v2686_v25 = vpop.eup %2685 }
 0x5c9   :  { %v757_v26 = vmul.f32 %v2686_v25, %v2684_v3  ;;  %v901_v44 = vpop.permute.xlu1 %900 }
 0x5ca   :  { %v923_v45 = vsel %vm467_vm1, %v901_v44, 0 }
 0x5cb   :  { %v758_v28 = vpack.c.bf16 %v757_v26, %v757_v26 }
 0x5cd   :  { %2402 = vmatmul.mubr.bf16.vlgmr.msra.gmra.mrb[40].mxu0 %v758_v28  ;;  %v905_v47 = vpop.permute.xlu1 %904 }
 0x5ce   :  { %2406 = vmatpush3.bf16.msra.mxu0 %v2553_v27  ;;  %2409 = vmatprep.mubr.msk.bf16.mxu0 %vm2800_vm0, %v2799_v1  ;;  %v929_v48 = vsel %vm467_vm1, %v905_v47, 0 }
 0x5cf   :  { %2407 = vmatprep.subr.bf16.mxu0 %v2799_v1 }
 0x5d1   :  { %v909_v50 = vpop.permute.xlu1 %908 }
 0x5d2   :  { %2408 = vmatpush3.bf16.msra.mxu0 %v2554_v29  ;;  %v935_v51 = vsel %vm467_vm1, %v909_v50, 0 }
 0x5d3   :  { %2413 = vmatprep.subr.bf16.mxu0 %v2799_v1 }
 0x6a0   :  { %v825_v30 = vpop.f32.mrb[40].mxu0 }
 0x6a1   :  { %v835_v33 = vpack.c.bf16 %v825_v30, %v825_v30  ;;  %v2403_v34 = vpop.f32.mrb[41].mxu0 }
 0x6a2   :  { %v828_v35 = vpop.f32.mrb[42].mxu0 }
 0x6a3   :  { %v2404_v37 = vpop.f32.mrb[43].mxu0  ;;  %2410 = vmatmul.mubr.msk.bf16.vlgmr.msra.gmra.mrb[44].mxu0 %vm467_vm1, %v835_v33 }
 0x6a4   :  { %2414 = vmatpush3.bf16.xpose.msra.mxu0 %v914_v36  ;;  %2429 = vmatprep.mubr.msk.bf16.mxu0 %vm2800_vm0, %v2799_v1 }
 0x6a5   :  { %2415 = vmatprep.subr.bf16.mxu0 %v2799_v1 }
 0x6ac   :  { %2416 = vmatpush3.bf16.xpose.msra.mxu0 %v917_v59 }
 0x6ad   :  { %2417 = vmatprep.subr.bf16.mxu0 %v2799_v1 }
 0x6b4   :  { %2418 = vmatpush3.bf16.xpose.msra.mxu0 %v920_v17 }
 0x6b5   :  { %2419 = vmatprep.subr.bf16.mxu0 %v2799_v1 }
 0x6bc   :  { %2420 = vmatpush3.bf16.xpose.msra.mxu0 %v923_v45 }
 0x6bd   :  { %2421 = vmatprep.subr.bf16.mxu0 %v2799_v1 }
 0x6c4   :  { %2422 = vmatpush3.bf16.xpose.msra.mxu0 %v926_v46 }
 0x6c5   :  { %2423 = vmatprep.subr.bf16.mxu0 %v2799_v1 }
 0x6cc   :  { %2424 = vmatpush3.bf16.xpose.msra.mxu0 %v929_v48 }
 0x6cd   :  { %2425 = vmatprep.subr.bf16.mxu0 %v2799_v1 }
 0x6d4   :  { %2426 = vmatpush3.bf16.xpose.msra.mxu0 %v932_v49 }
 0x6d5   :  { %2427 = vmatprep.subr.bf16.mxu0 %v2799_v1 }
 0x6dc   :  { %2428 = vmatpush3.bf16.xpose.msra.mxu0 %v935_v51 }
 0x6dd   :  { %2453 = vmatprep.subr.bf16.mxu0 %v2799_v1 }
 0x6e3   :  { %2430 = vmatmul.mubr.msk.bf16.vlgmr.msra.gmra.mrb[48].mxu0 %vm467_vm1, %v893_v15 }
 0x6e4   :  { %2457 = vmatprep.mubr.msk.bf16.mxu0 %vm2800_vm0, %v2799_v1  ;;  %2454 = vmatpush3.bf16.msra.mxu0 %v2555_v19  ;;  %v2561_v19 = vld [vmem:[%s3749_s11 + $0x4] ss:$8 sps:$4 sm:$0xff]  }
 0x6e5   :  { %2455 = vmatprep.subr.bf16.mxu0 %v2799_v1 }
 0x6e8   :  { %2456 = vmatpush3.bf16.msra.mxu0 %v2556_v20  ;;  %v2583_v20 = vld [vmem:[%s3748_s10] ss:$8 sps:$4 sm:$0xff]  }
 0x6e9   :  { %2481 = vmatprep.subr.bf16.mxu0 %v2799_v1 }
 0x776   :  { %v885_v61 = vpop.f32.mrb[44].mxu0 }
 0x777   :  { %v3341_v62 = vadd.f32 %v885_v61, %v650_v60  ;;  %v2411_v63 = vpop.f32.mrb[45].mxu0 }
 0x778   :  { %v888_v2 = vpop.f32.mrb[46].mxu0 }
 0x779   :  { %v2412_v3 = vpop.f32.mrb[47].mxu0 }
 0x7b6   :  { %v971_v4 = vpop.f32.mrb[48].mxu0 }
 0x7b7   :  { %v977_v7 = vmul.f32 0.17677669, %v971_v4  ;;  %v2431_v8 = vpop.f32.mrb[49].mxu0 }
 0x7b8   :  { %v974_v11 = vpop.f32.mrb[50].mxu0 }
 0x7b9   :  { %v2432_v12 = vpop.f32.mrb[51].mxu0  ;;  %v978_v13 = vsel %vm442_vm2, %v977_v7, -1e+30 }
 0x7ba   :  { %v979_v14 = vsel %vm537_vm3, %v978_v13, -inf }
 0x7bb   :  { %980 = vmax.xlane.f32.xlu1 %v979_v14 }
 0x7cc   :  { %995 = vrot.lane.b32.xlu1 %v3119_v32, %s2802_s25 }
 0x7d0   :  { %999 = vrot.lane.b32.xlu1 %v3147_v58, %s2802_s25 }
 0x7d4   :  { %1001 = vrot.lane.b32.xlu1 %v3162_v10, %s2802_s25 }
 0x7d8   :  { %1003 = vrot.lane.b32.xlu1 %v3177_v24, %s2802_s25 }
 0x7dc   :  { %1118 = vrot.lane.b32.xlu1 %v3085_v5, %s2803_s27 }
 0x7e0   :  { %1122 = vrot.lane.b32.xlu1 %v3117_v31, %s2803_s27 }
 0x7e4   :  { %1126 = vrot.lane.b32.xlu1 %v3145_v55, %s2803_s27  ;;  %v998_v55 = vpop.permute.xlu0 %997 }
 0x7e8   :  { %1130 = vrot.lane.b32.xlu1 %v3175_v23, %s2803_s27 }
 0x7ec   :  { %1116 = vrot.lane.b32.xlu1 %v3195_v40, %s2803_s27 }
 0x7f0   :  { %1215 = vrot.lane.b32.xlu1 %v3087_v6, %s2803_s27 }
 0x7f4   :  { %1219 = vrot.lane.b32.xlu1 %v3119_v32, %s2803_s27 }
 0x7f8   :  { %1225 = vrot.lane.b32.xlu1 %v3162_v10, %s2803_s27 }
 0x848   :  { %v981_v5 = vpop.xlane.xlu1 %980 }
 0x849   :  { %v982_v31 = vsub.f32 %v978_v13, %v981_v5 }
 0x84b   :  { %v983_v52 = vmul.f32 1.442695, %v982_v31 }
 0x84c   :  { %v996_v15 = vpop.permute.xlu1 %995 }
 0x84d   :  { %2687 = vpow2.f32 %v983_v52  ;;  %2438 = vmatpush3.bf16.msra.mxu1 %v996_v15 }
 0x84e   :  { %2439 = vmatprep.subr.bf16.mxu1 %v2799_v1 }
 0x850   :  { %v1000_v23 = vpop.permute.xlu1 %999 }
 0x851   :  { %2440 = vmatpush3.bf16.msra.mxu1 %v998_v55 }
 0x852   :  { %2441 = vmatprep.subr.bf16.mxu1 %v2799_v1 }
 0x854   :  { %v1002_v6 = vpop.permute.xlu1 %1001 }
 0x855   :  { %2442 = vmatpush3.bf16.msra.mxu1 %v1000_v23 }
 0x856   :  { %2443 = vmatprep.subr.bf16.mxu1 %v2799_v1 }
 0x857   :  { %v2688_v32 = vpop.eup %2687 }
 0x858   :  { %v985_v10 = vsel %vm537_vm3, %v2688_v32, 0.0  ;;  %v1004_v40 = vpop.permute.xlu1 %1003 }
 0x859   :  { %986 = vadd.xlane.f32.xlu0 %v985_v10  ;;  %2444 = vmatpush3.bf16.msra.mxu1 %v1002_v6  ;;  %v2557_v10 = vld [vmem:[%s3746_s8 + $0x30] sm:$0xff]  }
 0x85a   :  { %2445 = vmatprep.subr.bf16.mxu1 %v2799_v1 }
 0x85c   :  { %v1119_v21 = vpop.permute.xlu1 %1118 }
 0x85d   :  { %2446 = vmatpush3.bf16.msra.mxu1 %v1004_v40  ;;  %v1138_v25 = vsel %vm467_vm1, %v1119_v21, 0  ;;  %v2601_v21 = vld [vmem:[%s3748_s10 + $0x30] ss:$8 sps:$4 sm:$0xff]  }
 0x85e   :  { %2447 = vmatprep.subr.bf16.mxu1 %v2799_v1 }
 0x860   :  { %v1123_v28 = vpop.permute.xlu1 %1122 }
 0x861   :  { %v1144_v29 = vsel %vm467_vm1, %v1123_v28, 0  ;;  %v2615_v28 = vld [vmem:[%s3748_s10 + $0x54] ss:$8 sps:$4 sm:$0xff]  }
 0x864   :  { %v1127_v34 = vpop.permute.xlu1 %1126 }
 0x865   :  { %v1150_v35 = vsel %vm467_vm1, %v1127_v34, 0  ;;  %v2559_v34 = vld [vmem:[%s3749_s11] ss:$8 sps:$4 sm:$0xff]  }
 0x868   :  { %v1131_v41 = vpop.permute.xlu1 %1130 }
 0x869   :  { %v1156_v59 = vsel %vm467_vm1, %v1131_v41, 0 }
 0x86c   :  { %v1117_v45 = vpop.permute.xlu1 %1116 }
 0x86f   :  { %1005 = vrot.lane.b32.xlu0 %v3193_v39, %s2802_s25 }
 0x870   :  { %v1216_v50 = vpop.permute.xlu1 %1215 }
 0x873   :  { %1120 = vrot.lane.b32.xlu0 %v3100_v16, %s2803_s27 }
 0x874   :  { %v1220_v5 = vpop.permute.xlu1 %1219 }
 0x877   :  { %1124 = vrot.lane.b32.xlu0 %v3130_v42, %s2803_s27 }
 0x87b   :  { %1128 = vrot.lane.b32.xlu0 %v3160_v9, %s2803_s27 }
 0x87f   :  { %1132 = vrot.lane.b32.xlu0 %v3191_v38, %s2803_s27 }
 0x8e6   :  { %v987_v16 = vpop.xlane.xlu0 %986 }
 0x8e7   :  { %2689 = vrcp.f32 %v987_v16  ;;  %v2585_v16 = vld [vmem:[%s3748_s10 + $0x4] ss:$8 sps:$4 sm:$0xff]  }
 0x8ea   :  { %v1006_v42 = vpop.permute.xlu0 %1005 }
 0x8eb   :  { %2448 = vmatpush3.bf16.msra.mxu1 %v1006_v42  ;;  %v2591_v42 = vld [vmem:[%s3748_s10 + $0x14] ss:$8 sps:$4 sm:$0xff]  }
 0x8ec   :  { %2461 = vmatprep.subr.bf16.mxu1 %v2799_v1 }
 0x8ee   :  { %v1121_v26 = vpop.permute.xlu0 %1120 }
 0x8ef   :  { %v1141_v27 = vsel %vm467_vm1, %v1121_v26, 0  ;;  %v2609_v26 = vld [vmem:[%s3748_s10 + $0x44] ss:$8 sps:$4 sm:$0xff]  }
 0x8f1   :  { %v2690_v9 = vpop.eup %2689 }
 0x8f2   :  { %v989_v38 = vmul.f32 %v2690_v9, %v2688_v32  ;;  %v1125_v30 = vpop.permute.xlu0 %1124  ;;  %v2595_v9 = vld [vmem:[%s3748_s10 + $0x20] ss:$8 sps:$4 sm:$0xff]  }
 0x8f3   :  { %v1147_v33 = vsel %vm467_vm1, %v1125_v30, 0  ;;  %v2621_v30 = vld [vmem:[%s3748_s10 + $0x64] ss:$8 sps:$4 sm:$0xff]  }
 0x8f4   :  { %v990_v22 = vpack.c.bf16 %v989_v38, %v989_v38  ;;  %v2597_v38 = vld [vmem:[%s3748_s10 + $0x24] ss:$8 sps:$4 sm:$0xff]  }
 0x8f6   :  { %2450 = vmatmul.mubr.bf16.vlgmr.msra.gmra.mrb[12].mxu1 %v990_v22  ;;  %v1129_v36 = vpop.permute.xlu0 %1128  ;;  %v2603_v22 = vld [vmem:[%s3748_s10 + $0x34] ss:$8 sps:$4 sm:$0xff]  }
 0x8f7   :  { %2462 = vmatpush3.bf16.xpose.msra.mxu1 %v1138_v25  ;;  %2477 = vmatprep.mubr.msk.bf16.mxu1 %vm2800_vm0, %v2799_v1  ;;  %v1153_v37 = vsel %vm467_vm1, %v1129_v36, 0  ;;  %v2607_v25 = vld [vmem:[%s3748_s10 + $0x40] ss:$8 sps:$4 sm:$0xff]  }
 0x8f8   :  { %2463 = vmatprep.subr.bf16.mxu1 %v2799_v1 }
 0x8fa   :  { %v1133_v17 = vpop.permute.xlu0 %1132 }
 0x8fb   :  { %v1159_v44 = vsel %vm467_vm1, %v1133_v17, 0  ;;  %v2562_v17 = vld [vmem:[%s3749_s11 + $0x10] ss:$8 sps:$4 sm:$0xff]  }
 0x8ff   :  { %2464 = vmatpush3.bf16.xpose.msra.mxu1 %v1141_v27  ;;  %v2613_v27 = vld [vmem:[%s3748_s10 + $0x50] ss:$8 sps:$4 sm:$0xff]  }
 0x900   :  { %2465 = vmatprep.subr.bf16.mxu1 %v2799_v1 }
 0x907   :  { %2466 = vmatpush3.bf16.xpose.msra.mxu1 %v1144_v29  ;;  %v2619_v29 = vld [vmem:[%s3748_s10 + $0x60] ss:$8 sps:$4 sm:$0xff]  }
 0x908   :  { %2467 = vmatprep.subr.bf16.mxu1 %v2799_v1 }
 0x90f   :  { %2468 = vmatpush3.bf16.xpose.msra.mxu1 %v1147_v33 }
 0x910   :  { %2469 = vmatprep.subr.bf16.mxu1 %v2799_v1 }
 0x917   :  { %2470 = vmatpush3.bf16.xpose.msra.mxu1 %v1150_v35 }
 0x918   :  { %2471 = vmatprep.subr.bf16.mxu1 %v2799_v1 }
 0x91f   :  { %2472 = vmatpush3.bf16.xpose.msra.mxu1 %v1153_v37  ;;  %v2564_v37 = vld [vmem:[%s3749_s11 + $0x14] ss:$8 sps:$4 sm:$0xff]  }
 0x920   :  { %2473 = vmatprep.subr.bf16.mxu1 %v2799_v1 }
 0x927   :  { %2474 = vmatpush3.bf16.xpose.msra.mxu1 %v1156_v59 }
 0x928   :  { %2475 = vmatprep.subr.bf16.mxu1 %v2799_v1 }
 0x92f   :  { %2476 = vmatpush3.bf16.xpose.msra.mxu1 %v1159_v44  ;;  %v2567_v44 = vld [vmem:[%s3749_s11 + $0x24] ss:$8 sps:$4 sm:$0xff]  }
 0x930   :  { %1578 = vmatprep.subr.bf16.mxu1 %v2585_v16 }
 0x936   :  { %2478 = vmatmul.mubr.msk.bf16.vlgmr.msra.gmra.mrb[16].mxu1 %vm467_vm1, %v1117_v45  ;;  %v2565_v45 = vld [vmem:[%s3749_s11 + $0x20] ss:$8 sps:$4 sm:$0xff]  }
 0x937   :  { %1610 = vmatprep.mubr.bf16.mxu1 %v2798_v0  ;;  %1579 = vmatpush1.bf16.msra.mxu1 %v2583_v20  ;;  %v2699_v20 = vld [vmem:[%s3759_s24] sm:$0x3] }
 0x938   :  { %1580 = vmatprep.subr.bf16.mxu1 %v2591_v42  ;;  %v2631_v42 = vld [vmem:[%s3752_s14] ss:$8 sps:$4 sm:$0xff]  }
 0x9c9   :  { %v1049_v46 = vpop.f32.mrb[12].mxu1 }
 0x9ca   :  { %v1059_v47 = vpack.c.bf16 %v1049_v46, %v1049_v46  ;;  %v2451_v48 = vpop.f32.mrb[13].mxu1  ;;  %v2570_v46 = vld [vmem:[%s3749_s11 + $0x34] ss:$8 sps:$4 sm:$0xff]  }
 0x9cb   :  { %v1052_v49 = vpop.f32.mrb[14].mxu1  ;;  %v2573_v48 = vld [vmem:[%s3749_s11 + $0x44] ss:$8 sps:$4 sm:$0xff]  }
 0x9cc   :  { %v2452_v51 = vpop.f32.mrb[15].mxu1  ;;  %2458 = vmatmul.mubr.msk.bf16.vlgmr.msra.gmra.mrb[52].mxu0 %vm467_vm1, %v1059_v47  ;;  %v2568_v47 = vld [vmem:[%s3749_s11 + $0x30] ss:$8 sps:$4 sm:$0xff]   ;;  %v2571_v49 = vld [vmem:[%s3749_s11 + $0x40] ss:$8 sps:$4 sm:$0xff]  }
 0x9cd   :  { %2482 = vmatpush3.bf16.msra.mxu0 %v1216_v50  ;;  %2497 = vmatprep.mubr.msk.bf16.mxu0 %vm2800_vm0, %v2799_v1  ;;  %v2576_v50 = vld [vmem:[%s3749_s11 + $0x54] ss:$8 sps:$4 sm:$0xff]   ;;  %v2574_v51 = vld [vmem:[%s3749_s11 + $0x50] ss:$8 sps:$4 sm:$0xff]  }
 0x9ce   :  { %2483 = vmatprep.subr.bf16.mxu0 %v2799_v1 }
 0xa09   :  { %v1195_v53 = vpop.f32.mrb[16].mxu1 }
 0xa0a   :  { %v1201_v60 = vmul.f32 0.17677669, %v1195_v53  ;;  %v2479_v61 = vpop.f32.mrb[17].mxu1  ;;  %v2579_v53 = vld [vmem:[%s3749_s11 + $0x64] ss:$8 sps:$4 sm:$0xff]  }
 0xa0b   :  { %v1198_v63 = vpop.f32.mrb[18].mxu1  ;;  %v2582_v61 = vld [vmem:[%s3749_s11 + $0x74] ss:$8 sps:$4 sm:$0xff]  }
 0xa0c   :  { %v2480_v2 = vpop.f32.mrb[19].mxu1  ;;  %v1202_v3 = vsel %vm442_vm2, %v1201_v60, -1e+30  ;;  %v2577_v60 = vld [vmem:[%s3749_s11 + $0x60] ss:$8 sps:$4 sm:$0xff]  }
 0xa0d   :  { %v1203_v4 = vsel %vm537_vm3, %v1202_v3, -inf  ;;  %v2580_v63 = vld [vmem:[%s3749_s11 + $0x70] ss:$8 sps:$4 sm:$0xff]   ;;  %v1359_v2 = vld [vmem:[%s3760_s6] sm:$0x3] }
 0xa0e   :  { %1204 = vmax.xlane.f32.xlu0 %v1203_v4  ;;  %v1376_v4 = vpack.c.bf16 %v1359_v2, %v1359_v2  ;;  %v2669_v2 = vld [vmem:[%s3752_s14 + $0xc4] ss:$8 sps:$4 sm:$0xff]  }
 0xa24   :  { %1217 = vrot.lane.b32.xlu0 %v3104_v18, %s2803_s27 }
 0xa28   :  { %1221 = vrot.lane.b32.xlu0 %v3132_v43, %s2803_s27 }
 0xa2c   :  { %1223 = vrot.lane.b32.xlu0 %v3147_v58, %s2803_s27 }
 0xa30   :  { %1227 = vrot.lane.b32.xlu0 %v3177_v24, %s2803_s27 }
 0xa9b   :  { %v1205_v7 = vpop.xlane.xlu0 %1204 }
 0xa9c   :  { %v1206_v8 = vsub.f32 %v1202_v3, %v1205_v7  ;;  %v2588_v3 = vld [vmem:[%s3750_s12 + $0x4] ss:$8 sps:$4 sm:$0xff]   ;;  %v2586_v7 = vld [vmem:[%s3750_s12] ss:$8 sps:$4 sm:$0xff]  }
 0xa9e   :  { %v1207_v11 = vmul.f32 1.442695, %v1206_v8  ;;  %v2594_v8 = vld [vmem:[%s3750_s12 + $0x14] ss:$8 sps:$4 sm:$0xff]  }
 0xa9f   :  { %v1218_v57 = vpop.permute.xlu0 %1217  ;;  %v1109_v12 = vpop.f32.mrb[52].mxu0 }
 0xaa0   :  { %2691 = vpow2.f32 %v1207_v11  ;;  %v3430_v13 = vadd.f32 %v1109_v12, %v3341_v62  ;;  %2484 = vmatpush3.bf16.msra.mxu0 %v1218_v57  ;;  %v2459_v18 = vpop.f32.mrb[53].mxu0  ;;  %v1226_v62 = vpop.permute.xlu1 %1225  ;;  %v2592_v11 = vld [vmem:[%s3750_s12 + $0x10] ss:$8 sps:$4 sm:$0xff]   ;;  %v2600_v57 = vld [vmem:[%s3750_s12 + $0x24] ss:$8 sps:$4 sm:$0xff]  }
 0xaa1   :  { %v1112_v14 = vpop.f32.mrb[54].mxu0  ;;  %2485 = vmatprep.subr.bf16.mxu0 %v2799_v1  ;;  %v2598_v12 = vld [vmem:[%s3750_s12 + $0x20] ss:$8 sps:$4 sm:$0xff]   ;;  %v2606_v18 = vld [vmem:[%s3750_s12 + $0x34] ss:$8 sps:$4 sm:$0xff]  }
 0xaa2   :  { %v2460_v43 = vpop.f32.mrb[55].mxu0  ;;  %v2612_v14 = vld [vmem:[%s3750_s12 + $0x44] ss:$8 sps:$4 sm:$0xff]  }
 0xaa3   :  { %v1222_v58 = vpop.permute.xlu0 %1221  ;;  %v2610_v43 = vld [vmem:[%s3750_s12 + $0x40] ss:$8 sps:$4 sm:$0xff]  }
 0xaa4   :  { %2486 = vmatpush3.bf16.msra.mxu0 %v1220_v5  ;;  %v2618_v5 = vld [vmem:[%s3750_s12 + $0x54] ss:$8 sps:$4 sm:$0xff]  }
 0xaa5   :  { %2487 = vmatprep.subr.bf16.mxu0 %v2799_v1 }
 0xaa7   :  { %v1224_v31 = vpop.permute.xlu0 %1223 }
 0xaa8   :  { %2488 = vmatpush3.bf16.msra.mxu0 %v1222_v58  ;;  %v2616_v58 = vld [vmem:[%s3750_s12 + $0x50] ss:$8 sps:$4 sm:$0xff]  }
 0xaa9   :  { %2489 = vmatprep.subr.bf16.mxu0 %v2799_v1 }
 0xaaa   :  { %v2692_v24 = vpop.eup %2691 }
 0xaab   :  { %v1209_v52 = vsel %vm537_vm3, %v2692_v24, 0.0  ;;  %v1228_v15 = vpop.permute.xlu0 %1227 }
 0xaac   :  { %1210 = vadd.xlane.f32.xlu1 %v1209_v52  ;;  %2490 = vmatpush3.bf16.msra.mxu0 %v1224_v31  ;;  %v2622_v31 = vld [vmem:[%s3750_s12 + $0x60] ss:$8 sps:$4 sm:$0xff]   ;;  %v2630_v52 = vld [vmem:[%s3750_s12 + $0x74] ss:$8 sps:$4 sm:$0xff]  }
 0xaad   :  { %2491 = vmatprep.subr.bf16.mxu0 %v2799_v1 }
 0xab0   :  { %2492 = vmatpush3.bf16.msra.mxu0 %v1226_v62  ;;  %v2627_v62 = vld [vmem:[%s3748_s10 + $0x74] ss:$8 sps:$4 sm:$0xff]  }
 0xab1   :  { %2493 = vmatprep.subr.bf16.mxu0 %v2799_v1 }
 0xab4   :  { %2494 = vmatpush3.bf16.msra.mxu0 %v1228_v15  ;;  %v2628_v15 = vld [vmem:[%s3750_s12 + $0x70] ss:$8 sps:$4 sm:$0xff]  }
 0xab5   :  { %2495 = vmatprep.subr.bf16.mxu0 %v2799_v1 }
 0xabd   :  { %1229 = vrot.lane.b32.xlu1 %v3193_v39, %s2803_s27  ;;  %v2558_v39 = vld [vmem:[%s3746_s8 + $0x38] sm:$0xff]  }
 0xb39   :  { %v1211_v55 = vpop.xlane.xlu1 %1210 }
 0xb3a   :  { %2693 = vrcp.f32 %v1211_v55  ;;  %v2625_v55 = vld [vmem:[%s3748_s10 + $0x70] ss:$8 sps:$4 sm:$0xff]  }
 0xb3d   :  { %v1230_v23 = vpop.permute.xlu1 %1229 }
 0xb3e   :  { %2496 = vmatpush3.bf16.msra.mxu0 %v1230_v23  ;;  %v1619_v23 = vld [vmem:[%s3740_s2] sm:$0x3] }
 0xb3f   :  { %2501 = vmatprep.subr.bf16.mxu0 %v2799_v1 }
 0xb44   :  { %v2694_v6 = vpop.eup %2693 }
 0xb45   :  { %v1213_v32 = vmul.f32 %v2694_v6, %v2692_v24  ;;  %v2624_v24 = vld [vmem:[%s3750_s12 + $0x64] ss:$8 sps:$4 sm:$0xff]   ;;  %v1636_v6 = vpack.c.bf16 %v1619_v23, %v1619_v23 }
 0xb47   :  { %v1214_v40 = vpack.c.bf16 %v1213_v32, %v1213_v32  ;;  %v2633_v32 = vld [vmem:[%s3752_s14 + $0x4] ss:$8 sps:$4 sm:$0xff]  }
 0xb49   :  { %2498 = vmatmul.mubr.bf16.vlgmr.msra.gmra.mrb[56].mxu0 %v1214_v40 }
 0xb4a   :  { %2502 = vmatpush3.bf16.msra.mxu0 %v2557_v10  ;;  %2505 = vmatprep.mubr.msk.bf16.mxu0 %vm2800_vm0, %v2799_v1 }
 0xb4b   :  { %2503 = vmatprep.subr.bf16.mxu0 %v2799_v1  ;;  %v2589_v1 = vld [vmem:[%s3748_s10 + $0x10] ss:$8 sps:$4 sm:$0xff]  }
 0xb4c   :  { %1581 = vmatpush1.bf16.msra.mxu1 %v2589_v1 }
 0xb4d   :  { %1582 = vmatprep.subr.bf16.mxu1 %v2597_v38  ;;  %v2636_v38 = vld [vmem:[%s3752_s14 + $0x14] ss:$8 sps:$4 sm:$0xff]  }
 0xb4e   :  { %2504 = vmatpush3.bf16.msra.mxu0 %v2558_v39 }
 0xb4f   :  { %1457 = vmatprep.subr.bf16.mxu0 %v2561_v19 }
 0xb50   :  { %1583 = vmatpush1.bf16.msra.mxu1 %v2595_v9 }
 0xb51   :  { %1584 = vmatprep.subr.bf16.mxu1 %v2603_v22  ;;  %v2637_v22 = vld [vmem:[%s3752_s14 + $0x20] ss:$8 sps:$4 sm:$0xff]  }
 0xb54   :  { %1585 = vmatpush1.bf16.msra.mxu1 %v2601_v21  ;;  %v2639_v21 = vld [vmem:[%s3752_s14 + $0x24] ss:$8 sps:$4 sm:$0xff]  }
 0xb55   :  { %1586 = vmatprep.subr.bf16.mxu1 %v2609_v26  ;;  %v2640_v26 = vld [vmem:[%s3752_s14 + $0x30] ss:$8 sps:$4 sm:$0xff]  }
 0xb58   :  { %1587 = vmatpush1.bf16.msra.mxu1 %v2607_v25  ;;  %v2642_v25 = vld [vmem:[%s3752_s14 + $0x34] ss:$8 sps:$4 sm:$0xff]  }
 0xb59   :  { %1588 = vmatprep.subr.bf16.mxu1 %v2615_v28  ;;  %v2643_v28 = vld [vmem:[%s3752_s14 + $0x40] ss:$8 sps:$4 sm:$0xff]  }
 0xb5c   :  { %1589 = vmatpush1.bf16.msra.mxu1 %v2613_v27  ;;  %v2645_v27 = vld [vmem:[%s3752_s14 + $0x44] ss:$8 sps:$4 sm:$0xff]  }
 0xb5d   :  { %1590 = vmatprep.subr.bf16.mxu1 %v2621_v30  ;;  %v2646_v30 = vld [vmem:[%s3752_s14 + $0x50] ss:$8 sps:$4 sm:$0xff]  }
 0xb60   :  { %1591 = vmatpush1.bf16.msra.mxu1 %v2619_v29  ;;  %v2648_v29 = vld [vmem:[%s3752_s14 + $0x54] ss:$8 sps:$4 sm:$0xff]  }
 0xb61   :  { %1592 = vmatprep.subr.bf16.mxu1 %v2627_v62 }
 0xb64   :  { %1593 = vmatpush1.bf16.msra.mxu1 %v2625_v55 }
 0xb65   :  { %1998 = vmatprep.subr.bf16.mxu1 %v2633_v32 }
 0xc1c   :  { %v1273_v33 = vpop.f32.mrb[56].mxu0 }
 0xc1d   :  { %v1283_v35 = vpack.c.bf16 %v1273_v33, %v1273_v33  ;;  %v2499_v36 = vpop.f32.mrb[57].mxu0  ;;  %v2651_v33 = vld [vmem:[%s3752_s14 + $0x64] ss:$8 sps:$4 sm:$0xff]  }
 0xc1e   :  { %v1276_v41 = vpop.f32.mrb[58].mxu0 }
 0xc1f   :  { %v2500_v59 = vpop.f32.mrb[59].mxu0  ;;  %2506 = vmatmul.mubr.msk.bf16.vlgmr.msra.gmra.mrb[60].mxu0 %vm467_vm1, %v1283_v35 }
 0xc20   :  { %1458 = vmatpush1.bf16.msra.mxu0 %v2559_v34  ;;  %1489 = vmatprep.mubr.bf16.mxu0 %v2798_v0  ;;  %v2649_v34 = vld [vmem:[%s3752_s14 + $0x60] ss:$8 sps:$4 sm:$0xff]   ;;  %v2654_v59 = vld [vmem:[%s3752_s14 + $0x74] ss:$8 sps:$4 sm:$0xff]  }
 0xc21   :  { %1459 = vmatprep.subr.bf16.mxu0 %v2564_v37 }
 0xc24   :  { %1460 = vmatpush1.bf16.msra.mxu0 %v2562_v17 }
 0xc25   :  { %1461 = vmatprep.subr.bf16.mxu0 %v2567_v44  ;;  %v2652_v44 = vld [vmem:[%s3752_s14 + $0x70] ss:$8 sps:$4 sm:$0xff]  }
 0xc28   :  { %1462 = vmatpush1.bf16.msra.mxu0 %v2565_v45 }
 0xc29   :  { %1463 = vmatprep.subr.bf16.mxu0 %v2570_v46 }
 0xc2c   :  { %1464 = vmatpush1.bf16.msra.mxu0 %v2568_v47 }
 0xc2d   :  { %1465 = vmatprep.subr.bf16.mxu0 %v2573_v48  ;;  %v2657_v48 = vld [vmem:[%s3752_s14 + $0x84] ss:$8 sps:$4 sm:$0xff]  }
 0xc30   :  { %1466 = vmatpush1.bf16.msra.mxu0 %v2571_v49  ;;  %v2655_v49 = vld [vmem:[%s3752_s14 + $0x80] ss:$8 sps:$4 sm:$0xff]  }
 0xc31   :  { %1467 = vmatprep.subr.bf16.mxu0 %v2576_v50  ;;  %v2660_v50 = vld [vmem:[%s3752_s14 + $0x94] ss:$8 sps:$4 sm:$0xff]  }
 0xc34   :  { %1468 = vmatpush1.bf16.msra.mxu0 %v2574_v51  ;;  %v2658_v51 = vld [vmem:[%s3752_s14 + $0x90] ss:$8 sps:$4 sm:$0xff]  }
 0xc35   :  { %1469 = vmatprep.subr.bf16.mxu0 %v2579_v53  ;;  %v2663_v53 = vld [vmem:[%s3752_s14 + $0xa4] ss:$8 sps:$4 sm:$0xff]  }
 0xc38   :  { %1470 = vmatpush1.bf16.msra.mxu0 %v2577_v60  ;;  %v2661_v60 = vld [vmem:[%s3752_s14 + $0xa0] ss:$8 sps:$4 sm:$0xff]  }
 0xc39   :  { %1471 = vmatprep.subr.bf16.mxu0 %v2582_v61  ;;  %v2666_v61 = vld [vmem:[%s3752_s14 + $0xb4] ss:$8 sps:$4 sm:$0xff]  }
 0xc3c   :  { %1472 = vmatpush1.bf16.msra.mxu0 %v2580_v63  ;;  %v2664_v63 = vld [vmem:[%s3752_s14 + $0xb0] ss:$8 sps:$4 sm:$0xff]  }
 0xc3d   :  { %1717 = vmatprep.subr.bf16.mxu0 %v2588_v3  ;;  %v2667_v3 = vld [vmem:[%s3752_s14 + $0xc0] ss:$8 sps:$4 sm:$0xff]  }
 0xc3f   :  { %1490 = vmatmul.mubr.bf16.vlgmr.msra.gmra.mrb[64].mxu0 %v1376_v4  ;;  %v2672_v4 = vld [vmem:[%s3752_s14 + $0xd4] ss:$8 sps:$4 sm:$0xff]  }
 0xc40   :  { %1718 = vmatpush1.bf16.msra.mxu0 %v2586_v7  ;;  %1749 = vmatprep.mubr.bf16.mxu0 %v2798_v0  ;;  %v2604_v0 = vld [vmem:[%s3750_s12 + $0x30] ss:$8 sps:$4 sm:$0xff]  }
 0xc41   :  { %1719 = vmatprep.subr.bf16.mxu0 %v2594_v8  ;;  %v2670_v7 = vld [vmem:[%s3752_s14 + $0xd0] ss:$8 sps:$4 sm:$0xff]   ;;  %v2675_v8 = vld [vmem:[%s3752_s14 + $0xe4] ss:$8 sps:$4 sm:$0xff]  }
 0xc44   :  { %1720 = vmatpush1.bf16.msra.mxu0 %v2592_v11  ;;  %v2673_v11 = vld [vmem:[%s3752_s14 + $0xe0] ss:$8 sps:$4 sm:$0xff]  }
 0xc45   :  { %1721 = vmatprep.subr.bf16.mxu0 %v2600_v57  ;;  %v2678_v57 = vld [vmem:[%s3752_s14 + $0xf4] ss:$8 sps:$4 sm:$0xff]  }
 0xc48   :  { %1722 = vmatpush1.bf16.msra.mxu0 %v2598_v12  ;;  %v2676_v12 = vld [vmem:[%s3752_s14 + $0xf0] ss:$8 sps:$4 sm:$0xff]  }
 0xc49   :  { %1723 = vmatprep.subr.bf16.mxu0 %v2606_v18  ;;  %v1760_v18 = vld [vmem:[%s3751_s13] sm:$0x3]  ;;  %s2804_s13 = smov [#allocation8]  }
 0xc4c   :  { %1724 = vmatpush1.bf16.msra.mxu0 %v2604_v0 }
 0xc4d   :  { %1725 = vmatprep.subr.bf16.mxu0 %v2612_v14 }
 0xc50   :  { %1726 = vmatpush1.bf16.msra.mxu0 %v2610_v43  ;;  %v1765_v43 = vrot.slane %v1760_v18, %v3068_v54 }
 0xc51   :  { %1727 = vmatprep.subr.bf16.mxu0 %v2618_v5 }
 0xc54   :  { %1728 = vmatpush1.bf16.msra.mxu0 %v2616_v58 }
 0xc55   :  { %1729 = vmatprep.subr.bf16.mxu0 %v2624_v24  ;;  %v1769_v24 = vrot.slane %v1760_v18, %v3073_v56 }
 0xc58   :  { %1730 = vmatpush1.bf16.msra.mxu0 %v2622_v31 }
 0xc59   :  { %1731 = vmatprep.subr.bf16.mxu0 %v2630_v52 }
 0xc5c   :  { %1732 = vmatpush1.bf16.msra.mxu0 %v2628_v15 }
 0xc5f   :  { %1750 = vmatmul.mubr.bf16.vlgmr.msra.gmra.mrb[68].mxu0 %v1636_v6 }
 0xcf2   :  { %v1333_v10 = vpop.f32.mrb[60].mxu0 }
 0xcf3   :  { %v1339_v40 = vadd.f32 %v1333_v10, %v3430_v13  ;;  %v2507_v39 = vpop.f32.mrb[61].mxu0  ;;  %v2634_v13 = vld [vmem:[%s3752_s14 + $0x10] ss:$8 sps:$4 sm:$0xff]   ;;  %s2067_s14 = sshll.u32 %s2804_s13, 4  ;;  %s2068_s14 = int_to_ptr.vmem [resolvable:$true] %s2067_s14 }
 0xcf4   :  { %v1336_v19 = vpop.f32.mrb[62].mxu0  ;;  %s2744_s11 = scalar_lea.vmem %s2068_s14, 32  ;;  %p2749_p3 = scmp.lt.s32.totalorder %s2068_s14, %s2068_s14 }
 0xcf5   :  { %v1340_v16 = vadd.f32 %v2699_v20, %v1339_v40  ;;  %v2508_v1 = vpop.f32.mrb[63].mxu0  ;;  %p2745_p2 = scmp.ne.s32.totalorder %s2068_s14, %s2744_s11  ;;  %p2750_p4 = scmp.lt.s32.totalorder %s2744_s11, %s2744_s11 }
 0xcf7   :  { %v1358_v9 = vpack.c.bf16 %v1340_v16, %v1340_v16  ;;  %1341 = vst [vmem:[#allocation8] sm:$0x3] %v1340_v16  ;;  %p2751_p5 = por %p2750_p4, %p2749_p3 }
 0xcf9   :  { %1611 = vmatmul.mubr.bf16.vlgmr.msra.gmra.mrb[20].mxu1 %v1358_v9  ;;  %p2752_p6 = pnand %p2751_p5, %p2745_p2 }
 0xcfa   :  { %1999 = vmatpush1.bf16.msra.mxu1 %v2631_v42 }
 0xcfb   :  { %2000 = vmatprep.subr.bf16.mxu1 %v2636_v38 }
 0xcfe   :  { %2001 = vmatpush1.bf16.msra.mxu1 %v2634_v13 }
 0xcff   :  { %2002 = vmatprep.subr.bf16.mxu1 %v2639_v21 }
 0xd02   :  { %2003 = vmatpush1.bf16.msra.mxu1 %v2637_v22 }
 0xd03   :  { %2004 = vmatprep.subr.bf16.mxu1 %v2642_v25 }
 0xd06   :  { %2005 = vmatpush1.bf16.msra.mxu1 %v2640_v26 }
 0xd07   :  { %2006 = vmatprep.subr.bf16.mxu1 %v2645_v27 }
 0xd0a   :  { %2007 = vmatpush1.bf16.msra.mxu1 %v2643_v28 }
 0xd0b   :  { %2008 = vmatprep.subr.bf16.mxu1 %v2648_v29 }
 0xd0e   :  { %2009 = vmatpush1.bf16.msra.mxu1 %v2646_v30 }
 0xd0f   :  { %2010 = vmatprep.subr.bf16.mxu1 %v2651_v33 }
 0xd12   :  { %v1491_v35 = vpop.f32.mrb[64].mxu0  ;;  %2011 = vmatpush1.bf16.msra.mxu1 %v2649_v34 }
 0xd13   :  { %v1493_v36 = vpop.f32.mrb[65].mxu0  ;;  %2012 = vmatprep.subr.bf16.mxu1 %v2654_v59 }
 0xd14   :  { %v1495_v37 = vpop.f32.mrb[66].mxu0 }
 0xd15   :  { %v1496_v41 = vpop.f32.mrb[67].mxu0 }
 0xd16   :  { %2013 = vmatpush1.bf16.msra.mxu1 %v2652_v44 }
 0xd17   :  { %2014 = vmatprep.subr.bf16.mxu1 %v2657_v48 }
 0xd1a   :  { %2015 = vmatpush1.bf16.msra.mxu1 %v2655_v49 }
 0xd1b   :  { %2016 = vmatprep.subr.bf16.mxu1 %v2660_v50 }
 0xd1e   :  { %2017 = vmatpush1.bf16.msra.mxu1 %v2658_v51 }
 0xd1f   :  { %2018 = vmatprep.subr.bf16.mxu1 %v2663_v53 }
 0xd22   :  { %2019 = vmatpush1.bf16.msra.mxu1 %v2661_v60 }
 0xd23   :  { %2020 = vmatprep.subr.bf16.mxu1 %v2666_v61 }
 0xd26   :  { %2021 = vmatpush1.bf16.msra.mxu1 %v2664_v63 }
 0xd27   :  { %2022 = vmatprep.subr.bf16.mxu1 %v2669_v2 }
 0xd2a   :  { %2023 = vmatpush1.bf16.msra.mxu1 %v2667_v3 }
 0xd2b   :  { %2024 = vmatprep.subr.bf16.mxu1 %v2672_v4 }
 0xd2e   :  { %2025 = vmatpush1.bf16.msra.mxu1 %v2670_v7 }
 0xd2f   :  { %2026 = vmatprep.subr.bf16.mxu1 %v2675_v8 }
 0xd32   :  { %v1751_v17 = vpop.f32.mrb[68].mxu0  ;;  %2027 = vmatpush1.bf16.msra.mxu1 %v2673_v11 }
 0xd33   :  { %v1753_v45 = vpop.f32.mrb[69].mxu0  ;;  %2028 = vmatprep.subr.bf16.mxu1 %v2678_v57 }
 0xd34   :  { %v1755_v46 = vpop.f32.mrb[70].mxu0 }
 0xd35   :  { %v1756_v47 = vpop.f32.mrb[71].mxu0 }
 0xd36   :  { %2029 = vmatpush1.bf16.msra.mxu1 %v2676_v12 }
 0xdcc   :  { %v1612_v0 = vpop.f32.mrb[20].mxu1 }
 0xdcd   :  { %v1613_v14 = vadd.f32 %v1612_v0, %v1491_v35  ;;  %v1614_v5 = vpop.f32.mrb[21].mxu1 }
 0xdce   :  { %v1615_v58 = vadd.f32 %v1614_v5, %v1493_v36  ;;  %v1616_v31 = vpop.f32.mrb[22].mxu1 }
 0xdcf   :  { %v1758_v52 = vadd.f32 %v1751_v17, %v1613_v14  ;;  %v1617_v62 = vpop.f32.mrb[23].mxu1 }
 0xdd0   :  { %v1759_v15 = vadd.f32 %v1753_v45, %v1615_v58 }
 0xdd1   :  { %v1772_v55 = vadd.f32 %v1765_v43, %v1758_v52 }
 0xdd2   :  { %v1773_v23 = vadd.f32 %v1769_v24, %v1759_v15 }
 0xdd3   :  { %v1776_v6 = vmul.f32 0.044715, %v1772_v55  ;;  %v1774_v13 = vmul.f32 0.5, %v1772_v55 }
 0xdd4   :  { %v1777_v32 = vmul.f32 0.044715, %v1773_v23  ;;  %v1775_v22 = vmul.f32 0.5, %v1773_v23 }
 0xdd5   :  { %v1778_v10 = vmul.f32 %v1776_v6, %v1772_v55 }
 0xdd6   :  { %v1779_v40 = vmul.f32 %v1777_v32, %v1773_v23 }
 0xdd7   :  { %v1780_v39 = vmul.f32 %v1778_v10, %v1772_v55 }
 0xdd8   :  { %v1781_v19 = vmul.f32 %v1779_v40, %v1773_v23 }
 0xdd9   :  { %v1782_v20 = vadd.f32 %v1780_v39, %v1772_v55 }
 0xdda   :  { %v1783_v16 = vadd.f32 %v1781_v19, %v1773_v23 }
 0xddb   :  { %v1784_v1 = vmul.f32 0.7978846, %v1782_v20 }
 0xddc   :  { %v1785_v42 = vmul.f32 0.7978846, %v1783_v16 }
 0xddd   :  { %2695 = vtanh.f32 %v1784_v1 }
 0xdde   :  { %2697 = vtanh.f32 %v1785_v42 }
 0xde7   :  { %v2696_v9 = vpop.eup %2695 }
 0xde8   :  { %v2698_v38 = vpop.eup %2697  ;;  %v1788_v21 = vadd.f32 1.0, %v2696_v9 }
 0xde9   :  { %v1789_v25 = vadd.f32 1.0, %v2698_v38 }
 0xdea   :  { %v1790_v26 = vmul.f32 %v1788_v21, %v1774_v13 }
 0xdeb   :  { %v1791_v27 = vmul.f32 %v1789_v25, %v1775_v22 }
 0xdec   :  { %v1824_v29 = vpack.c.bf16 %v1790_v26, %v1790_v26 }
 0xded   :  { %v1825_v28 = vpack.c.bf16 %v1791_v27, %v1791_v27 }
 0xdef   :  { %2030 = vmatprep.mubr.bf16.mxu1 %v1825_v28 }
 0xdf0   :  { %2031 = vmatmul.mubr.bf16.vlgmr.msra.gmra.mrb[24].mxu1 %v1824_v29 }
 0xdf1   :  { %2755 = shalt.err (!%p2752_p6)
}
 0xdf2   :  { %s2756_s8 = scalar_lea.hbm %s3755_s17, 32 }
 0xdf3   :  { %p2757_p7 = scmp.ne.s32.totalorder %s3755_s17, %s2756_s8  ;;  %p2760_p8 = scmp.lt.u32.totalorder %s2756_s8, %s3755_s17 }
 0xdf5   :  { %p2762_p9 = pnand %p2760_p8, %p2757_p7 }
 0xdf7   :  { %2765 = shalt.err (!%p2762_p9)
}
 0xdf8   :  { %2070 = dma.vmem_to_hbm [thread:$0]  %s2068_s14, 32, %s3755_s17, [#allocation9]   ;;  %v1826_v30 = vld [vmem:[%s3753_s15] sm:$0x3] }
 0xdf9   :  { %v1831_v33 = vrot.slane %v1826_v30, %v3068_v54  ;;  %v1835_v34 = vrot.slane %v1826_v30, %v3073_v56  ;;  %s2805_s10 = smov [#allocation7]  }
 0xdfa   :  { %s2057_s12 = sshll.u32 %s2805_s10, 4  ;;  %s2058_s12 = int_to_ptr.vmem [resolvable:$true] %s2057_s12 }
 0xdfb   :  { %s2766_s17 = scalar_lea.vmem %s2058_s12, 64  ;;  %p2771_p11 = scmp.lt.s32.totalorder %s2058_s12, %s2058_s12 }
 0xdfc   :  { %p2767_p10 = scmp.ne.s32.totalorder %s2058_s12, %s2766_s17  ;;  %p2772_p12 = scmp.lt.s32.totalorder %s2766_s17, %s2766_s17 }
 0xdfe   :  { %p2773_p13 = por %p2772_p12, %p2771_p11 }
 0xe00   :  { %p2774_p0 = pnand %p2773_p13, %p2767_p10 }
 0xec3   :  { %v2032_v35 = vpop.f32.mrb[24].mxu1 }
 0xec4   :  { %v2033_v36 = vadd.f32 %v2032_v35, %v1831_v33  ;;  %v2034_v37 = vpop.f32.mrb[25].mxu1 }
 0xec5   :  { %v2035_v41 = vadd.f32 %v2034_v37, %v1835_v34  ;;  %v2036_v59 = vpop.f32.mrb[26].mxu1 }
 0xec6   :  { %v2037_v17 = vpop.f32.mrb[27].mxu1 }
 0xec7   :  { %v2041_v44 = vcombine.low %v2033_v36, %v2035_v41 }
 0xec9   :  { %2203 = vst.sshfl [vmem:[#allocation7] sm:$0x33 pattern:$0x76325410] %v2041_v44 }
 0xeca   :  { %2777 = shalt.err (!%p2774_p0)
}
 0xecb   :  { %s2778_s0 = scalar_lea.hbm %s3754_s16, 64 }
 0xecc   :  { %p2779_p1 = scmp.ne.s32.totalorder %s3754_s16, %s2778_s0  ;;  %p2782_p2 = scmp.lt.u32.totalorder %s2778_s0, %s3754_s16 }
 0xece   :  { %p2784_p3 = pnand %p2782_p2, %p2779_p1 }
 0xed0   :  { %2787 = shalt.err (!%p2784_p3)
}
 0xed1   :  { %2060 = dma.vmem_to_hbm [thread:$0]  %s2058_s12, 64, %s3754_s16, [#allocation4]  }
 0xed2   :  { %2792 = dma.done.wait [#allocation4], 64  }
 0xed3   :  { %2793 = vsyncadd [#allocation4], 4294967232 }
 0xed4   :  { %2794 = dma.done.wait [#allocation9], 32  }
 0xed5   :  { %2795 = vsyncadd [#allocation9], 4294967264 }
 0xed6   :  { %2077 = vsyncpa [#allocation3], 1 }
 0xed7   :  { %2078 = vsyncpa [#allocation6], 1 }
 0xed8   :  { %2079 = vsyncpa [#allocation4], 1 }
 0xed9   :  { %2080 = vsyncpa [#allocation9], 1 }

</bundles_post_ra>
